<compile_context>
chip_gen: v7x
topology: tpu7x:2x2x1
jax: 0.10.0
libtpu: 0.0.40
codegen_flags: <defaults>
</compile_context>

<pallas_src>
import functools

import jax
import jax.numpy as jnp
from jax import lax
from jax.experimental import pallas as pl
from jax.experimental.pallas import tpu as pltpu


def _encoder_layer_kernel(x_ref, wq_ref, wk_ref, wv_ref, wo_ref,
                          w1_ref, b1_ref, w2_ref, b2_ref,
                          g1_ref, be1_ref, g2_ref, be2_ref,
                          *out_and_scratch, block_q, output_attention):
    """One transformer encoder layer, one (batch, query-tile) grid step.

    x_ref:    (1, L, D)        input tile (f32), full sequence for this batch
    y_ref:    (1, block_q, D)  output query tile (f32)
    attn_ref: (1, block_q, L)  softmax attention weights (optional)
    k_sc/v_sc:(L, D) bf16 VMEM scratch, filled once per batch element.
    """
    if output_attention:
        y_ref, attn_ref, k_sc, v_sc = out_and_scratch
    else:
        y_ref, k_sc, v_sc = out_and_scratch
        attn_ref = None

    qi = pl.program_id(1)

    # ---- K / V projections: once per batch element, kept in VMEM scratch ----
    @pl.when(qi == 0)
    def _():
        xw = x_ref[0].astype(jnp.bfloat16)                         # (L, D)
        k_sc[...] = jnp.dot(xw, wk_ref[...],
                            preferred_element_type=jnp.float32).astype(jnp.bfloat16)
        v_sc[...] = jnp.dot(xw, wv_ref[...],
                            preferred_element_type=jnp.float32).astype(jnp.bfloat16)

    # ---- query tile ----
    start = pl.multiple_of(qi * block_q, block_q)
    x_q = x_ref[0, pl.ds(start, block_q), :]                       # (bq, D) f32
    xq_b = x_q.astype(jnp.bfloat16)

    d_model = x_q.shape[-1]
    scale = 1.0 / jnp.sqrt(jnp.float32(d_model))

    # scale folded into q (a (bq, D) pass) rather than the (bq, L) scores.
    q = (jnp.dot(xq_b, wq_ref[...], preferred_element_type=jnp.float32)
         * scale).astype(jnp.bfloat16)                             # (bq, D)

    # scores = q @ k.T, bf16 operands, f32 accumulation.
    scores = lax.dot_general(q, k_sc[...],
                             dimension_numbers=(((1,), (1,)), ((), ())),
                             preferred_element_type=jnp.float32)   # (bq, L)

    # ---- softmax (f32) ----
    m = jnp.max(scores, axis=-1, keepdims=True)
    p = jnp.exp(scores - m)
    denom = jnp.sum(p, axis=-1, keepdims=True)
    attn = p * pl.reciprocal(denom, approx=True)                   # (bq, L)

    ctx = jnp.dot(attn.astype(jnp.bfloat16), v_sc[...],
                  preferred_element_type=jnp.float32)              # (bq, D)
    attn_out = jnp.dot(ctx.astype(jnp.bfloat16), wo_ref[...],
                       preferred_element_type=jnp.float32)         # (bq, D)

    # ---- residual + LayerNorm 1 (fused mean-of-squares variance) ----
    h = x_q + attn_out
    mu = jnp.mean(h, axis=-1, keepdims=True)
    var = jnp.mean(h * h, axis=-1, keepdims=True) - mu * mu
    hn = (h - mu) * lax.rsqrt(var + 1e-5) * g1_ref[...] + be1_ref[...]

    # ---- position-wise FFN (Conv1d k=1 == dense), bf16 matmuls ----
    f = jnp.dot(hn.astype(jnp.bfloat16), w1_ref[...],
                preferred_element_type=jnp.float32) + b1_ref[...]  # (bq, Dff)
    f = jnp.maximum(f, 0.0)
    f = jnp.dot(f.astype(jnp.bfloat16), w2_ref[...],
                preferred_element_type=jnp.float32) + b2_ref[...]  # (bq, D)

    # ---- residual + LayerNorm 2 ----
    o = hn + f
    mu2 = jnp.mean(o, axis=-1, keepdims=True)
    var2 = jnp.mean(o * o, axis=-1, keepdims=True) - mu2 * mu2
    on = (o - mu2) * lax.rsqrt(var2 + 1e-5) * g2_ref[...] + be2_ref[...]

    y_ref[0] = on.astype(y_ref.dtype)
    if output_attention:
        attn_ref[0] = attn.astype(attn_ref.dtype)


def encoder_layer(x, params, *, block_q=128, output_attention=True):
    """Run one Pallas-fused encoder layer on x of shape (B, L, D)."""
    B, L, D = x.shape
    Dff = params["w1"].shape[1]

    bq = block_q if (block_q <= L and L % block_q == 0) else L
    n_q = L // bq

    def full2d(shape):
        return pl.BlockSpec(shape, lambda b, qi: (0, 0))

    in_specs = [
        pl.BlockSpec((1, L, D), lambda b, qi: (b, 0, 0)),           # x (constant over qi)
        full2d((D, D)), full2d((D, D)), full2d((D, D)), full2d((D, D)),  # wq wk wv wo
        full2d((D, Dff)), full2d((1, Dff)),                          # w1, b1
        full2d((Dff, D)), full2d((1, D)),                            # w2, b2
        full2d((1, D)), full2d((1, D)),                              # ln1 gamma, beta
        full2d((1, D)), full2d((1, D)),                              # ln2 gamma, beta
    ]
    out_specs = [pl.BlockSpec((1, bq, D), lambda b, qi: (b, qi, 0))]
    out_shape = [jax.ShapeDtypeStruct((B, L, D), jnp.float32)]
    if output_attention:
        out_specs.append(pl.BlockSpec((1, bq, L), lambda b, qi: (b, qi, 0)))
        out_shape.append(jax.ShapeDtypeStruct((B, L, L), jnp.float32))

    kernel = functools.partial(_encoder_layer_kernel,
                               block_q=bq, output_attention=output_attention)

    fn = pl.pallas_call(
        kernel,
        out_shape=out_shape,
        grid_spec=pltpu.PrefetchScalarGridSpec(
            num_scalar_prefetch=0,
            grid=(B, n_q),
            in_specs=in_specs,
            out_specs=out_specs,
            scratch_shapes=[
                pltpu.VMEM((L, D), jnp.bfloat16),   # K scratch (per batch element)
                pltpu.VMEM((L, D), jnp.bfloat16),   # V scratch
            ],
        ),
        compiler_params=pltpu.CompilerParams(
            # qi axis is "arbitrary": K/V scratch computed at qi==0 is reused
            # across query tiles of the same batch element.
            dimension_semantics=("parallel", "arbitrary"),
            vmem_limit_bytes=48 * 1024 * 1024,      # explicit budget (fits v7x 64 MiB)
        ),
    )
    outs = fn(x,
              params["wq"], params["wk"], params["wv"], params["wo"],
              params["w1"], params["b1"], params["w2"], params["b2"],
              params["g1"], params["be1"], params["g2"], params["be2"])
    if output_attention:
        y, attn = outs
    else:
        y, attn = outs[0], None
    return y, attn


def encoder_stack_forward(x, params_list, inp_lens, *, block_q=128,
                          output_attention=True):
    """Pallas equivalent of EncoderStack.forward.

    x: (B, L, D). For each (i_len, encoder) pair, run the encoder on the last
    L // 2**i_len timesteps, then concatenate the outputs along the seq axis.
    """
    x_stack = []
    attns = []
    for i_len, params in zip(inp_lens, params_list):
        inp_len = x.shape[1] // (2 ** i_len)
        x_s, attn = encoder_layer(x[:, -inp_len:, :], params,
                                  block_q=block_q,
                                  output_attention=output_attention)
        x_stack.append(x_s)
        attns.append(attn)
    x_cat = jnp.concatenate(x_stack, axis=-2)
    return x_cat, attns


def make_encoder_params(key, d_model, d_ff):
    ks = jax.random.split(key, 8)
    s = 0.02
    # Matmul weights stored in bf16 (MXU operands); LN/bias params in f32.
    return {
        "wq": (s * jax.random.normal(ks[0], (d_model, d_model))).astype(jnp.bfloat16),
        "wk": (s * jax.random.normal(ks[1], (d_model, d_model))).astype(jnp.bfloat16),
        "wv": (s * jax.random.normal(ks[2], (d_model, d_model))).astype(jnp.bfloat16),
        "wo": (s * jax.random.normal(ks[3], (d_model, d_model))).astype(jnp.bfloat16),
        "w1": (s * jax.random.normal(ks[4], (d_model, d_ff))).astype(jnp.bfloat16),
        "b1": jnp.zeros((1, d_ff), jnp.float32),
        "w2": (s * jax.random.normal(ks[5], (d_ff, d_model))).astype(jnp.bfloat16),
        "b2": jnp.zeros((1, d_model), jnp.float32),
        "g1": jnp.ones((1, d_model), jnp.float32),
        "be1": jnp.zeros((1, d_model), jnp.float32),
        "g2": jnp.ones((1, d_model), jnp.float32),
        "be2": jnp.zeros((1, d_model), jnp.float32),
    }


if __name__ == "__main__":
    # Small but lane-dense shapes: D and Dff are multiples of 128, L multiple of 8.
    B, L, D, Dff = 2, 32, 128, 256
    inp_lens = [0, 1, 2]          # branch seq lengths: 32, 16, 8
    BLOCK_Q = 16                  # query tile (falls back to L when L < BLOCK_Q)

    key = jax.random.PRNGKey(0)
    kx, kp = jax.random.split(key)
    x = jax.random.normal(kx, (B, L, D), jnp.float32)

    p_keys = jax.random.split(kp, len(inp_lens))
    params_list = [make_encoder_params(k, D, Dff) for k in p_keys]

    fwd = jax.jit(functools.partial(encoder_stack_forward,
                                    inp_lens=inp_lens,
                                    block_q=BLOCK_Q,
                                    output_attention=True))
    x_stack, attns = fwd(x, params_list)
    jax.block_until_ready(x_stack)
    for a in attns:
        jax.block_until_ready(a)

    assert x_stack.shape == (B, sum(L // 2 ** i for i in inp_lens), D)
    assert [a.shape for a in attns] == [(B, L // 2 ** i, L // 2 ** i) for i in inp_lens]
    assert bool(jnp.all(jnp.isfinite(x_stack)))
    print("KERNEL_OK")
</pallas_src>

<mosaic_0001>
module attributes {stable_mosaic.version = 11 : i64} {
  func.func @_encoder_layer_kernel(%arg0: i32, %arg1: i32, %arg2: memref<1x8x128xf32, #tpu.memory_space<vmem>>, %arg3: memref<128x128xbf16, #tpu.memory_space<vmem>>, %arg4: memref<128x128xbf16, #tpu.memory_space<vmem>>, %arg5: memref<128x128xbf16, #tpu.memory_space<vmem>>, %arg6: memref<128x128xbf16, #tpu.memory_space<vmem>>, %arg7: memref<128x256xbf16, #tpu.memory_space<vmem>>, %arg8: memref<1x256xf32, #tpu.memory_space<vmem>>, %arg9: memref<256x128xbf16, #tpu.memory_space<vmem>>, %arg10: memref<1x128xf32, #tpu.memory_space<vmem>>, %arg11: memref<1x128xf32, #tpu.memory_space<vmem>>, %arg12: memref<1x128xf32, #tpu.memory_space<vmem>>, %arg13: memref<1x128xf32, #tpu.memory_space<vmem>>, %arg14: memref<1x128xf32, #tpu.memory_space<vmem>>, %arg15: memref<1x8x128xf32, #tpu.memory_space<vmem>>, %arg16: memref<1x8x8xf32, #tpu.memory_space<vmem>>, %arg17: memref<8x128xbf16, #tpu.memory_space<vmem>>, %arg18: memref<8x128xbf16, #tpu.memory_space<vmem>>) attributes {dimension_semantics = [#tpu.dimension_semantics<parallel>, #tpu.dimension_semantics<arbitrary>], iteration_bounds = array<i64: 2, 1>, scalar_prefetch = 0 : i64, scratch_operands = 2 : i64, tpu.core_type = #tpu.core_type<tc>, window_params = [{transform_indices = @transform_0, window_bounds = array<i64: 1, 8, 128>}, {pipeline_mode = #tpu.pipeline_mode<synchronous>, transform_indices = @transform_1, window_bounds = array<i64: 128, 128>}, {pipeline_mode = #tpu.pipeline_mode<synchronous>, transform_indices = @transform_2, window_bounds = array<i64: 128, 128>}, {pipeline_mode = #tpu.pipeline_mode<synchronous>, transform_indices = @transform_3, window_bounds = array<i64: 128, 128>}, {pipeline_mode = #tpu.pipeline_mode<synchronous>, transform_indices = @transform_4, window_bounds = array<i64: 128, 128>}, {pipeline_mode = #tpu.pipeline_mode<synchronous>, transform_indices = @transform_5, window_bounds = array<i64: 128, 256>}, {pipeline_mode = #tpu.pipeline_mode<synchronous>, transform_indices = @transform_6, window_bounds = array<i64: 1, 256>}, {pipeline_mode = #tpu.pipeline_mode<synchronous>, transform_indices = @transform_7, window_bounds = array<i64: 256, 128>}, {pipeline_mode = #tpu.pipeline_mode<synchronous>, transform_indices = @transform_8, window_bounds = array<i64: 1, 128>}, {pipeline_mode = #tpu.pipeline_mode<synchronous>, transform_indices = @transform_9, window_bounds = array<i64: 1, 128>}, {pipeline_mode = #tpu.pipeline_mode<synchronous>, transform_indices = @transform_10, window_bounds = array<i64: 1, 128>}, {pipeline_mode = #tpu.pipeline_mode<synchronous>, transform_indices = @transform_11, window_bounds = array<i64: 1, 128>}, {pipeline_mode = #tpu.pipeline_mode<synchronous>, transform_indices = @transform_12, window_bounds = array<i64: 1, 128>}, {transform_indices = @transform_13, window_bounds = array<i64: 1, 8, 128>}, {transform_indices = @transform_14, window_bounds = array<i64: 1, 8, 8>}]} {
    %c0_i32 = arith.constant 0 : i32
    %0 = arith.cmpi eq, %arg1, %c0_i32 : i32
    %1 = arith.extui %0 : i1 to i32
    %c0_i32_0 = arith.constant 0 : i32
    %2 = arith.cmpi ne, %1, %c0_i32_0 : i32
    scf.if %2 {
      %c0_52 = arith.constant 0 : index
      %c0_53 = arith.constant 0 : index
      %c0_54 = arith.constant 0 : index
      %104 = vector.load %arg2[%c0_52, %c0_53, %c0_54] : memref<1x8x128xf32, #tpu.memory_space<vmem>>, vector<1x8x128xf32>
      %105 = vector.shape_cast %104 : vector<1x8x128xf32> to vector<8x128xf32>
      %106 = arith.truncf %105 : vector<8x128xf32> to vector<8x128xbf16>
      %c0_55 = arith.constant 0 : index
      %c0_56 = arith.constant 0 : index
      %107 = vector.load %arg4[%c0_55, %c0_56] : memref<128x128xbf16, #tpu.memory_space<vmem>>, vector<128x128xbf16>
      %cst_57 = arith.constant dense<0.000000e+00> : vector<8x128xf32>
      %108 = tpu.matmul %106, %107, %cst_57 {dimension_numbers = #tpu.dot_dimension_numbers<[1], [0], [0], [1], [0, 0, 1, 1], [], []>} : vector<8x128xbf16>, vector<128x128xbf16>, vector<8x128xf32> -> vector<8x128xf32>
      %109 = arith.truncf %108 : vector<8x128xf32> to vector<8x128xbf16>
      %c0_58 = arith.constant 0 : index
      %c0_59 = arith.constant 0 : index
      %110 = vector.load %arg17[%c0_58, %c0_59] : memref<8x128xbf16, #tpu.memory_space<vmem>>, vector<8x128xbf16>
      tpu.vector_store %arg17[%c0_58, %c0_59], %109 {strides = array<i32>} : memref<8x128xbf16, #tpu.memory_space<vmem>>, vector<8x128xbf16>,
      %c0_60 = arith.constant 0 : index
      %c0_61 = arith.constant 0 : index
      %111 = vector.load %arg5[%c0_60, %c0_61] : memref<128x128xbf16, #tpu.memory_space<vmem>>, vector<128x128xbf16>
      %cst_62 = arith.constant dense<0.000000e+00> : vector<8x128xf32>
      %112 = tpu.matmul %106, %111, %cst_62 {dimension_numbers = #tpu.dot_dimension_numbers<[1], [0], [0], [1], [0, 0, 1, 1], [], []>} : vector<8x128xbf16>, vector<128x128xbf16>, vector<8x128xf32> -> vector<8x128xf32>
      %113 = arith.truncf %112 : vector<8x128xf32> to vector<8x128xbf16>
      %c0_63 = arith.constant 0 : index
      %c0_64 = arith.constant 0 : index
      %114 = vector.load %arg18[%c0_63, %c0_64] : memref<8x128xbf16, #tpu.memory_space<vmem>>, vector<8x128xbf16>
      tpu.vector_store %arg18[%c0_63, %c0_64], %113 {strides = array<i32>} : memref<8x128xbf16, #tpu.memory_space<vmem>>, vector<8x128xbf16>,
    } else {
    }
    %c8_i32 = arith.constant 8 : i32
    %3 = arith.muli %arg1, %c8_i32 : i32
    %4 = tpu.assume_multiple %3, 8 : i32
    %c0 = arith.constant 0 : index
    %5 = arith.index_cast %4 : i32 to index
    %c0_1 = arith.constant 0 : index
    %6 = vector.load %arg2[%c0, %5, %c0_1] : memref<1x8x128xf32, #tpu.memory_space<vmem>>, vector<1x8x128xf32>
    %7 = vector.shape_cast %6 : vector<1x8x128xf32> to vector<8x128xf32>
    %8 = arith.truncf %7 : vector<8x128xf32> to vector<8x128xbf16>
    %cst = arith.constant 1.280000e+02 : f32
    %9 = math.sqrt %cst : f32
    %cst_2 = arith.constant 1.000000e+00 : f32
    %10 = arith.divf %cst_2, %9 : f32
    %c0_3 = arith.constant 0 : index
    %c0_4 = arith.constant 0 : index
    %11 = vector.load %arg3[%c0_3, %c0_4] : memref<128x128xbf16, #tpu.memory_space<vmem>>, vector<128x128xbf16>
    %cst_5 = arith.constant dense<0.000000e+00> : vector<8x128xf32>
    %12 = tpu.matmul %8, %11, %cst_5 {dimension_numbers = #tpu.dot_dimension_numbers<[1], [0], [0], [1], [0, 0, 1, 1], [], []>} : vector<8x128xbf16>, vector<128x128xbf16>, vector<8x128xf32> -> vector<8x128xf32>
    %13 = vector.broadcast %10 : f32 to vector<8x128xf32>
    %14 = arith.mulf %12, %13 : vector<8x128xf32>
    %15 = arith.truncf %14 : vector<8x128xf32> to vector<8x128xbf16>
    %c0_6 = arith.constant 0 : index
    %c0_7 = arith.constant 0 : index
    %16 = vector.load %arg17[%c0_6, %c0_7] : memref<8x128xbf16, #tpu.memory_space<vmem>>, vector<8x128xbf16>
    %cst_8 = arith.constant dense<0.000000e+00> : vector<8x8xf32>
    %17 = tpu.matmul %15, %16, %cst_8 {dimension_numbers = #tpu.dot_dimension_numbers<[1], [1], [0], [0], [0, 0, 1, 0], [], []>} : vector<8x128xbf16>, vector<8x128xbf16>, vector<8x8xf32> -> vector<8x8xf32>
    %cst_9 = arith.constant dense<0xFF800000> : vector<8xf32>
    %18 = vector.multi_reduction <maximumf>, %17, %cst_9 [1] : vector<8x8xf32> to vector<8xf32>
    %19 = vector.shape_cast %18 : vector<8xf32> to vector<8x1xf32>
    %20 = vector.broadcast %19 : vector<8x1xf32> to vector<8x8xf32>
    %21 = arith.subf %17, %20 : vector<8x8xf32>
    %22 = math.exp %21 : vector<8x8xf32>
    %cst_10 = arith.constant dense<0.000000e+00> : vector<8xf32>
    %23 = vector.multi_reduction <add>, %22, %cst_10 [1] : vector<8x8xf32> to vector<8xf32>
    %24 = vector.shape_cast %23 : vector<8xf32> to vector<8x1xf32>
    %25 = tpu.reciprocal %24 {approx = true} : vector<8x1xf32> -> vector<8x1xf32>
    %26 = vector.broadcast %25 : vector<8x1xf32> to vector<8x8xf32>
    %27 = arith.mulf %22, %26 : vector<8x8xf32>
    %28 = arith.truncf %27 : vector<8x8xf32> to vector<8x8xbf16>
    %c0_11 = arith.constant 0 : index
    %c0_12 = arith.constant 0 : index
    %29 = vector.load %arg18[%c0_11, %c0_12] : memref<8x128xbf16, #tpu.memory_space<vmem>>, vector<8x128xbf16>
    %cst_13 = arith.constant dense<0.000000e+00> : vector<8x128xf32>
    %30 = tpu.matmul %28, %29, %cst_13 {dimension_numbers = #tpu.dot_dimension_numbers<[1], [0], [0], [1], [0, 0, 1, 1], [], []>} : vector<8x8xbf16>, vector<8x128xbf16>, vector<8x128xf32> -> vector<8x128xf32>
    %31 = arith.truncf %30 : vector<8x128xf32> to vector<8x128xbf16>
    %c0_14 = arith.constant 0 : index
    %c0_15 = arith.constant 0 : index
    %32 = vector.load %arg6[%c0_14, %c0_15] : memref<128x128xbf16, #tpu.memory_space<vmem>>, vector<128x128xbf16>
    %cst_16 = arith.constant dense<0.000000e+00> : vector<8x128xf32>
    %33 = tpu.matmul %31, %32, %cst_16 {dimension_numbers = #tpu.dot_dimension_numbers<[1], [0], [0], [1], [0, 0, 1, 1], [], []>} : vector<8x128xbf16>, vector<128x128xbf16>, vector<8x128xf32> -> vector<8x128xf32>
    %34 = arith.addf %7, %33 : vector<8x128xf32>
    %cst_17 = arith.constant dense<0.000000e+00> : vector<8xf32>
    %35 = vector.multi_reduction <add>, %34, %cst_17 [1] : vector<8x128xf32> to vector<8xf32>
    %36 = vector.shape_cast %35 : vector<8xf32> to vector<8x1xf32>
    %cst_18 = arith.constant 1.280000e+02 : f32
    %37 = vector.broadcast %cst_18 : f32 to vector<8x1xf32>
    %38 = arith.divf %36, %37 : vector<8x1xf32>
    %39 = arith.mulf %34, %34 : vector<8x128xf32>
    %cst_19 = arith.constant dense<0.000000e+00> : vector<8xf32>
    %40 = vector.multi_reduction <add>, %39, %cst_19 [1] : vector<8x128xf32> to vector<8xf32>
    %41 = vector.shape_cast %40 : vector<8xf32> to vector<8x1xf32>
    %cst_20 = arith.constant 1.280000e+02 : f32
    %42 = vector.broadcast %cst_20 : f32 to vector<8x1xf32>
    %43 = arith.divf %41, %42 : vector<8x1xf32>
    %44 = arith.mulf %38, %38 : vector<8x1xf32>
    %45 = arith.subf %43, %44 : vector<8x1xf32>
    %46 = vector.broadcast %38 : vector<8x1xf32> to vector<8x128xf32>
    %47 = arith.subf %34, %46 : vector<8x128xf32>
    %cst_21 = arith.constant 9.99999974E-6 : f32
    %48 = vector.broadcast %cst_21 : f32 to vector<8x1xf32>
    %49 = arith.addf %45, %48 : vector<8x1xf32>
    %50 = math.rsqrt %49 : vector<8x1xf32>
    %51 = vector.broadcast %50 : vector<8x1xf32> to vector<8x128xf32>
    %52 = arith.mulf %47, %51 : vector<8x128xf32>
    %c0_22 = arith.constant 0 : index
    %c0_23 = arith.constant 0 : index
    %53 = vector.load %arg11[%c0_22, %c0_23] : memref<1x128xf32, #tpu.memory_space<vmem>>, vector<1x128xf32>
    %54 = vector.broadcast %53 : vector<1x128xf32> to vector<8x128xf32>
    %55 = arith.mulf %52, %54 : vector<8x128xf32>
    %c0_24 = arith.constant 0 : index
    %c0_25 = arith.constant 0 : index
    %56 = vector.load %arg12[%c0_24, %c0_25] : memref<1x128xf32, #tpu.memory_space<vmem>>, vector<1x128xf32>
    %57 = vector.broadcast %56 : vector<1x128xf32> to vector<8x128xf32>
    %58 = arith.addf %55, %57 : vector<8x128xf32>
    %59 = arith.truncf %58 : vector<8x128xf32> to vector<8x128xbf16>
    %c0_26 = arith.constant 0 : index
    %c0_27 = arith.constant 0 : index
    %60 = vector.load %arg7[%c0_26, %c0_27] : memref<128x256xbf16, #tpu.memory_space<vmem>>, vector<128x256xbf16>
    %cst_28 = arith.constant dense<0.000000e+00> : vector<8x256xf32>
    %61 = tpu.matmul %59, %60, %cst_28 {dimension_numbers = #tpu.dot_dimension_numbers<[1], [0], [0], [1], [0, 0, 1, 1], [], []>} : vector<8x128xbf16>, vector<128x256xbf16>, vector<8x256xf32> -> vector<8x256xf32>
    %c0_29 = arith.constant 0 : index
    %c0_30 = arith.constant 0 : index
    %62 = vector.load %arg8[%c0_29, %c0_30] : memref<1x256xf32, #tpu.memory_space<vmem>>, vector<1x256xf32>
    %63 = vector.broadcast %62 : vector<1x256xf32> to vector<8x256xf32>
    %64 = arith.addf %61, %63 : vector<8x256xf32>
    %cst_31 = arith.constant 0.000000e+00 : f32
    %65 = vector.broadcast %cst_31 : f32 to vector<8x256xf32>
    %66 = arith.maximumf %64, %65 : vector<8x256xf32>
    %67 = arith.truncf %66 : vector<8x256xf32> to vector<8x256xbf16>
    %c0_32 = arith.constant 0 : index
    %c0_33 = arith.constant 0 : index
    %68 = vector.load %arg9[%c0_32, %c0_33] : memref<256x128xbf16, #tpu.memory_space<vmem>>, vector<256x128xbf16>
    %cst_34 = arith.constant dense<0.000000e+00> : vector<8x128xf32>
    %69 = tpu.matmul %67, %68, %cst_34 {dimension_numbers = #tpu.dot_dimension_numbers<[1], [0], [0], [1], [0, 0, 1, 1], [], []>} : vector<8x256xbf16>, vector<256x128xbf16>, vector<8x128xf32> -> vector<8x128xf32>
    %c0_35 = arith.constant 0 : index
    %c0_36 = arith.constant 0 : index
    %70 = vector.load %arg10[%c0_35, %c0_36] : memref<1x128xf32, #tpu.memory_space<vmem>>, vector<1x128xf32>
    %71 = vector.broadcast %70 : vector<1x128xf32> to vector<8x128xf32>
    %72 = arith.addf %69, %71 : vector<8x128xf32>
    %73 = arith.addf %58, %72 : vector<8x128xf32>
    %cst_37 = arith.constant dense<0.000000e+00> : vector<8xf32>
    %74 = vector.multi_reduction <add>, %73, %cst_37 [1] : vector<8x128xf32> to vector<8xf32>
    %75 = vector.shape_cast %74 : vector<8xf32> to vector<8x1xf32>
    %cst_38 = arith.constant 1.280000e+02 : f32
    %76 = vector.broadcast %cst_38 : f32 to vector<8x1xf32>
    %77 = arith.divf %75, %76 : vector<8x1xf32>
    %78 = arith.mulf %73, %73 : vector<8x128xf32>
    %cst_39 = arith.constant dense<0.000000e+00> : vector<8xf32>
    %79 = vector.multi_reduction <add>, %78, %cst_39 [1] : vector<8x128xf32> to vector<8xf32>
    %80 = vector.shape_cast %79 : vector<8xf32> to vector<8x1xf32>
    %cst_40 = arith.constant 1.280000e+02 : f32
    %81 = vector.broadcast %cst_40 : f32 to vector<8x1xf32>
    %82 = arith.divf %80, %81 : vector<8x1xf32>
    %83 = arith.mulf %77, %77 : vector<8x1xf32>
    %84 = arith.subf %82, %83 : vector<8x1xf32>
    %85 = vector.broadcast %77 : vector<8x1xf32> to vector<8x128xf32>
    %86 = arith.subf %73, %85 : vector<8x128xf32>
    %cst_41 = arith.constant 9.99999974E-6 : f32
    %87 = vector.broadcast %cst_41 : f32 to vector<8x1xf32>
    %88 = arith.addf %84, %87 : vector<8x1xf32>
    %89 = math.rsqrt %88 : vector<8x1xf32>
    %90 = vector.broadcast %89 : vector<8x1xf32> to vector<8x128xf32>
    %91 = arith.mulf %86, %90 : vector<8x128xf32>
    %c0_42 = arith.constant 0 : index
    %c0_43 = arith.constant 0 : index
    %92 = vector.load %arg13[%c0_42, %c0_43] : memref<1x128xf32, #tpu.memory_space<vmem>>, vector<1x128xf32>
    %93 = vector.broadcast %92 : vector<1x128xf32> to vector<8x128xf32>
    %94 = arith.mulf %91, %93 : vector<8x128xf32>
    %c0_44 = arith.constant 0 : index
    %c0_45 = arith.constant 0 : index
    %95 = vector.load %arg14[%c0_44, %c0_45] : memref<1x128xf32, #tpu.memory_space<vmem>>, vector<1x128xf32>
    %96 = vector.broadcast %95 : vector<1x128xf32> to vector<8x128xf32>
    %97 = arith.addf %94, %96 : vector<8x128xf32>
    %c0_46 = arith.constant 0 : index
    %c0_47 = arith.constant 0 : index
    %c0_48 = arith.constant 0 : index
    %98 = vector.load %arg15[%c0_46, %c0_47, %c0_48] : memref<1x8x128xf32, #tpu.memory_space<vmem>>, vector<1x8x128xf32>
    %99 = vector.shape_cast %98 : vector<1x8x128xf32> to vector<8x128xf32>
    %100 = vector.shape_cast %97 : vector<8x128xf32> to vector<1x8x128xf32>
    tpu.vector_store %arg15[%c0_46, %c0_47, %c0_48], %100 {strides = array<i32>} : memref<1x8x128xf32, #tpu.memory_space<vmem>>, vector<1x8x128xf32>,
    %c0_49 = arith.constant 0 : index
    %c0_50 = arith.constant 0 : index
    %c0_51 = arith.constant 0 : index
    %101 = vector.load %arg16[%c0_49, %c0_50, %c0_51] : memref<1x8x8xf32, #tpu.memory_space<vmem>>, vector<1x8x8xf32>
    %102 = vector.shape_cast %101 : vector<1x8x8xf32> to vector<8x8xf32>
    %103 = vector.shape_cast %27 : vector<8x8xf32> to vector<1x8x8xf32>
    tpu.vector_store %arg16[%c0_49, %c0_50, %c0_51], %103 {strides = array<i32>} : memref<1x8x8xf32, #tpu.memory_space<vmem>>, vector<1x8x8xf32>,
    return
  }
  func.func @transform_0(%arg0: i32, %arg1: i32) -> (i32, i32, i32) {
    %c0_i32 = arith.constant 0 : i32
    %c0_i32_0 = arith.constant 0 : i32
    %c0_i32_1 = arith.constant 0 : i32
    return %arg0, %c0_i32, %c0_i32_0 : i32, i32, i32
  }
  func.func @transform_1(%arg0: i32, %arg1: i32) -> (i32, i32) {
    %c0_i32 = arith.constant 0 : i32
    %c0_i32_0 = arith.constant 0 : i32
    %c0_i32_1 = arith.constant 0 : i32
    return %c0_i32, %c0_i32_0 : i32, i32
  }
  func.func @transform_2(%arg0: i32, %arg1: i32) -> (i32, i32) {
    %c0_i32 = arith.constant 0 : i32
    %c0_i32_0 = arith.constant 0 : i32
    %c0_i32_1 = arith.constant 0 : i32
    return %c0_i32, %c0_i32_0 : i32, i32
  }
  func.func @transform_3(%arg0: i32, %arg1: i32) -> (i32, i32) {
    %c0_i32 = arith.constant 0 : i32
    %c0_i32_0 = arith.constant 0 : i32
    %c0_i32_1 = arith.constant 0 : i32
    return %c0_i32, %c0_i32_0 : i32, i32
  }
  func.func @transform_4(%arg0: i32, %arg1: i32) -> (i32, i32) {
    %c0_i32 = arith.constant 0 : i32
    %c0_i32_0 = arith.constant 0 : i32
    %c0_i32_1 = arith.constant 0 : i32
    return %c0_i32, %c0_i32_0 : i32, i32
  }
  func.func @transform_5(%arg0: i32, %arg1: i32) -> (i32, i32) {
    %c0_i32 = arith.constant 0 : i32
    %c0_i32_0 = arith.constant 0 : i32
    %c0_i32_1 = arith.constant 0 : i32
    return %c0_i32, %c0_i32_0 : i32, i32
  }
  func.func @transform_6(%arg0: i32, %arg1: i32) -> (i32, i32) {
    %c0_i32 = arith.constant 0 : i32
    %c0_i32_0 = arith.constant 0 : i32
    %c0_i32_1 = arith.constant 0 : i32
    return %c0_i32, %c0_i32_0 : i32, i32
  }
  func.func @transform_7(%arg0: i32, %arg1: i32) -> (i32, i32) {
    %c0_i32 = arith.constant 0 : i32
    %c0_i32_0 = arith.constant 0 : i32
    %c0_i32_1 = arith.constant 0 : i32
    return %c0_i32, %c0_i32_0 : i32, i32
  }
  func.func @transform_8(%arg0: i32, %arg1: i32) -> (i32, i32) {
    %c0_i32 = arith.constant 0 : i32
    %c0_i32_0 = arith.constant 0 : i32
    %c0_i32_1 = arith.constant 0 : i32
    return %c0_i32, %c0_i32_0 : i32, i32
  }
  func.func @transform_9(%arg0: i32, %arg1: i32) -> (i32, i32) {
    %c0_i32 = arith.constant 0 : i32
    %c0_i32_0 = arith.constant 0 : i32
    %c0_i32_1 = arith.constant 0 : i32
    return %c0_i32, %c0_i32_0 : i32, i32
  }
  func.func @transform_10(%arg0: i32, %arg1: i32) -> (i32, i32) {
    %c0_i32 = arith.constant 0 : i32
    %c0_i32_0 = arith.constant 0 : i32
    %c0_i32_1 = arith.constant 0 : i32
    return %c0_i32, %c0_i32_0 : i32, i32
  }
  func.func @transform_11(%arg0: i32, %arg1: i32) -> (i32, i32) {
    %c0_i32 = arith.constant 0 : i32
    %c0_i32_0 = arith.constant 0 : i32
    %c0_i32_1 = arith.constant 0 : i32
    return %c0_i32, %c0_i32_0 : i32, i32
  }
  func.func @transform_12(%arg0: i32, %arg1: i32) -> (i32, i32) {
    %c0_i32 = arith.constant 0 : i32
    %c0_i32_0 = arith.constant 0 : i32
    %c0_i32_1 = arith.constant 0 : i32
    return %c0_i32, %c0_i32_0 : i32, i32
  }
  func.func @transform_13(%arg0: i32, %arg1: i32) -> (i32, i32, i32) {
    %c0_i32 = arith.constant 0 : i32
    %c0_i32_0 = arith.constant 0 : i32
    return %arg0, %arg1, %c0_i32 : i32, i32, i32
  }
  func.func @transform_14(%arg0: i32, %arg1: i32) -> (i32, i32, i32) {
    %c0_i32 = arith.constant 0 : i32
    %c0_i32_0 = arith.constant 0 : i32
    return %arg0, %arg1, %c0_i32 : i32, i32, i32
  }
}

module attributes {stable_mosaic.version = 11 : i64} {
  func.func @_encoder_layer_kernel(%arg0: i32, %arg1: i32, %arg2: memref<1x32x128xf32, #tpu.memory_space<vmem>>, %arg3: memref<128x128xbf16, #tpu.memory_space<vmem>>, %arg4: memref<128x128xbf16, #tpu.memory_space<vmem>>, %arg5: memref<128x128xbf16, #tpu.memory_space<vmem>>, %arg6: memref<128x128xbf16, #tpu.memory_space<vmem>>, %arg7: memref<128x256xbf16, #tpu.memory_space<vmem>>, %arg8: memref<1x256xf32, #tpu.memory_space<vmem>>, %arg9: memref<256x128xbf16, #tpu.memory_space<vmem>>, %arg10: memref<1x128xf32, #tpu.memory_space<vmem>>, %arg11: memref<1x128xf32, #tpu.memory_space<vmem>>, %arg12: memref<1x128xf32, #tpu.memory_space<vmem>>, %arg13: memref<1x128xf32, #tpu.memory_space<vmem>>, %arg14: memref<1x128xf32, #tpu.memory_space<vmem>>, %arg15: memref<1x16x128xf32, #tpu.memory_space<vmem>>, %arg16: memref<1x16x32xf32, #tpu.memory_space<vmem>>, %arg17: memref<32x128xbf16, #tpu.memory_space<vmem>>, %arg18: memref<32x128xbf16, #tpu.memory_space<vmem>>) attributes {dimension_semantics = [#tpu.dimension_semantics<parallel>, #tpu.dimension_semantics<arbitrary>], iteration_bounds = array<i64: 2, 2>, scalar_prefetch = 0 : i64, scratch_operands = 2 : i64, tpu.core_type = #tpu.core_type<tc>, window_params = [{transform_indices = @transform_0, window_bounds = array<i64: 1, 32, 128>}, {pipeline_mode = #tpu.pipeline_mode<synchronous>, transform_indices = @transform_1, window_bounds = array<i64: 128, 128>}, {pipeline_mode = #tpu.pipeline_mode<synchronous>, transform_indices = @transform_2, window_bounds = array<i64: 128, 128>}, {pipeline_mode = #tpu.pipeline_mode<synchronous>, transform_indices = @transform_3, window_bounds = array<i64: 128, 128>}, {pipeline_mode = #tpu.pipeline_mode<synchronous>, transform_indices = @transform_4, window_bounds = array<i64: 128, 128>}, {pipeline_mode = #tpu.pipeline_mode<synchronous>, transform_indices = @transform_5, window_bounds = array<i64: 128, 256>}, {pipeline_mode = #tpu.pipeline_mode<synchronous>, transform_indices = @transform_6, window_bounds = array<i64: 1, 256>}, {pipeline_mode = #tpu.pipeline_mode<synchronous>, transform_indices = @transform_7, window_bounds = array<i64: 256, 128>}, {pipeline_mode = #tpu.pipeline_mode<synchronous>, transform_indices = @transform_8, window_bounds = array<i64: 1, 128>}, {pipeline_mode = #tpu.pipeline_mode<synchronous>, transform_indices = @transform_9, window_bounds = array<i64: 1, 128>}, {pipeline_mode = #tpu.pipeline_mode<synchronous>, transform_indices = @transform_10, window_bounds = array<i64: 1, 128>}, {pipeline_mode = #tpu.pipeline_mode<synchronous>, transform_indices = @transform_11, window_bounds = array<i64: 1, 128>}, {pipeline_mode = #tpu.pipeline_mode<synchronous>, transform_indices = @transform_12, window_bounds = array<i64: 1, 128>}, {transform_indices = @transform_13, window_bounds = array<i64: 1, 16, 128>}, {transform_indices = @transform_14, window_bounds = array<i64: 1, 16, 32>}]} {
    %c0_i32 = arith.constant 0 : i32
    %0 = arith.cmpi eq, %arg1, %c0_i32 : i32
    %1 = arith.extui %0 : i1 to i32
    %c0_i32_0 = arith.constant 0 : i32
    %2 = arith.cmpi ne, %1, %c0_i32_0 : i32
    scf.if %2 {
      %c0_52 = arith.constant 0 : index
      %c0_53 = arith.constant 0 : index
      %c0_54 = arith.constant 0 : index
      %104 = vector.load %arg2[%c0_52, %c0_53, %c0_54] : memref<1x32x128xf32, #tpu.memory_space<vmem>>, vector<1x32x128xf32>
      %105 = vector.shape_cast %104 : vector<1x32x128xf32> to vector<32x128xf32>
      %106 = arith.truncf %105 : vector<32x128xf32> to vector<32x128xbf16>
      %c0_55 = arith.constant 0 : index
      %c0_56 = arith.constant 0 : index
      %107 = vector.load %arg4[%c0_55, %c0_56] : memref<128x128xbf16, #tpu.memory_space<vmem>>, vector<128x128xbf16>
      %cst_57 = arith.constant dense<0.000000e+00> : vector<32x128xf32>
      %108 = tpu.matmul %106, %107, %cst_57 {dimension_numbers = #tpu.dot_dimension_numbers<[1], [0], [0], [1], [0, 0, 1, 1], [], []>} : vector<32x128xbf16>, vector<128x128xbf16>, vector<32x128xf32> -> vector<32x128xf32>
      %109 = arith.truncf %108 : vector<32x128xf32> to vector<32x128xbf16>
      %c0_58 = arith.constant 0 : index
      %c0_59 = arith.constant 0 : index
      %110 = vector.load %arg17[%c0_58, %c0_59] : memref<32x128xbf16, #tpu.memory_space<vmem>>, vector<32x128xbf16>
      tpu.vector_store %arg17[%c0_58, %c0_59], %109 {strides = array<i32>} : memref<32x128xbf16, #tpu.memory_space<vmem>>, vector<32x128xbf16>,
      %c0_60 = arith.constant 0 : index
      %c0_61 = arith.constant 0 : index
      %111 = vector.load %arg5[%c0_60, %c0_61] : memref<128x128xbf16, #tpu.memory_space<vmem>>, vector<128x128xbf16>
      %cst_62 = arith.constant dense<0.000000e+00> : vector<32x128xf32>
      %112 = tpu.matmul %106, %111, %cst_62 {dimension_numbers = #tpu.dot_dimension_numbers<[1], [0], [0], [1], [0, 0, 1, 1], [], []>} : vector<32x128xbf16>, vector<128x128xbf16>, vector<32x128xf32> -> vector<32x128xf32>
      %113 = arith.truncf %112 : vector<32x128xf32> to vector<32x128xbf16>
      %c0_63 = arith.constant 0 : index
      %c0_64 = arith.constant 0 : index
      %114 = vector.load %arg18[%c0_63, %c0_64] : memref<32x128xbf16, #tpu.memory_space<vmem>>, vector<32x128xbf16>
      tpu.vector_store %arg18[%c0_63, %c0_64], %113 {strides = array<i32>} : memref<32x128xbf16, #tpu.memory_space<vmem>>, vector<32x128xbf16>,
    } else {
    }
    %c16_i32 = arith.constant 16 : i32
    %3 = arith.muli %arg1, %c16_i32 : i32
    %4 = tpu.assume_multiple %3, 16 : i32
    %c0 = arith.constant 0 : index
    %5 = arith.index_cast %4 : i32 to index
    %c0_1 = arith.constant 0 : index
    %6 = vector.load %arg2[%c0, %5, %c0_1] : memref<1x32x128xf32, #tpu.memory_space<vmem>>, vector<1x16x128xf32>
    %7 = vector.shape_cast %6 : vector<1x16x128xf32> to vector<16x128xf32>
    %8 = arith.truncf %7 : vector<16x128xf32> to vector<16x128xbf16>
    %cst = arith.constant 1.280000e+02 : f32
    %9 = math.sqrt %cst : f32
    %cst_2 = arith.constant 1.000000e+00 : f32
    %10 = arith.divf %cst_2, %9 : f32
    %c0_3 = arith.constant 0 : index
    %c0_4 = arith.constant 0 : index
    %11 = vector.load %arg3[%c0_3, %c0_4] : memref<128x128xbf16, #tpu.memory_space<vmem>>, vector<128x128xbf16>
    %cst_5 = arith.constant dense<0.000000e+00> : vector<16x128xf32>
    %12 = tpu.matmul %8, %11, %cst_5 {dimension_numbers = #tpu.dot_dimension_numbers<[1], [0], [0], [1], [0, 0, 1, 1], [], []>} : vector<16x128xbf16>, vector<128x128xbf16>, vector<16x128xf32> -> vector<16x128xf32>
    %13 = vector.broadcast %10 : f32 to vector<16x128xf32>
    %14 = arith.mulf %12, %13 : vector<16x128xf32>
    %15 = arith.truncf %14 : vector<16x128xf32> to vector<16x128xbf16>
    %c0_6 = arith.constant 0 : index
    %c0_7 = arith.constant 0 : index
    %16 = vector.load %arg17[%c0_6, %c0_7] : memref<32x128xbf16, #tpu.memory_space<vmem>>, vector<32x128xbf16>
    %cst_8 = arith.constant dense<0.000000e+00> : vector<16x32xf32>
    %17 = tpu.matmul %15, %16, %cst_8 {dimension_numbers = #tpu.dot_dimension_numbers<[1], [1], [0], [0], [0, 0, 1, 0], [], []>} : vector<16x128xbf16>, vector<32x128xbf16>, vector<16x32xf32> -> vector<16x32xf32>
    %cst_9 = arith.constant dense<0xFF800000> : vector<16xf32>
    %18 = vector.multi_reduction <maximumf>, %17, %cst_9 [1] : vector<16x32xf32> to vector<16xf32>
    %19 = vector.shape_cast %18 : vector<16xf32> to vector<16x1xf32>
    %20 = vector.broadcast %19 : vector<16x1xf32> to vector<16x32xf32>
    %21 = arith.subf %17, %20 : vector<16x32xf32>
    %22 = math.exp %21 : vector<16x32xf32>
    %cst_10 = arith.constant dense<0.000000e+00> : vector<16xf32>
    %23 = vector.multi_reduction <add>, %22, %cst_10 [1] : vector<16x32xf32> to vector<16xf32>
    %24 = vector.shape_cast %23 : vector<16xf32> to vector<16x1xf32>
    %25 = tpu.reciprocal %24 {approx = true} : vector<16x1xf32> -> vector<16x1xf32>
    %26 = vector.broadcast %25 : vector<16x1xf32> to vector<16x32xf32>
    %27 = arith.mulf %22, %26 : vector<16x32xf32>
    %28 = arith.truncf %27 : vector<16x32xf32> to vector<16x32xbf16>
    %c0_11 = arith.constant 0 : index
    %c0_12 = arith.constant 0 : index
    %29 = vector.load %arg18[%c0_11, %c0_12] : memref<32x128xbf16, #tpu.memory_space<vmem>>, vector<32x128xbf16>
    %cst_13 = arith.constant dense<0.000000e+00> : vector<16x128xf32>
    %30 = tpu.matmul %28, %29, %cst_13 {dimension_numbers = #tpu.dot_dimension_numbers<[1], [0], [0], [1], [0, 0, 1, 1], [], []>} : vector<16x32xbf16>, vector<32x128xbf16>, vector<16x128xf32> -> vector<16x128xf32>
    %31 = arith.truncf %30 : vector<16x128xf32> to vector<16x128xbf16>
    %c0_14 = arith.constant 0 : index
    %c0_15 = arith.constant 0 : index
    %32 = vector.load %arg6[%c0_14, %c0_15] : memref<128x128xbf16, #tpu.memory_space<vmem>>, vector<128x128xbf16>
    %cst_16 = arith.constant dense<0.000000e+00> : vector<16x128xf32>
    %33 = tpu.matmul %31, %32, %cst_16 {dimension_numbers = #tpu.dot_dimension_numbers<[1], [0], [0], [1], [0, 0, 1, 1], [], []>} : vector<16x128xbf16>, vector<128x128xbf16>, vector<16x128xf32> -> vector<16x128xf32>
    %34 = arith.addf %7, %33 : vector<16x128xf32>
    %cst_17 = arith.constant dense<0.000000e+00> : vector<16xf32>
    %35 = vector.multi_reduction <add>, %34, %cst_17 [1] : vector<16x128xf32> to vector<16xf32>
    %36 = vector.shape_cast %35 : vector<16xf32> to vector<16x1xf32>
    %cst_18 = arith.constant 1.280000e+02 : f32
    %37 = vector.broadcast %cst_18 : f32 to vector<16x1xf32>
    %38 = arith.divf %36, %37 : vector<16x1xf32>
    %39 = arith.mulf %34, %34 : vector<16x128xf32>
    %cst_19 = arith.constant dense<0.000000e+00> : vector<16xf32>
    %40 = vector.multi_reduction <add>, %39, %cst_19 [1] : vector<16x128xf32> to vector<16xf32>
    %41 = vector.shape_cast %40 : vector<16xf32> to vector<16x1xf32>
    %cst_20 = arith.constant 1.280000e+02 : f32
    %42 = vector.broadcast %cst_20 : f32 to vector<16x1xf32>
    %43 = arith.divf %41, %42 : vector<16x1xf32>
    %44 = arith.mulf %38, %38 : vector<16x1xf32>
    %45 = arith.subf %43, %44 : vector<16x1xf32>
    %46 = vector.broadcast %38 : vector<16x1xf32> to vector<16x128xf32>
    %47 = arith.subf %34, %46 : vector<16x128xf32>
    %cst_21 = arith.constant 9.99999974E-6 : f32
    %48 = vector.broadcast %cst_21 : f32 to vector<16x1xf32>
    %49 = arith.addf %45, %48 : vector<16x1xf32>
    %50 = math.rsqrt %49 : vector<16x1xf32>
    %51 = vector.broadcast %50 : vector<16x1xf32> to vector<16x128xf32>
    %52 = arith.mulf %47, %51 : vector<16x128xf32>
    %c0_22 = arith.constant 0 : index
    %c0_23 = arith.constant 0 : index
    %53 = vector.load %arg11[%c0_22, %c0_23] : memref<1x128xf32, #tpu.memory_space<vmem>>, vector<1x128xf32>
    %54 = vector.broadcast %53 : vector<1x128xf32> to vector<16x128xf32>
    %55 = arith.mulf %52, %54 : vector<16x128xf32>
    %c0_24 = arith.constant 0 : index
    %c0_25 = arith.constant 0 : index
    %56 = vector.load %arg12[%c0_24, %c0_25] : memref<1x128xf32, #tpu.memory_space<vmem>>, vector<1x128xf32>
    %57 = vector.broadcast %56 : vector<1x128xf32> to vector<16x128xf32>
    %58 = arith.addf %55, %57 : vector<16x128xf32>
    %59 = arith.truncf %58 : vector<16x128xf32> to vector<16x128xbf16>
    %c0_26 = arith.constant 0 : index
    %c0_27 = arith.constant 0 : index
    %60 = vector.load %arg7[%c0_26, %c0_27] : memref<128x256xbf16, #tpu.memory_space<vmem>>, vector<128x256xbf16>
    %cst_28 = arith.constant dense<0.000000e+00> : vector<16x256xf32>
    %61 = tpu.matmul %59, %60, %cst_28 {dimension_numbers = #tpu.dot_dimension_numbers<[1], [0], [0], [1], [0, 0, 1, 1], [], []>} : vector<16x128xbf16>, vector<128x256xbf16>, vector<16x256xf32> -> vector<16x256xf32>
    %c0_29 = arith.constant 0 : index
    %c0_30 = arith.constant 0 : index
    %62 = vector.load %arg8[%c0_29, %c0_30] : memref<1x256xf32, #tpu.memory_space<vmem>>, vector<1x256xf32>
    %63 = vector.broadcast %62 : vector<1x256xf32> to vector<16x256xf32>
    %64 = arith.addf %61, %63 : vector<16x256xf32>
    %cst_31 = arith.constant 0.000000e+00 : f32
    %65 = vector.broadcast %cst_31 : f32 to vector<16x256xf32>
    %66 = arith.maximumf %64, %65 : vector<16x256xf32>
    %67 = arith.truncf %66 : vector<16x256xf32> to vector<16x256xbf16>
    %c0_32 = arith.constant 0 : index
    %c0_33 = arith.constant 0 : index
    %68 = vector.load %arg9[%c0_32, %c0_33] : memref<256x128xbf16, #tpu.memory_space<vmem>>, vector<256x128xbf16>
    %cst_34 = arith.constant dense<0.000000e+00> : vector<16x128xf32>
    %69 = tpu.matmul %67, %68, %cst_34 {dimension_numbers = #tpu.dot_dimension_numbers<[1], [0], [0], [1], [0, 0, 1, 1], [], []>} : vector<16x256xbf16>, vector<256x128xbf16>, vector<16x128xf32> -> vector<16x128xf32>
    %c0_35 = arith.constant 0 : index
    %c0_36 = arith.constant 0 : index
    %70 = vector.load %arg10[%c0_35, %c0_36] : memref<1x128xf32, #tpu.memory_space<vmem>>, vector<1x128xf32>
    %71 = vector.broadcast %70 : vector<1x128xf32> to vector<16x128xf32>
    %72 = arith.addf %69, %71 : vector<16x128xf32>
    %73 = arith.addf %58, %72 : vector<16x128xf32>
    %cst_37 = arith.constant dense<0.000000e+00> : vector<16xf32>
    %74 = vector.multi_reduction <add>, %73, %cst_37 [1] : vector<16x128xf32> to vector<16xf32>
    %75 = vector.shape_cast %74 : vector<16xf32> to vector<16x1xf32>
    %cst_38 = arith.constant 1.280000e+02 : f32
    %76 = vector.broadcast %cst_38 : f32 to vector<16x1xf32>
    %77 = arith.divf %75, %76 : vector<16x1xf32>
    %78 = arith.mulf %73, %73 : vector<16x128xf32>
    %cst_39 = arith.constant dense<0.000000e+00> : vector<16xf32>
    %79 = vector.multi_reduction <add>, %78, %cst_39 [1] : vector<16x128xf32> to vector<16xf32>
    %80 = vector.shape_cast %79 : vector<16xf32> to vector<16x1xf32>
    %cst_40 = arith.constant 1.280000e+02 : f32
    %81 = vector.broadcast %cst_40 : f32 to vector<16x1xf32>
    %82 = arith.divf %80, %81 : vector<16x1xf32>
    %83 = arith.mulf %77, %77 : vector<16x1xf32>
    %84 = arith.subf %82, %83 : vector<16x1xf32>
    %85 = vector.broadcast %77 : vector<16x1xf32> to vector<16x128xf32>
    %86 = arith.subf %73, %85 : vector<16x128xf32>
    %cst_41 = arith.constant 9.99999974E-6 : f32
    %87 = vector.broadcast %cst_41 : f32 to vector<16x1xf32>
    %88 = arith.addf %84, %87 : vector<16x1xf32>
    %89 = math.rsqrt %88 : vector<16x1xf32>
    %90 = vector.broadcast %89 : vector<16x1xf32> to vector<16x128xf32>
    %91 = arith.mulf %86, %90 : vector<16x128xf32>
    %c0_42 = arith.constant 0 : index
    %c0_43 = arith.constant 0 : index
    %92 = vector.load %arg13[%c0_42, %c0_43] : memref<1x128xf32, #tpu.memory_space<vmem>>, vector<1x128xf32>
    %93 = vector.broadcast %92 : vector<1x128xf32> to vector<16x128xf32>
    %94 = arith.mulf %91, %93 : vector<16x128xf32>
    %c0_44 = arith.constant 0 : index
    %c0_45 = arith.constant 0 : index
    %95 = vector.load %arg14[%c0_44, %c0_45] : memref<1x128xf32, #tpu.memory_space<vmem>>, vector<1x128xf32>
    %96 = vector.broadcast %95 : vector<1x128xf32> to vector<16x128xf32>
    %97 = arith.addf %94, %96 : vector<16x128xf32>
    %c0_46 = arith.constant 0 : index
    %c0_47 = arith.constant 0 : index
    %c0_48 = arith.constant 0 : index
    %98 = vector.load %arg15[%c0_46, %c0_47, %c0_48] : memref<1x16x128xf32, #tpu.memory_space<vmem>>, vector<1x16x128xf32>
    %99 = vector.shape_cast %98 : vector<1x16x128xf32> to vector<16x128xf32>
    %100 = vector.shape_cast %97 : vector<16x128xf32> to vector<1x16x128xf32>
    tpu.vector_store %arg15[%c0_46, %c0_47, %c0_48], %100 {strides = array<i32>} : memref<1x16x128xf32, #tpu.memory_space<vmem>>, vector<1x16x128xf32>,
    %c0_49 = arith.constant 0 : index
    %c0_50 = arith.constant 0 : index
    %c0_51 = arith.constant 0 : index
    %101 = vector.load %arg16[%c0_49, %c0_50, %c0_51] : memref<1x16x32xf32, #tpu.memory_space<vmem>>, vector<1x16x32xf32>
    %102 = vector.shape_cast %101 : vector<1x16x32xf32> to vector<16x32xf32>
    %103 = vector.shape_cast %27 : vector<16x32xf32> to vector<1x16x32xf32>
    tpu.vector_store %arg16[%c0_49, %c0_50, %c0_51], %103 {strides = array<i32>} : memref<1x16x32xf32, #tpu.memory_space<vmem>>, vector<1x16x32xf32>,
    return
  }
  func.func @transform_0(%arg0: i32, %arg1: i32) -> (i32, i32, i32) {
    %c0_i32 = arith.constant 0 : i32
    %c0_i32_0 = arith.constant 0 : i32
    %c0_i32_1 = arith.constant 0 : i32
    return %arg0, %c0_i32, %c0_i32_0 : i32, i32, i32
  }
  func.func @transform_1(%arg0: i32, %arg1: i32) -> (i32, i32) {
    %c0_i32 = arith.constant 0 : i32
    %c0_i32_0 = arith.constant 0 : i32
    %c0_i32_1 = arith.constant 0 : i32
    return %c0_i32, %c0_i32_0 : i32, i32
  }
  func.func @transform_2(%arg0: i32, %arg1: i32) -> (i32, i32) {
    %c0_i32 = arith.constant 0 : i32
    %c0_i32_0 = arith.constant 0 : i32
    %c0_i32_1 = arith.constant 0 : i32
    return %c0_i32, %c0_i32_0 : i32, i32
  }
  func.func @transform_3(%arg0: i32, %arg1: i32) -> (i32, i32) {
    %c0_i32 = arith.constant 0 : i32
    %c0_i32_0 = arith.constant 0 : i32
    %c0_i32_1 = arith.constant 0 : i32
    return %c0_i32, %c0_i32_0 : i32, i32
  }
  func.func @transform_4(%arg0: i32, %arg1: i32) -> (i32, i32) {
    %c0_i32 = arith.constant 0 : i32
    %c0_i32_0 = arith.constant 0 : i32
    %c0_i32_1 = arith.constant 0 : i32
    return %c0_i32, %c0_i32_0 : i32, i32
  }
  func.func @transform_5(%arg0: i32, %arg1: i32) -> (i32, i32) {
    %c0_i32 = arith.constant 0 : i32
    %c0_i32_0 = arith.constant 0 : i32
    %c0_i32_1 = arith.constant 0 : i32
    return %c0_i32, %c0_i32_0 : i32, i32
  }
  func.func @transform_6(%arg0: i32, %arg1: i32) -> (i32, i32) {
    %c0_i32 = arith.constant 0 : i32
    %c0_i32_0 = arith.constant 0 : i32
    %c0_i32_1 = arith.constant 0 : i32
    return %c0_i32, %c0_i32_0 : i32, i32
  }
  func.func @transform_7(%arg0: i32, %arg1: i32) -> (i32, i32) {
    %c0_i32 = arith.constant 0 : i32
    %c0_i32_0 = arith.constant 0 : i32
    %c0_i32_1 = arith.constant 0 : i32
    return %c0_i32, %c0_i32_0 : i32, i32
  }
  func.func @transform_8(%arg0: i32, %arg1: i32) -> (i32, i32) {
    %c0_i32 = arith.constant 0 : i32
    %c0_i32_0 = arith.constant 0 : i32
    %c0_i32_1 = arith.constant 0 : i32
    return %c0_i32, %c0_i32_0 : i32, i32
  }
  func.func @transform_9(%arg0: i32, %arg1: i32) -> (i32, i32) {
    %c0_i32 = arith.constant 0 : i32
    %c0_i32_0 = arith.constant 0 : i32
    %c0_i32_1 = arith.constant 0 : i32
    return %c0_i32, %c0_i32_0 : i32, i32
  }
  func.func @transform_10(%arg0: i32, %arg1: i32) -> (i32, i32) {
    %c0_i32 = arith.constant 0 : i32
    %c0_i32_0 = arith.constant 0 : i32
    %c0_i32_1 = arith.constant 0 : i32
    return %c0_i32, %c0_i32_0 : i32, i32
  }
  func.func @transform_11(%arg0: i32, %arg1: i32) -> (i32, i32) {
    %c0_i32 = arith.constant 0 : i32
    %c0_i32_0 = arith.constant 0 : i32
    %c0_i32_1 = arith.constant 0 : i32
    return %c0_i32, %c0_i32_0 : i32, i32
  }
  func.func @transform_12(%arg0: i32, %arg1: i32) -> (i32, i32) {
    %c0_i32 = arith.constant 0 : i32
    %c0_i32_0 = arith.constant 0 : i32
    %c0_i32_1 = arith.constant 0 : i32
    return %c0_i32, %c0_i32_0 : i32, i32
  }
  func.func @transform_13(%arg0: i32, %arg1: i32) -> (i32, i32, i32) {
    %c0_i32 = arith.constant 0 : i32
    %c0_i32_0 = arith.constant 0 : i32
    return %arg0, %arg1, %c0_i32 : i32, i32, i32
  }
  func.func @transform_14(%arg0: i32, %arg1: i32) -> (i32, i32, i32) {
    %c0_i32 = arith.constant 0 : i32
    %c0_i32_0 = arith.constant 0 : i32
    return %arg0, %arg1, %c0_i32 : i32, i32, i32
  }
}

module attributes {stable_mosaic.version = 11 : i64} {
  func.func @_encoder_layer_kernel(%arg0: i32, %arg1: i32, %arg2: memref<1x16x128xf32, #tpu.memory_space<vmem>>, %arg3: memref<128x128xbf16, #tpu.memory_space<vmem>>, %arg4: memref<128x128xbf16, #tpu.memory_space<vmem>>, %arg5: memref<128x128xbf16, #tpu.memory_space<vmem>>, %arg6: memref<128x128xbf16, #tpu.memory_space<vmem>>, %arg7: memref<128x256xbf16, #tpu.memory_space<vmem>>, %arg8: memref<1x256xf32, #tpu.memory_space<vmem>>, %arg9: memref<256x128xbf16, #tpu.memory_space<vmem>>, %arg10: memref<1x128xf32, #tpu.memory_space<vmem>>, %arg11: memref<1x128xf32, #tpu.memory_space<vmem>>, %arg12: memref<1x128xf32, #tpu.memory_space<vmem>>, %arg13: memref<1x128xf32, #tpu.memory_space<vmem>>, %arg14: memref<1x128xf32, #tpu.memory_space<vmem>>, %arg15: memref<1x16x128xf32, #tpu.memory_space<vmem>>, %arg16: memref<1x16x16xf32, #tpu.memory_space<vmem>>, %arg17: memref<16x128xbf16, #tpu.memory_space<vmem>>, %arg18: memref<16x128xbf16, #tpu.memory_space<vmem>>) attributes {dimension_semantics = [#tpu.dimension_semantics<parallel>, #tpu.dimension_semantics<arbitrary>], iteration_bounds = array<i64: 2, 1>, scalar_prefetch = 0 : i64, scratch_operands = 2 : i64, tpu.core_type = #tpu.core_type<tc>, window_params = [{transform_indices = @transform_0, window_bounds = array<i64: 1, 16, 128>}, {pipeline_mode = #tpu.pipeline_mode<synchronous>, transform_indices = @transform_1, window_bounds = array<i64: 128, 128>}, {pipeline_mode = #tpu.pipeline_mode<synchronous>, transform_indices = @transform_2, window_bounds = array<i64: 128, 128>}, {pipeline_mode = #tpu.pipeline_mode<synchronous>, transform_indices = @transform_3, window_bounds = array<i64: 128, 128>}, {pipeline_mode = #tpu.pipeline_mode<synchronous>, transform_indices = @transform_4, window_bounds = array<i64: 128, 128>}, {pipeline_mode = #tpu.pipeline_mode<synchronous>, transform_indices = @transform_5, window_bounds = array<i64: 128, 256>}, {pipeline_mode = #tpu.pipeline_mode<synchronous>, transform_indices = @transform_6, window_bounds = array<i64: 1, 256>}, {pipeline_mode = #tpu.pipeline_mode<synchronous>, transform_indices = @transform_7, window_bounds = array<i64: 256, 128>}, {pipeline_mode = #tpu.pipeline_mode<synchronous>, transform_indices = @transform_8, window_bounds = array<i64: 1, 128>}, {pipeline_mode = #tpu.pipeline_mode<synchronous>, transform_indices = @transform_9, window_bounds = array<i64: 1, 128>}, {pipeline_mode = #tpu.pipeline_mode<synchronous>, transform_indices = @transform_10, window_bounds = array<i64: 1, 128>}, {pipeline_mode = #tpu.pipeline_mode<synchronous>, transform_indices = @transform_11, window_bounds = array<i64: 1, 128>}, {pipeline_mode = #tpu.pipeline_mode<synchronous>, transform_indices = @transform_12, window_bounds = array<i64: 1, 128>}, {transform_indices = @transform_13, window_bounds = array<i64: 1, 16, 128>}, {transform_indices = @transform_14, window_bounds = array<i64: 1, 16, 16>}]} {
    %c0_i32 = arith.constant 0 : i32
    %0 = arith.cmpi eq, %arg1, %c0_i32 : i32
    %1 = arith.extui %0 : i1 to i32
    %c0_i32_0 = arith.constant 0 : i32
    %2 = arith.cmpi ne, %1, %c0_i32_0 : i32
    scf.if %2 {
      %c0_52 = arith.constant 0 : index
      %c0_53 = arith.constant 0 : index
      %c0_54 = arith.constant 0 : index
      %104 = vector.load %arg2[%c0_52, %c0_53, %c0_54] : memref<1x16x128xf32, #tpu.memory_space<vmem>>, vector<1x16x128xf32>
      %105 = vector.shape_cast %104 : vector<1x16x128xf32> to vector<16x128xf32>
      %106 = arith.truncf %105 : vector<16x128xf32> to vector<16x128xbf16>
      %c0_55 = arith.constant 0 : index
      %c0_56 = arith.constant 0 : index
      %107 = vector.load %arg4[%c0_55, %c0_56] : memref<128x128xbf16, #tpu.memory_space<vmem>>, vector<128x128xbf16>
      %cst_57 = arith.constant dense<0.000000e+00> : vector<16x128xf32>
      %108 = tpu.matmul %106, %107, %cst_57 {dimension_numbers = #tpu.dot_dimension_numbers<[1], [0], [0], [1], [0, 0, 1, 1], [], []>} : vector<16x128xbf16>, vector<128x128xbf16>, vector<16x128xf32> -> vector<16x128xf32>
      %109 = arith.truncf %108 : vector<16x128xf32> to vector<16x128xbf16>
      %c0_58 = arith.constant 0 : index
      %c0_59 = arith.constant 0 : index
      %110 = vector.load %arg17[%c0_58, %c0_59] : memref<16x128xbf16, #tpu.memory_space<vmem>>, vector<16x128xbf16>
      tpu.vector_store %arg17[%c0_58, %c0_59], %109 {strides = array<i32>} : memref<16x128xbf16, #tpu.memory_space<vmem>>, vector<16x128xbf16>,
      %c0_60 = arith.constant 0 : index
      %c0_61 = arith.constant 0 : index
      %111 = vector.load %arg5[%c0_60, %c0_61] : memref<128x128xbf16, #tpu.memory_space<vmem>>, vector<128x128xbf16>
      %cst_62 = arith.constant dense<0.000000e+00> : vector<16x128xf32>
      %112 = tpu.matmul %106, %111, %cst_62 {dimension_numbers = #tpu.dot_dimension_numbers<[1], [0], [0], [1], [0, 0, 1, 1], [], []>} : vector<16x128xbf16>, vector<128x128xbf16>, vector<16x128xf32> -> vector<16x128xf32>
      %113 = arith.truncf %112 : vector<16x128xf32> to vector<16x128xbf16>
      %c0_63 = arith.constant 0 : index
      %c0_64 = arith.constant 0 : index
      %114 = vector.load %arg18[%c0_63, %c0_64] : memref<16x128xbf16, #tpu.memory_space<vmem>>, vector<16x128xbf16>
      tpu.vector_store %arg18[%c0_63, %c0_64], %113 {strides = array<i32>} : memref<16x128xbf16, #tpu.memory_space<vmem>>, vector<16x128xbf16>,
    } else {
    }
    %c16_i32 = arith.constant 16 : i32
    %3 = arith.muli %arg1, %c16_i32 : i32
    %4 = tpu.assume_multiple %3, 16 : i32
    %c0 = arith.constant 0 : index
    %5 = arith.index_cast %4 : i32 to index
    %c0_1 = arith.constant 0 : index
    %6 = vector.load %arg2[%c0, %5, %c0_1] : memref<1x16x128xf32, #tpu.memory_space<vmem>>, vector<1x16x128xf32>
    %7 = vector.shape_cast %6 : vector<1x16x128xf32> to vector<16x128xf32>
    %8 = arith.truncf %7 : vector<16x128xf32> to vector<16x128xbf16>
    %cst = arith.constant 1.280000e+02 : f32
    %9 = math.sqrt %cst : f32
    %cst_2 = arith.constant 1.000000e+00 : f32
    %10 = arith.divf %cst_2, %9 : f32
    %c0_3 = arith.constant 0 : index
    %c0_4 = arith.constant 0 : index
    %11 = vector.load %arg3[%c0_3, %c0_4] : memref<128x128xbf16, #tpu.memory_space<vmem>>, vector<128x128xbf16>
    %cst_5 = arith.constant dense<0.000000e+00> : vector<16x128xf32>
    %12 = tpu.matmul %8, %11, %cst_5 {dimension_numbers = #tpu.dot_dimension_numbers<[1], [0], [0], [1], [0, 0, 1, 1], [], []>} : vector<16x128xbf16>, vector<128x128xbf16>, vector<16x128xf32> -> vector<16x128xf32>
    %13 = vector.broadcast %10 : f32 to vector<16x128xf32>
    %14 = arith.mulf %12, %13 : vector<16x128xf32>
    %15 = arith.truncf %14 : vector<16x128xf32> to vector<16x128xbf16>
    %c0_6 = arith.constant 0 : index
    %c0_7 = arith.constant 0 : index
    %16 = vector.load %arg17[%c0_6, %c0_7] : memref<16x128xbf16, #tpu.memory_space<vmem>>, vector<16x128xbf16>
    %cst_8 = arith.constant dense<0.000000e+00> : vector<16x16xf32>
    %17 = tpu.matmul %15, %16, %cst_8 {dimension_numbers = #tpu.dot_dimension_numbers<[1], [1], [0], [0], [0, 0, 1, 0], [], []>} : vector<16x128xbf16>, vector<16x128xbf16>, vector<16x16xf32> -> vector<16x16xf32>
    %cst_9 = arith.constant dense<0xFF800000> : vector<16xf32>
    %18 = vector.multi_reduction <maximumf>, %17, %cst_9 [1] : vector<16x16xf32> to vector<16xf32>
    %19 = vector.shape_cast %18 : vector<16xf32> to vector<16x1xf32>
    %20 = vector.broadcast %19 : vector<16x1xf32> to vector<16x16xf32>
    %21 = arith.subf %17, %20 : vector<16x16xf32>
    %22 = math.exp %21 : vector<16x16xf32>
    %cst_10 = arith.constant dense<0.000000e+00> : vector<16xf32>
    %23 = vector.multi_reduction <add>, %22, %cst_10 [1] : vector<16x16xf32> to vector<16xf32>
    %24 = vector.shape_cast %23 : vector<16xf32> to vector<16x1xf32>
    %25 = tpu.reciprocal %24 {approx = true} : vector<16x1xf32> -> vector<16x1xf32>
    %26 = vector.broadcast %25 : vector<16x1xf32> to vector<16x16xf32>
    %27 = arith.mulf %22, %26 : vector<16x16xf32>
    %28 = arith.truncf %27 : vector<16x16xf32> to vector<16x16xbf16>
    %c0_11 = arith.constant 0 : index
    %c0_12 = arith.constant 0 : index
    %29 = vector.load %arg18[%c0_11, %c0_12] : memref<16x128xbf16, #tpu.memory_space<vmem>>, vector<16x128xbf16>
    %cst_13 = arith.constant dense<0.000000e+00> : vector<16x128xf32>
    %30 = tpu.matmul %28, %29, %cst_13 {dimension_numbers = #tpu.dot_dimension_numbers<[1], [0], [0], [1], [0, 0, 1, 1], [], []>} : vector<16x16xbf16>, vector<16x128xbf16>, vector<16x128xf32> -> vector<16x128xf32>
    %31 = arith.truncf %30 : vector<16x128xf32> to vector<16x128xbf16>
    %c0_14 = arith.constant 0 : index
    %c0_15 = arith.constant 0 : index
    %32 = vector.load %arg6[%c0_14, %c0_15] : memref<128x128xbf16, #tpu.memory_space<vmem>>, vector<128x128xbf16>
    %cst_16 = arith.constant dense<0.000000e+00> : vector<16x128xf32>
    %33 = tpu.matmul %31, %32, %cst_16 {dimension_numbers = #tpu.dot_dimension_numbers<[1], [0], [0], [1], [0, 0, 1, 1], [], []>} : vector<16x128xbf16>, vector<128x128xbf16>, vector<16x128xf32> -> vector<16x128xf32>
    %34 = arith.addf %7, %33 : vector<16x128xf32>
    %cst_17 = arith.constant dense<0.000000e+00> : vector<16xf32>
    %35 = vector.multi_reduction <add>, %34, %cst_17 [1] : vector<16x128xf32> to vector<16xf32>
    %36 = vector.shape_cast %35 : vector<16xf32> to vector<16x1xf32>
    %cst_18 = arith.constant 1.280000e+02 : f32
    %37 = vector.broadcast %cst_18 : f32 to vector<16x1xf32>
    %38 = arith.divf %36, %37 : vector<16x1xf32>
    %39 = arith.mulf %34, %34 : vector<16x128xf32>
    %cst_19 = arith.constant dense<0.000000e+00> : vector<16xf32>
    %40 = vector.multi_reduction <add>, %39, %cst_19 [1] : vector<16x128xf32> to vector<16xf32>
    %41 = vector.shape_cast %40 : vector<16xf32> to vector<16x1xf32>
    %cst_20 = arith.constant 1.280000e+02 : f32
    %42 = vector.broadcast %cst_20 : f32 to vector<16x1xf32>
    %43 = arith.divf %41, %42 : vector<16x1xf32>
    %44 = arith.mulf %38, %38 : vector<16x1xf32>
    %45 = arith.subf %43, %44 : vector<16x1xf32>
    %46 = vector.broadcast %38 : vector<16x1xf32> to vector<16x128xf32>
    %47 = arith.subf %34, %46 : vector<16x128xf32>
    %cst_21 = arith.constant 9.99999974E-6 : f32
    %48 = vector.broadcast %cst_21 : f32 to vector<16x1xf32>
    %49 = arith.addf %45, %48 : vector<16x1xf32>
    %50 = math.rsqrt %49 : vector<16x1xf32>
    %51 = vector.broadcast %50 : vector<16x1xf32> to vector<16x128xf32>
    %52 = arith.mulf %47, %51 : vector<16x128xf32>
    %c0_22 = arith.constant 0 : index
    %c0_23 = arith.constant 0 : index
    %53 = vector.load %arg11[%c0_22, %c0_23] : memref<1x128xf32, #tpu.memory_space<vmem>>, vector<1x128xf32>
    %54 = vector.broadcast %53 : vector<1x128xf32> to vector<16x128xf32>
    %55 = arith.mulf %52, %54 : vector<16x128xf32>
    %c0_24 = arith.constant 0 : index
    %c0_25 = arith.constant 0 : index
    %56 = vector.load %arg12[%c0_24, %c0_25] : memref<1x128xf32, #tpu.memory_space<vmem>>, vector<1x128xf32>
    %57 = vector.broadcast %56 : vector<1x128xf32> to vector<16x128xf32>
    %58 = arith.addf %55, %57 : vector<16x128xf32>
    %59 = arith.truncf %58 : vector<16x128xf32> to vector<16x128xbf16>
    %c0_26 = arith.constant 0 : index
    %c0_27 = arith.constant 0 : index
    %60 = vector.load %arg7[%c0_26, %c0_27] : memref<128x256xbf16, #tpu.memory_space<vmem>>, vector<128x256xbf16>
    %cst_28 = arith.constant dense<0.000000e+00> : vector<16x256xf32>
    %61 = tpu.matmul %59, %60, %cst_28 {dimension_numbers = #tpu.dot_dimension_numbers<[1], [0], [0], [1], [0, 0, 1, 1], [], []>} : vector<16x128xbf16>, vector<128x256xbf16>, vector<16x256xf32> -> vector<16x256xf32>
    %c0_29 = arith.constant 0 : index
    %c0_30 = arith.constant 0 : index
    %62 = vector.load %arg8[%c0_29, %c0_30] : memref<1x256xf32, #tpu.memory_space<vmem>>, vector<1x256xf32>
    %63 = vector.broadcast %62 : vector<1x256xf32> to vector<16x256xf32>
    %64 = arith.addf %61, %63 : vector<16x256xf32>
    %cst_31 = arith.constant 0.000000e+00 : f32
    %65 = vector.broadcast %cst_31 : f32 to vector<16x256xf32>
    %66 = arith.maximumf %64, %65 : vector<16x256xf32>
    %67 = arith.truncf %66 : vector<16x256xf32> to vector<16x256xbf16>
    %c0_32 = arith.constant 0 : index
    %c0_33 = arith.constant 0 : index
    %68 = vector.load %arg9[%c0_32, %c0_33] : memref<256x128xbf16, #tpu.memory_space<vmem>>, vector<256x128xbf16>
    %cst_34 = arith.constant dense<0.000000e+00> : vector<16x128xf32>
    %69 = tpu.matmul %67, %68, %cst_34 {dimension_numbers = #tpu.dot_dimension_numbers<[1], [0], [0], [1], [0, 0, 1, 1], [], []>} : vector<16x256xbf16>, vector<256x128xbf16>, vector<16x128xf32> -> vector<16x128xf32>
    %c0_35 = arith.constant 0 : index
    %c0_36 = arith.constant 0 : index
    %70 = vector.load %arg10[%c0_35, %c0_36] : memref<1x128xf32, #tpu.memory_space<vmem>>, vector<1x128xf32>
    %71 = vector.broadcast %70 : vector<1x128xf32> to vector<16x128xf32>
    %72 = arith.addf %69, %71 : vector<16x128xf32>
    %73 = arith.addf %58, %72 : vector<16x128xf32>
    %cst_37 = arith.constant dense<0.000000e+00> : vector<16xf32>
    %74 = vector.multi_reduction <add>, %73, %cst_37 [1] : vector<16x128xf32> to vector<16xf32>
    %75 = vector.shape_cast %74 : vector<16xf32> to vector<16x1xf32>
    %cst_38 = arith.constant 1.280000e+02 : f32
    %76 = vector.broadcast %cst_38 : f32 to vector<16x1xf32>
    %77 = arith.divf %75, %76 : vector<16x1xf32>
    %78 = arith.mulf %73, %73 : vector<16x128xf32>
    %cst_39 = arith.constant dense<0.000000e+00> : vector<16xf32>
    %79 = vector.multi_reduction <add>, %78, %cst_39 [1] : vector<16x128xf32> to vector<16xf32>
    %80 = vector.shape_cast %79 : vector<16xf32> to vector<16x1xf32>
    %cst_40 = arith.constant 1.280000e+02 : f32
    %81 = vector.broadcast %cst_40 : f32 to vector<16x1xf32>
    %82 = arith.divf %80, %81 : vector<16x1xf32>
    %83 = arith.mulf %77, %77 : vector<16x1xf32>
    %84 = arith.subf %82, %83 : vector<16x1xf32>
    %85 = vector.broadcast %77 : vector<16x1xf32> to vector<16x128xf32>
    %86 = arith.subf %73, %85 : vector<16x128xf32>
    %cst_41 = arith.constant 9.99999974E-6 : f32
    %87 = vector.broadcast %cst_41 : f32 to vector<16x1xf32>
    %88 = arith.addf %84, %87 : vector<16x1xf32>
    %89 = math.rsqrt %88 : vector<16x1xf32>
    %90 = vector.broadcast %89 : vector<16x1xf32> to vector<16x128xf32>
    %91 = arith.mulf %86, %90 : vector<16x128xf32>
    %c0_42 = arith.constant 0 : index
    %c0_43 = arith.constant 0 : index
    %92 = vector.load %arg13[%c0_42, %c0_43] : memref<1x128xf32, #tpu.memory_space<vmem>>, vector<1x128xf32>
    %93 = vector.broadcast %92 : vector<1x128xf32> to vector<16x128xf32>
    %94 = arith.mulf %91, %93 : vector<16x128xf32>
    %c0_44 = arith.constant 0 : index
    %c0_45 = arith.constant 0 : index
    %95 = vector.load %arg14[%c0_44, %c0_45] : memref<1x128xf32, #tpu.memory_space<vmem>>, vector<1x128xf32>
    %96 = vector.broadcast %95 : vector<1x128xf32> to vector<16x128xf32>
    %97 = arith.addf %94, %96 : vector<16x128xf32>
    %c0_46 = arith.constant 0 : index
    %c0_47 = arith.constant 0 : index
    %c0_48 = arith.constant 0 : index
    %98 = vector.load %arg15[%c0_46, %c0_47, %c0_48] : memref<1x16x128xf32, #tpu.memory_space<vmem>>, vector<1x16x128xf32>
    %99 = vector.shape_cast %98 : vector<1x16x128xf32> to vector<16x128xf32>
    %100 = vector.shape_cast %97 : vector<16x128xf32> to vector<1x16x128xf32>
    tpu.vector_store %arg15[%c0_46, %c0_47, %c0_48], %100 {strides = array<i32>} : memref<1x16x128xf32, #tpu.memory_space<vmem>>, vector<1x16x128xf32>,
    %c0_49 = arith.constant 0 : index
    %c0_50 = arith.constant 0 : index
    %c0_51 = arith.constant 0 : index
    %101 = vector.load %arg16[%c0_49, %c0_50, %c0_51] : memref<1x16x16xf32, #tpu.memory_space<vmem>>, vector<1x16x16xf32>
    %102 = vector.shape_cast %101 : vector<1x16x16xf32> to vector<16x16xf32>
    %103 = vector.shape_cast %27 : vector<16x16xf32> to vector<1x16x16xf32>
    tpu.vector_store %arg16[%c0_49, %c0_50, %c0_51], %103 {strides = array<i32>} : memref<1x16x16xf32, #tpu.memory_space<vmem>>, vector<1x16x16xf32>,
    return
  }
  func.func @transform_0(%arg0: i32, %arg1: i32) -> (i32, i32, i32) {
    %c0_i32 = arith.constant 0 : i32
    %c0_i32_0 = arith.constant 0 : i32
    %c0_i32_1 = arith.constant 0 : i32
    return %arg0, %c0_i32, %c0_i32_0 : i32, i32, i32
  }
  func.func @transform_1(%arg0: i32, %arg1: i32) -> (i32, i32) {
    %c0_i32 = arith.constant 0 : i32
    %c0_i32_0 = arith.constant 0 : i32
    %c0_i32_1 = arith.constant 0 : i32
    return %c0_i32, %c0_i32_0 : i32, i32
  }
  func.func @transform_2(%arg0: i32, %arg1: i32) -> (i32, i32) {
    %c0_i32 = arith.constant 0 : i32
    %c0_i32_0 = arith.constant 0 : i32
    %c0_i32_1 = arith.constant 0 : i32
    return %c0_i32, %c0_i32_0 : i32, i32
  }
  func.func @transform_3(%arg0: i32, %arg1: i32) -> (i32, i32) {
    %c0_i32 = arith.constant 0 : i32
    %c0_i32_0 = arith.constant 0 : i32
    %c0_i32_1 = arith.constant 0 : i32
    return %c0_i32, %c0_i32_0 : i32, i32
  }
  func.func @transform_4(%arg0: i32, %arg1: i32) -> (i32, i32) {
    %c0_i32 = arith.constant 0 : i32
    %c0_i32_0 = arith.constant 0 : i32
    %c0_i32_1 = arith.constant 0 : i32
    return %c0_i32, %c0_i32_0 : i32, i32
  }
  func.func @transform_5(%arg0: i32, %arg1: i32) -> (i32, i32) {
    %c0_i32 = arith.constant 0 : i32
    %c0_i32_0 = arith.constant 0 : i32
    %c0_i32_1 = arith.constant 0 : i32
    return %c0_i32, %c0_i32_0 : i32, i32
  }
  func.func @transform_6(%arg0: i32, %arg1: i32) -> (i32, i32) {
    %c0_i32 = arith.constant 0 : i32
    %c0_i32_0 = arith.constant 0 : i32
    %c0_i32_1 = arith.constant 0 : i32
    return %c0_i32, %c0_i32_0 : i32, i32
  }
  func.func @transform_7(%arg0: i32, %arg1: i32) -> (i32, i32) {
    %c0_i32 = arith.constant 0 : i32
    %c0_i32_0 = arith.constant 0 : i32
    %c0_i32_1 = arith.constant 0 : i32
    return %c0_i32, %c0_i32_0 : i32, i32
  }
  func.func @transform_8(%arg0: i32, %arg1: i32) -> (i32, i32) {
    %c0_i32 = arith.constant 0 : i32
    %c0_i32_0 = arith.constant 0 : i32
    %c0_i32_1 = arith.constant 0 : i32
    return %c0_i32, %c0_i32_0 : i32, i32
  }
  func.func @transform_9(%arg0: i32, %arg1: i32) -> (i32, i32) {
    %c0_i32 = arith.constant 0 : i32
    %c0_i32_0 = arith.constant 0 : i32
    %c0_i32_1 = arith.constant 0 : i32
    return %c0_i32, %c0_i32_0 : i32, i32
  }
  func.func @transform_10(%arg0: i32, %arg1: i32) -> (i32, i32) {
    %c0_i32 = arith.constant 0 : i32
    %c0_i32_0 = arith.constant 0 : i32
    %c0_i32_1 = arith.constant 0 : i32
    return %c0_i32, %c0_i32_0 : i32, i32
  }
  func.func @transform_11(%arg0: i32, %arg1: i32) -> (i32, i32) {
    %c0_i32 = arith.constant 0 : i32
    %c0_i32_0 = arith.constant 0 : i32
    %c0_i32_1 = arith.constant 0 : i32
    return %c0_i32, %c0_i32_0 : i32, i32
  }
  func.func @transform_12(%arg0: i32, %arg1: i32) -> (i32, i32) {
    %c0_i32 = arith.constant 0 : i32
    %c0_i32_0 = arith.constant 0 : i32
    %c0_i32_1 = arith.constant 0 : i32
    return %c0_i32, %c0_i32_0 : i32, i32
  }
  func.func @transform_13(%arg0: i32, %arg1: i32) -> (i32, i32, i32) {
    %c0_i32 = arith.constant 0 : i32
    %c0_i32_0 = arith.constant 0 : i32
    return %arg0, %arg1, %c0_i32 : i32, i32, i32
  }
  func.func @transform_14(%arg0: i32, %arg1: i32) -> (i32, i32, i32) {
    %c0_i32 = arith.constant 0 : i32
    %c0_i32_0 = arith.constant 0 : i32
    return %arg0, %arg1, %c0_i32 : i32, i32, i32
  }
}

</mosaic_0001>

<bundles_post_ra>
// kernel: encoder_stack_forward.5
= control target key start
LH: loop header
LB: loop body
LE: loop exit
PB: predicated region body
PF: predicated region fallthrough
CT: control target
= control target key end

     0   :  { %s3250_s0 = inlined_call_operand.vmem [shape: f32[2,8,128], index: 0, kind: input, shape index: {}]   ;;  %s3251_s1 = inlined_call_operand.hbm [shape: bf16[128,128], index: 1, kind: input, shape index: {}]   ;;  %s3252_s2 = inlined_call_operand.hbm [shape: bf16[128,128], index: 2, kind: input, shape index: {}]   ;;  %s3253_s3 = inlined_call_operand.hbm [shape: bf16[128,128], index: 3, kind: input, shape index: {}]   ;;  %s3254_s4 = inlined_call_operand.hbm [shape: bf16[128,128], index: 4, kind: input, shape index: {}]   ;;  %s3255_s5 = inlined_call_operand.vmem [shape: bf16[128,256], index: 5, kind: input, shape index: {}]   ;;  %s3256_s6 = inlined_call_operand.hbm [shape: f32[1,256], index: 6, kind: input, shape index: {}]   ;;  %s3257_s7 = inlined_call_operand.hbm [shape: bf16[256,128], index: 7, kind: input, shape index: {}]   ;;  %s3258_s8 = inlined_call_operand.vmem [shape: f32[1,128], index: 8, kind: input, shape index: {}]   ;;  %s3259_s9 = inlined_call_operand.hbm [shape: f32[1,128], index: 9, kind: input, shape index: {}]   ;;  %s3260_s10 = inlined_call_operand.hbm [shape: f32[1,128], index: 10, kind: input, shape index: {}]   ;;  %s3261_s11 = inlined_call_operand.hbm [shape: f32[1,128], index: 11, kind: input, shape index: {}]   ;;  %s3262_s12 = inlined_call_operand.hbm [shape: f32[1,128], index: 12, kind: input, shape index: {}]   ;;  %s3263_s13 = inlined_call_operand.vmem [shape: f32[2,8,128], index: 13, kind: output, shape index: {0}]   ;;  %s3264_s14 = inlined_call_operand.hbm [shape: f32[2,8,8], index: 14, kind: output, shape index: {1}]  }
   0x1   :  { %3280 = sst [smem:[#allocation37_spill]] %s3252_s2 }
   0x2   :  { %3281 = sst [smem:[#allocation38_spill]] %s3255_s5 }
   0x3   :  { %3282 = sst [smem:[#allocation39_spill]] %s3258_s8 }
   0x4   :  { %3283 = sst [smem:[#allocation40_spill]] %s3263_s13 }
   0x5   :  { %3284 = sst [smem:[#allocation41_spill]] %s3264_s14 }
   0x6   :  { %20 = vsyncpa [#allocation5], 0 }
   0x7   :  { %21 = vsyncpa [#allocation8], 0 }
   0x8   :  { %22 = vsyncpa [#allocation11], 0 }
   0x9   :  { %23 = vsyncpa [#allocation14], 0 }
   0xa   :  { %24 = vsyncpa [#allocation17], 0 }
   0xb   :  { %25 = vsyncpa [#allocation20], 0 }
   0xc   :  { %26 = vsyncpa [#allocation6], 0 }
   0xd   :  { %28 = vsyncpa [#allocation6 + $0x1], 0  ;;  %s2756_s29 = smov 0   ;;  %s2758_s30 = smov 0  }
   0xe   :  { %s2760_s15 = smov 0   ;;  %s2762_s16 = smov 0  }
   0xf   :  { %s2764_s17 = smov 0   ;;  %s2766_s18 = smov 0  }
  0x10 LB: > { %3285 = sst [smem:[#allocation29_spill]] %s2643_s29  ;;  %s1784_s19 = sadd.s32 4294967295, %s2663_s18   ;;  %s2663_s18 = sphi %s2766_s18, %s34_s18   ;;  %s2659_s17 = sphi %s2764_s17, %s3316_s17   ;;  %s2655_s16 = sphi %s2762_s16, %s3315_s16   ;;  %s2651_s15 = sphi %s2760_s15, %s3314_s15   ;;  %s2647_s30 = sphi %s2758_s30, %s3318_s30   ;;  %s2643_s29 = sphi %s2756_s29, %s3317_s29  }
  0x11   : > { %3286 = sst [smem:[#allocation30_spill]] %s2651_s15  ;;  %s1785_s20 = sadd.s32 4294967294, %s2663_s18  }
  0x12   : > { %3287 = sst [smem:[#allocation31_spill]] %s2659_s17  ;;  %s46_s21 = sadd.s32 1, %s2659_s17 }
  0x13   : > { %3288 = sst [smem:[#allocation32_spill]] %s2663_s18  ;;  %s361_s22 = sadd.s32 1, %s2651_s15 }
  0x14   : > { %p48_p0 = scmp.ge.s32.totalorder %s46_s21, 2  ;;  %p371_p1 = scmp.ne.s32.totalorder %s2651_s15, %s2647_s30 }
  0x15   : > { %p372_p2 = scmp.eq.s32.totalorder %s1784_s19, 1  ;;  %p377_p3 = scmp.ne.s32.totalorder %s2647_s30, %s2643_s29 }
  0x16   : > { %s3320_s21 = smov (%p48_p0, %s46_s21), 0  ;;  %p378_p5 = scmp.eq.s32.totalorder %s1785_s20, 1 }
  0x17   : > { %3289 = sst [smem:[#allocation33_spill]] %s3320_s21  ;;  %p2796_p4 = por %p372_p2, %p371_p1 }
  0x18   : > { %s356_s24 = ssub.s32 %s2659_s17, %s3320_s21  ;;  %p1786_p6 = scmp.ge.s32.totalorder %s2663_s18, 1 }
  0x19   : > { %s3290_s23 = scalar_select %p2796_p4, 1, 0 }
  0x1a   : > { %p359_p7 = scmp.eq.s32.totalorder %s356_s24, 0  ;;  %p2803_p8 = por %p378_p5, %p377_p3 }
  0x1b   : > { %3291 = sst [smem:[#allocation34_spill]] %s3290_s23  ;;  %p385_p9 = scmp.lt.s32.totalorder %s2663_s18, 3 }
  0x1c   : > { %s3292_s25 = scalar_select %p2803_p8, 1, 0 }
  0x1d   : > { %s2809_s26 = scalar_select %p359_p7, %s2651_s15, %s361_s22  }
  0x1e   : > { %3293 = sst [smem:[#allocation35_spill]] %s3292_s25  ;;  %p2811_p10 = pnand %p1786_p6, %p385_p9 }
  0x1f   : > { %3294 = sst [smem:[#allocation36_spill]] %s2809_s26  ;;  %p2815_p11 = scmp.eq.s32.totalorder %s1784_s19, 0 }
  0x20   : > { %s3295_s27 = scalar_select %p2811_p10, 1, 0 }
  0x21   : > { %s3296_s28 = scalar_select %p2815_p11, 1, 0 }
  0x22   : > { %p2082_p12 = pneg %p2811_p10  ;;  %s2665_s20 = smov [#allocation7]  }
  0x23   : > { %s410_s24 = sshll.u32 %s2665_s20, 4  ;;  %s2666_s22 = smov [#allocation10]   ;;  %s411_s24 = int_to_ptr.vmem [resolvable:$true] %s410_s24 }
  0x24   : > { %p2823_p13 = pnand %p2815_p11, %p2082_p12  ;;  %s436_s17 = sshll.u32 %s2666_s22, 4  ;;  %s2827_s17 = int_to_ptr.vmem [resolvable:$true] %s436_s17 }
  0x25   : > { %s3298_s2 = sld [smem:[#allocation37_spill]] }
  0x26   : > { %p2837_p1 = pneg %p2823_p13 }
  0x2b   : > { %s2281_s15 = scalar_lea.hbm %s3298_s2, 1024 }
  0x2c   : > { %p2282_p0 = scmp.ne.s32.totalorder %s3298_s2, %s2281_s15  ;;  %p2288_p5 = scmp.lt.u32.totalorder %s2281_s15, %s3298_s2 }
  0x2e   : > { %p2284_p2 = pnand %p2837_p1, %p2282_p0 }
  0x30   : > { %p2285_p3 = pneg %p2284_p2 }
  0x32   : > { %p2290_p6 = pnand %p2288_p5, %p2285_p3 }
  0x34   : > { %2293 = shalt.err (!%p2290_p6)
}
  0x35   : > { %s2294_s26 = scalar_lea.vmem %s411_s24, 1024  ;;  %p2302_p8 = scmp.lt.s32.totalorder %s411_s24, %s411_s24 }
  0x36   : > { %p2295_p7 = scmp.ne.s32.totalorder %s411_s24, %s2294_s26  ;;  %p2303_p4 = scmp.lt.s32.totalorder %s2294_s26, %s2294_s26 }
  0x38   : > { %p2297_p9 = pnand %p2295_p7, %p2837_p1  ;;  %p2304_p11 = por %p2303_p4, %p2302_p8 }
  0x3a   : > { %p2298_p12 = pneg %p2297_p9 }
  0x3c   : > { %p2305_p10 = pnand %p2304_p11, %p2298_p12 }
  0x3e   : > { %2308 = shalt.err (!%p2305_p10)
}
  0x3f   : > { %s2667_s29 = smov 64   ;;  %s2668_s25 = smov 4  }
  0x40   : > { %2088 = dma.hbm_to_vmem [thread:$0]  (!%p2823_p13), %s3298_s2, 1024, %s411_s24, [#allocation8], %s2667_s29, %s2667_s29, %s2668_s25  }
  0x41   : > { %s2309_s13 = scalar_lea.hbm %s3254_s4, 1024 }
  0x42   : > { %p2310_p4 = scmp.ne.s32.totalorder %s3254_s4, %s2309_s13  ;;  %p2316_p11 = scmp.lt.u32.totalorder %s2309_s13, %s3254_s4 }
  0x44   : > { %p2312_p8 = pnand %p2310_p4, %p2837_p1 }
  0x46   : > { %p2313_p10 = pneg %p2312_p8 }
  0x48   : > { %p2318_p0 = pnand %p2316_p11, %p2313_p10 }
  0x4a   : > { %2321 = shalt.err (!%p2318_p0)
}
  0x4b   : > { %s2322_s24 = scalar_lea.vmem %s2827_s17, 1024  ;;  %p2330_p6 = scmp.lt.s32.totalorder %s2827_s17, %s2827_s17 }
  0x4c   : > { %p2323_p2 = scmp.ne.s32.totalorder %s2827_s17, %s2322_s24  ;;  %p2331_p7 = scmp.lt.s32.totalorder %s2322_s24, %s2322_s24 }
  0x4e   : > { %p2325_p3 = pnand %p2323_p2, %p2837_p1  ;;  %p2332_p9 = por %p2331_p7, %p2330_p6 }
  0x50   : > { %p2326_p5 = pneg %p2325_p3 }
  0x52   : > { %p2333_p12 = pnand %p2332_p9, %p2326_p5 }
  0x54   : > { %2336 = shalt.err (!%p2333_p12)
}
  0x55   : > { %2094 = dma.hbm_to_vmem [thread:$0]  (!%p2823_p13), %s3254_s4, 1024, %s2827_s17, [#allocation11], %s2667_s29, %s2667_s29, %s2668_s25  }
  0x56   : > { %s2669_s14 = smov [#allocation13]   ;;  %s2670_s15 = smov [#allocation16]  }
  0x57   : > { %s463_s23 = sshll.u32 %s2669_s14, 4  ;;  %s491_s18 = sshll.u32 %s2670_s15, 4  ;;  %s464_s23 = int_to_ptr.vmem [resolvable:$true] %s463_s23  ;;  %s492_s18 = int_to_ptr.vmem [resolvable:$true] %s491_s18 }
  0x58   : > { %s2337_s26 = scalar_lea.hbm %s3257_s7, 2048 }
  0x59   : > { %p2338_p4 = scmp.ne.s32.totalorder %s3257_s7, %s2337_s26  ;;  %p2344_p11 = scmp.lt.u32.totalorder %s2337_s26, %s3257_s7 }
  0x5b   : > { %p2340_p8 = pnand %p2338_p4, %p2837_p1 }
  0x5d   : > { %p2341_p10 = pneg %p2340_p8 }
  0x5f   : > { %p2346_p0 = pnand %p2344_p11, %p2341_p10 }
  0x61   : > { %2349 = shalt.err (!%p2346_p0)
}
  0x62   : > { %s2350_s17 = scalar_lea.vmem %s464_s23, 2048  ;;  %p2358_p6 = scmp.lt.s32.totalorder %s464_s23, %s464_s23 }
  0x63   : > { %p2351_p2 = scmp.ne.s32.totalorder %s464_s23, %s2350_s17  ;;  %p2359_p7 = scmp.lt.s32.totalorder %s2350_s17, %s2350_s17 }
  0x65   : > { %p2353_p3 = pnand %p2351_p2, %p2837_p1  ;;  %p2360_p9 = por %p2359_p7, %p2358_p6 }
  0x67   : > { %p2354_p5 = pneg %p2353_p3 }
  0x69   : > { %p2361_p12 = pnand %p2360_p9, %p2354_p5 }
  0x6b   : > { %2364 = shalt.err (!%p2361_p12)
}
  0x6c   : > { %2100 = dma.hbm_to_vmem [thread:$0]  (!%p2823_p13), %s3257_s7, 2048, %s464_s23, [#allocation14], %s2667_s29, %s2667_s29, %s2668_s25  }
  0x6d   : > { %s2365_s15 = scalar_lea.hbm %s3260_s10, 16 }
  0x6e   : > { %p2366_p4 = scmp.ne.s32.totalorder %s3260_s10, %s2365_s15  ;;  %p2372_p11 = scmp.lt.u32.totalorder %s2365_s15, %s3260_s10 }
  0x70   : > { %p2368_p8 = pnand %p2366_p4, %p2837_p1 }
  0x72   : > { %p2369_p10 = pneg %p2368_p8 }
  0x74   : > { %p2374_p0 = pnand %p2372_p11, %p2369_p10 }
  0x76   : > { %2377 = shalt.err (!%p2374_p0)
}
  0x77   : > { %s2378_s8 = scalar_lea.vmem %s492_s18, 16  ;;  %s2385_s23 = scalar_lea.vmem %s492_s18, 32 }
  0x78   : > { %p2379_p2 = scmp.ne.s32.totalorder %s492_s18, %s2378_s8  ;;  %p2386_p6 = scmp.lt.s32.totalorder %s492_s18, %s492_s18 }
  0x79   : > { %p2387_p7 = scmp.lt.s32.totalorder %s2385_s23, %s2378_s8 }
  0x7a   : > { %p2381_p3 = pnand %p2379_p2, %p2837_p1 }
  0x7b   : > { %p2388_p9 = por %p2387_p7, %p2386_p6 }
  0x7c   : > { %p2382_p5 = pneg %p2381_p3 }
  0x7e   : > { %p2389_p12 = pnand %p2388_p9, %p2382_p5 }
  0x80   : > { %2392 = shalt.err (!%p2389_p12)
}
  0x81   : > { %2106 = dma.hbm_to_vmem [thread:$0]  (!%p2823_p13), %s3260_s10, 16, %s492_s18, [#allocation17]  }
  0x82   : > { %s2671_s5 = smov [#allocation4]   ;;  %s2672_s14 = smov [#allocation9]  }
  0x83   : > { %s397_s13 = sshll.u32 %s2671_s5, 4  ;;  %s423_s15 = sshll.u32 %s2672_s14, 4  ;;  %s398_s13 = int_to_ptr.vmem [resolvable:$true] %s397_s13  ;;  %s424_s15 = int_to_ptr.vmem [resolvable:$true] %s423_s15 }
  0x84   : > { %s2393_s26 = scalar_lea.hbm %s3251_s1, 1024 }
  0x85   : > { %p2394_p4 = scmp.ne.s32.totalorder %s3251_s1, %s2393_s26  ;;  %p2400_p11 = scmp.lt.u32.totalorder %s2393_s26, %s3251_s1 }
  0x87   : > { %p2396_p8 = pnand %p2394_p4, %p2837_p1 }
  0x89   : > { %p2397_p10 = pneg %p2396_p8 }
  0x8b   : > { %p2402_p0 = pnand %p2400_p11, %p2397_p10 }
  0x8d   : > { %2405 = shalt.err (!%p2402_p0)
}
  0x8e   : > { %s2406_s18 = scalar_lea.vmem %s398_s13, 1024  ;;  %p2414_p6 = scmp.lt.s32.totalorder %s398_s13, %s398_s13 }
  0x8f   : > { %p2407_p2 = scmp.ne.s32.totalorder %s398_s13, %s2406_s18  ;;  %p2415_p7 = scmp.lt.s32.totalorder %s2406_s18, %s2406_s18 }
  0x91   : > { %p2409_p3 = pnand %p2407_p2, %p2837_p1  ;;  %p2416_p9 = por %p2415_p7, %p2414_p6 }
  0x93   : > { %p2410_p5 = pneg %p2409_p3 }
  0x95   : > { %p2417_p12 = pnand %p2416_p9, %p2410_p5 }
  0x97   : > { %2420 = shalt.err (!%p2417_p12)
}
  0x98   : > { %2085 = dma.hbm_to_vmem [thread:$0]  (!%p2823_p13), %s3251_s1, 1024, %s398_s13, [#allocation5], %s2667_s29, %s2667_s29, %s2668_s25  }
  0x99   : > { %s2421_s22 = scalar_lea.hbm %s3253_s3, 1024 }
  0x9a   : > { %p2422_p4 = scmp.ne.s32.totalorder %s3253_s3, %s2421_s22  ;;  %p2428_p11 = scmp.lt.u32.totalorder %s2421_s22, %s3253_s3 }
  0x9c   : > { %p2424_p8 = pnand %p2422_p4, %p2837_p1 }
  0x9e   : > { %p2425_p10 = pneg %p2424_p8 }
  0xa0   : > { %p2430_p0 = pnand %p2428_p11, %p2425_p10 }
  0xa2   : > { %2433 = shalt.err (!%p2430_p0)
}
  0xa3   : > { %s2434_s17 = scalar_lea.vmem %s424_s15, 1024  ;;  %p2442_p6 = scmp.lt.s32.totalorder %s424_s15, %s424_s15 }
  0xa4   : > { %p2435_p2 = scmp.ne.s32.totalorder %s424_s15, %s2434_s17  ;;  %p2443_p7 = scmp.lt.s32.totalorder %s2434_s17, %s2434_s17 }
  0xa6   : > { %p2437_p3 = pnand %p2435_p2, %p2837_p1  ;;  %p2444_p9 = por %p2443_p7, %p2442_p6 }
  0xa8   : > { %p2438_p5 = pneg %p2437_p3 }
  0xaa   : > { %p2445_p12 = pnand %p2444_p9, %p2438_p5 }
  0xac   : > { %2448 = shalt.err (!%p2445_p12)
}
  0xad   : > { %2091 = dma.hbm_to_vmem [thread:$0]  (!%p2823_p13), %s3253_s3, 1024, %s424_s15, [#allocation8], %s2667_s29, %s2667_s29, %s2668_s25  }
  0xae   : > { %s2673_s2 = smov [#allocation12]   ;;  %s2674_s14 = smov [#allocation15]  }
  0xaf   : > { %s453_s5 = sshll.u32 %s2673_s2, 4  ;;  %s480_s19 = sshll.u32 %s2674_s14, 4  ;;  %s454_s5 = int_to_ptr.vmem [resolvable:$true] %s453_s5  ;;  %s481_s19 = int_to_ptr.vmem [resolvable:$true] %s480_s19 }
  0xb0   : > { %s2449_s24 = scalar_lea.hbm %s3256_s6, 32 }
  0xb1   : > { %p2450_p4 = scmp.ne.s32.totalorder %s3256_s6, %s2449_s24  ;;  %p2456_p11 = scmp.lt.u32.totalorder %s2449_s24, %s3256_s6 }
  0xb3   : > { %p2452_p8 = pnand %p2450_p4, %p2837_p1 }
  0xb5   : > { %p2453_p10 = pneg %p2452_p8 }
  0xb7   : > { %p2458_p0 = pnand %p2456_p11, %p2453_p10 }
  0xb9   : > { %2461 = shalt.err (!%p2458_p0)
}
  0xba   : > { %s2462_s29 = scalar_lea.vmem %s454_s5, 32  ;;  %p2470_p6 = scmp.lt.s32.totalorder %s454_s5, %s454_s5 }
  0xbb   : > { %p2463_p2 = scmp.ne.s32.totalorder %s454_s5, %s2462_s29  ;;  %p2471_p7 = scmp.lt.s32.totalorder %s2462_s29, %s2462_s29 }
  0xbd   : > { %p2465_p3 = pnand %p2463_p2, %p2837_p1  ;;  %p2472_p9 = por %p2471_p7, %p2470_p6 }
  0xbf   : > { %p2466_p5 = pneg %p2465_p3 }
  0xc1   : > { %p2473_p12 = pnand %p2472_p9, %p2466_p5 }
  0xc3   : > { %2476 = shalt.err (!%p2473_p12)
}
  0xc4   : > { %2097 = dma.hbm_to_vmem [thread:$0]  (!%p2823_p13), %s3256_s6, 32, %s454_s5, [#allocation11]  }
  0xc5   : > { %s2477_s14 = scalar_lea.hbm %s3259_s9, 16 }
  0xc6   : > { %p2478_p4 = scmp.ne.s32.totalorder %s3259_s9, %s2477_s14  ;;  %p2484_p11 = scmp.lt.u32.totalorder %s2477_s14, %s3259_s9 }
  0xc8   : > { %p2480_p8 = pnand %p2478_p4, %p2837_p1 }
  0xca   : > { %p2481_p10 = pneg %p2480_p8 }
  0xcc   : > { %p2486_p0 = pnand %p2484_p11, %p2481_p10 }
  0xce   : > { %2489 = shalt.err (!%p2486_p0)
}
  0xcf   : > { %s2490_s23 = scalar_lea.vmem %s481_s19, 16  ;;  %s2497_s5 = scalar_lea.vmem %s481_s19, 32 }
  0xd0   : > { %p2491_p2 = scmp.ne.s32.totalorder %s481_s19, %s2490_s23  ;;  %p2498_p6 = scmp.lt.s32.totalorder %s481_s19, %s481_s19 }
  0xd1   : > { %p2499_p7 = scmp.lt.s32.totalorder %s2497_s5, %s2490_s23 }
  0xd2   : > { %p2493_p3 = pnand %p2491_p2, %p2837_p1 }
  0xd3   : > { %p2500_p9 = por %p2499_p7, %p2498_p6 }
  0xd4   : > { %p2494_p5 = pneg %p2493_p3 }
  0xd6   : > { %p2501_p12 = pnand %p2500_p9, %p2494_p5 }
  0xd8   : > { %2504 = shalt.err (!%p2501_p12)
}
  0xd9   : > { %2103 = dma.hbm_to_vmem [thread:$0]  (!%p2823_p13), %s3259_s9, 16, %s481_s19, [#allocation14]  }
  0xda   : > { %s2675_s29 = smov [#allocation18]   ;;  %s2676_s15 = smov [#allocation19]  }
  0xdb   : > { %s502_s25 = sshll.u32 %s2675_s29, 4  ;;  %s513_s18 = sshll.u32 %s2676_s15, 4  ;;  %s503_s25 = int_to_ptr.vmem [resolvable:$true] %s502_s25  ;;  %s514_s18 = int_to_ptr.vmem [resolvable:$true] %s513_s18 }
  0xdc   : > { %s2505_s22 = scalar_lea.hbm %s3261_s11, 16 }
  0xdd   : > { %p2506_p4 = scmp.ne.s32.totalorder %s3261_s11, %s2505_s22  ;;  %p2512_p11 = scmp.lt.u32.totalorder %s2505_s22, %s3261_s11 }
  0xdf   : > { %p2508_p8 = pnand %p2506_p4, %p2837_p1 }
  0xe1   : > { %p2509_p10 = pneg %p2508_p8 }
  0xe3   : > { %p2514_p0 = pnand %p2512_p11, %p2509_p10 }
  0xe5   : > { %2517 = shalt.err (!%p2514_p0)
}
  0xe6   : > { %s2518_s19 = scalar_lea.vmem %s503_s25, 16  ;;  %s2525_s5 = scalar_lea.vmem %s503_s25, 32 }
  0xe7   : > { %p2519_p2 = scmp.ne.s32.totalorder %s503_s25, %s2518_s19  ;;  %p2526_p6 = scmp.lt.s32.totalorder %s503_s25, %s503_s25 }
  0xe8   : > { %p2527_p7 = scmp.lt.s32.totalorder %s2525_s5, %s2518_s19 }
  0xe9   : > { %p2521_p3 = pnand %p2519_p2, %p2837_p1 }
  0xea   : > { %p2528_p9 = por %p2527_p7, %p2526_p6 }
  0xeb   : > { %p2522_p5 = pneg %p2521_p3 }
  0xed   : > { %p2529_p12 = pnand %p2528_p9, %p2522_p5 }
  0xef   : > { %2532 = shalt.err (!%p2529_p12)
}
  0xf0   : > { %2109 = dma.hbm_to_vmem [thread:$0]  (!%p2823_p13), %s3261_s11, 16, %s503_s25, [#allocation17]  }
  0xf1   : > { %s2533_s2 = scalar_lea.hbm %s3262_s12, 16 }
  0xf2   : > { %p2534_p4 = scmp.ne.s32.totalorder %s3262_s12, %s2533_s2  ;;  %p2540_p11 = scmp.lt.u32.totalorder %s2533_s2, %s3262_s12 }
  0xf4   : > { %p2536_p8 = pnand %p2534_p4, %p2837_p1 }
  0xf6   : > { %p2537_p10 = pneg %p2536_p8 }
  0xf8   : > { %p2542_p0 = pnand %p2540_p11, %p2537_p10 }
  0xfa   : > { %2545 = shalt.err (!%p2542_p0)
}
  0xfb   : > { %s2546_s8 = scalar_lea.vmem %s514_s18, 16  ;;  %s2553_s25 = scalar_lea.vmem %s514_s18, 32 }
  0xfc   : > { %p2547_p2 = scmp.ne.s32.totalorder %s514_s18, %s2546_s8  ;;  %p2554_p6 = scmp.lt.s32.totalorder %s514_s18, %s514_s18 }
  0xfd   : > { %p2555_p7 = scmp.lt.s32.totalorder %s2553_s25, %s2546_s8 }
  0xfe   : > { %p2549_p3 = pnand %p2547_p2, %p2837_p1 }
  0xff   : > { %p2556_p9 = por %p2555_p7, %p2554_p6 }
 0x100   : > { %p2550_p5 = pneg %p2549_p3 }
 0x102   : > { %p2557_p12 = pnand %p2556_p9, %p2550_p5 }
 0x104   : > { %2560 = shalt.err (!%p2557_p12)
}
 0x105   : > { %2112 = dma.hbm_to_vmem [thread:$0]  (!%p2823_p13), %s3262_s12, 16, %s514_s18, [#allocation20]  }
 0x106   : > { %p3300_p4 = scmp.ne.s32.totalorder %s3295_s27, 0 }
 0x107   : > { %p3301_p8 = scmp.ne.s32.totalorder (!%p3300_p4), %s3296_s28, 0 }
 0x108   : > { %533 = sbr.rel (%p3300_p4) target bundleno = 2298 (0x8fa), region = 72 }
 0x10f   : > { %2614 = dma.done.wait (%p3301_p8), [#allocation5], 1024  }
 0x110   : > { %2616 = vsyncadd (%p3301_p8), [#allocation5], 4294966272 }
 0x111   : > { %2618 = dma.done.wait (%p3301_p8), [#allocation8], 2048  }
 0x112   : > { %2620 = vsyncadd (%p3301_p8), [#allocation8], 4294965248 }
 0x113   : > { %2622 = dma.done.wait (%p3301_p8), [#allocation11], 1056  }
 0x114   : > { %2624 = vsyncadd (%p3301_p8), [#allocation11], 4294966240 }
 0x115   : > { %2626 = dma.done.wait (%p3301_p8), [#allocation14], 2064  }
 0x116   : > { %2628 = vsyncadd (%p3301_p8), [#allocation14], 4294965232 }
 0x117   : > { %2630 = dma.done.wait (%p3301_p8), [#allocation17], 32  }
 0x118   : > { %2632 = vsyncadd (%p3301_p8), [#allocation17], 4294967264 }
 0x119   : > { %2634 = dma.done.wait (%p3301_p8), [#allocation20], 16  }
 0x11a   : > { %2636 = vsyncadd (%p3301_p8), [#allocation20], 4294967280  ;;  %v2677_v0 = vmov 0.0   ;;  %vm2678_vm0 = vmmov 0   ;;  %v2201_v1 = vld [vmem:[#allocation7] sm:$0xff]   ;;  %v2202_v2 = vld [vmem:[#allocation7 + $0x8] sm:$0xff]  }
 0x11b   : > { %1948 = vmatprep.subr.bf16.mxu0 %v2677_v0  ;;  %1964 = vmatprep.mubr.msk.bf16.mxu0 %vm2678_vm0, %v2677_v0  ;;  %v2203_v3 = vld [vmem:[#allocation7 + $0x10] sm:$0xff]   ;;  %p621_p13 = scmp.lt.s32.totalorder %s2655_s16, 1  ;;  %v2204_v4 = vld [vmem:[#allocation7 + $0x18] sm:$0xff]   ;;  %v2205_v5 = vld [vmem:[#allocation7 + $0x20] sm:$0xff]   ;;  %vm1002_vm1 = vcmask 64512   ;;  %vm1019_vm2 = vcmask 1043456  }
 0x11c   : > { %1968 = vmatprep.subr.bf16.mxu1 %v2677_v0  ;;  %1984 = vmatprep.mubr.msk.bf16.mxu1 %vm2678_vm0, %v2677_v0  ;;  %v2206_v6 = vld [vmem:[#allocation7 + $0x28] sm:$0xff]   ;;  %v2207_v7 = vld [vmem:[#allocation7 + $0x30] sm:$0xff]   ;;  %v2208_v8 = vld [vmem:[#allocation7 + $0x38] sm:$0xff]   ;;  %s618_s5 = sand.u32 1, %s2647_s30   ;;  %s3302_s2 = sld [smem:[#allocation38_spill]] }
 0x11d   : > { %1949 = vmatpush3.bf16.msra.mxu0 %v2201_v1  ;;  %s3072_s21 = scalar_select %p621_p13, %s2655_s16, 1  ;;  %v2209_v10 = vld [vmem:[#allocation4] sm:$0xff]   ;;  %v2210_v12 = vld [vmem:[#allocation4 + $0x8] sm:$0xff]   ;;  %v2211_v13 = vld [vmem:[#allocation4 + $0x10] sm:$0xff]  }
 0x11e   : > { %1950 = vmatprep.subr.bf16.mxu0 %v2677_v0  ;;  %v2212_v14 = vld [vmem:[#allocation4 + $0x18] sm:$0xff]   ;;  %v2213_v15 = vld [vmem:[#allocation4 + $0x20] sm:$0xff]   ;;  %v2214_v16 = vld [vmem:[#allocation4 + $0x28] sm:$0xff]   ;;  %s3122_s17 = sshll.u32 %s618_s5, 3  ;;  %s3303_s23 = sld [smem:[#allocation39_spill]] }
 0x11f   : > { %s1810_s27 = sshll.u32 %s3072_s21, 3  ;;  %v2215_v17 = vld [vmem:[#allocation4 + $0x30] sm:$0xff]   ;;  %v2216_v18 = vld [vmem:[#allocation4 + $0x38] sm:$0xff]   ;;  %v2217_v31 = vld [vmem:[#allocation9] sm:$0xff]   ;;  %s620_s13 = scalar_lea.vmem [#allocation21], %s3122_s17 }
 0x120   : > { %s624_s18 = scalar_lea.vmem %s3250_s0, %s1810_s27  ;;  %1969 = vmatpush3.bf16.msra.mxu1 %v2217_v31  ;;  %v2218_v32 = vld [vmem:[#allocation9 + $0x8] sm:$0xff]   ;;  %v2219_v33 = vld [vmem:[#allocation9 + $0x10] sm:$0xff]   ;;  %v2220_v34 = vld [vmem:[#allocation9 + $0x18] sm:$0xff]   ;;  %s3304_s19 = sld [smem:[#allocation34_spill]] }
 0x121   : > { %1951 = vmatpush3.bf16.msra.mxu0 %v2202_v2  ;;  %v3083_v9 = vld [vmem:[%s624_s18] sm:$0xff]  ;;  %1970 = vmatprep.subr.bf16.mxu1 %v2677_v0  ;;  %v2221_v35 = vld [vmem:[#allocation9 + $0x20] sm:$0xff]   ;;  %v2222_v36 = vld [vmem:[#allocation9 + $0x28] sm:$0xff]   ;;  %s1883_s28 = sshll.u32 %s2655_s16, 7  ;;  %s1585_s20 = sshll.u32 %s620_s13, 4  ;;  %s1586_s20 = int_to_ptr.vmem [resolvable:$true] %s1585_s20 }
 0x122   : > { %1952 = vmatprep.subr.bf16.mxu0 %v2677_v0  ;;  %v3088_v11 = vpack.c.bf16 %v3083_v9, %v3083_v9  ;;  %v2223_v37 = vld [vmem:[#allocation9 + $0x30] sm:$0xff]   ;;  %v2224_v38 = vld [vmem:[#allocation9 + $0x38] sm:$0xff]   ;;  %v2225_v59 = vld [vmem:[#allocation10] sm:$0xff]   ;;  %s3305_s15 = sld [smem:[#allocation41_spill]]  ;;  %s1568_s26 = scalar_lea.sflag [#allocation6], %s618_s5 }
 0x123   : > { %v2226_v61 = vld [vmem:[#allocation10 + $0x8] sm:$0xff]   ;;  %v2227_v62 = vld [vmem:[#allocation10 + $0x10] sm:$0xff]   ;;  %v2228_v63 = vld [vmem:[#allocation10 + $0x18] sm:$0xff]   ;;  %s2561_s24 = scalar_lea.vmem %s1586_s20, 128  ;;  %s2680_s8 = smov [#allocation21]  }
 0x124   : > { %1971 = vmatpush3.bf16.msra.mxu1 %v2218_v32  ;;  %v2229_v1 = vld [vmem:[#allocation10 + $0x20] sm:$0xff]   ;;  %v2230_v2 = vld [vmem:[#allocation10 + $0x28] sm:$0xff]   ;;  %p2562_p1 = scmp.ne.s32.totalorder %s1586_s20, %s2561_s24  ;;  %s2565_s25 = sshll.u32 %s2680_s8, 4  ;;  %s2566_s25 = int_to_ptr.vmem [resolvable:$false] %s2565_s25 }
 0x125   : > { %1953 = vmatpush3.bf16.msra.mxu0 %v2203_v3  ;;  %1972 = vmatprep.subr.bf16.mxu1 %v2677_v0  ;;  %v2231_v3 = vld [vmem:[#allocation10 + $0x30] sm:$0xff]   ;;  %v2257_v32 = vld [vmem:[#allocation13 + $0x40] sm:$0xff]   ;;  %p2568_p2 = scmp.lt.s32.totalorder %s1586_s20, %s2566_s25 }
 0x126   : > { %1954 = vmatprep.subr.bf16.mxu0 %v2677_v0  ;;  %v2254_v31 = vld [vmem:[%s3302_s2 + $0x70] ss:$8 sps:$4 sm:$0xff]   ;;  %p3307_p10 = scmp.ne.s32.totalorder %s3304_s19, 0 }
 0x128   : > { %1973 = vmatpush3.bf16.msra.mxu1 %v2219_v33  ;;  %v2258_v33 = vld [vmem:[#allocation13] sm:$0xff]   ;;  %s3306_s14 = smov %s3305_s15  ;;  %s3202_s22 = scalar_lea.hbm %s3305_s15, %s1883_s28 }
 0x129   : > { %1955 = vmatpush3.bf16.msra.mxu0 %v2204_v4  ;;  %1974 = vmatprep.subr.bf16.mxu1 %v2677_v0  ;;  %v2232_v4 = vld [vmem:[#allocation10 + $0x38] sm:$0xff]   ;;  %p2563_p11 = pnand %p2562_p1, %p3307_p10 }
 0x12a   : > { %1956 = vmatprep.subr.bf16.mxu0 %v2677_v0 }
 0x12b   : > { %p2564_p0 = pneg %p2563_p11 }
 0x12c   : > { %1975 = vmatpush3.bf16.msra.mxu1 %v2220_v34  ;;  %v2259_v34 = vld [vmem:[#allocation13 + $0x48] sm:$0xff]  }
 0x12d   : > { %1957 = vmatpush3.bf16.msra.mxu0 %v2205_v5  ;;  %1976 = vmatprep.subr.bf16.mxu1 %v2677_v0 }
 0x12e   : > { %1958 = vmatprep.subr.bf16.mxu0 %v2677_v0 }
 0x130   : > { %1977 = vmatpush3.bf16.msra.mxu1 %v2221_v35  ;;  %v2260_v35 = vld [vmem:[#allocation13 + $0x8] sm:$0xff]  }
 0x131   : > { %1959 = vmatpush3.bf16.msra.mxu0 %v2206_v6  ;;  %1978 = vmatprep.subr.bf16.mxu1 %v2677_v0 }
 0x132   : > { %1960 = vmatprep.subr.bf16.mxu0 %v2677_v0 }
 0x134   : > { %1979 = vmatpush3.bf16.msra.mxu1 %v2222_v36  ;;  %v2261_v36 = vld [vmem:[#allocation13 + $0x50] sm:$0xff]  }
 0x135   : > { %1961 = vmatpush3.bf16.msra.mxu0 %v2207_v7  ;;  %1980 = vmatprep.subr.bf16.mxu1 %v2677_v0 }
 0x136   : > { %1962 = vmatprep.subr.bf16.mxu0 %v2677_v0 }
 0x138   : > { %1981 = vmatpush3.bf16.msra.mxu1 %v2223_v37  ;;  %v2262_v37 = vld [vmem:[#allocation13 + $0x10] sm:$0xff]  }
 0x139   : > { %1963 = vmatpush3.bf16.msra.mxu0 %v2208_v8  ;;  %1982 = vmatprep.subr.bf16.mxu1 %v2677_v0 }
 0x13a   : > { %1988 = vmatprep.subr.bf16.mxu0 %v2677_v0 }
 0x13c   : > { %1965 = vmatmul.mubr.bf16.vlgmr.msra.gmra.mrb[0].mxu0 %v3088_v11  ;;  %1983 = vmatpush3.bf16.msra.mxu1 %v2224_v38  ;;  %v2263_v38 = vld [vmem:[#allocation13 + $0x58] sm:$0xff]  }
 0x13d   : > { %1989 = vmatpush3.bf16.msra.mxu0 %v2209_v10  ;;  %2004 = vmatprep.mubr.msk.bf16.mxu0 %vm2678_vm0, %v2677_v0 }
 0x13e   : > { %1990 = vmatprep.subr.bf16.mxu0 %v2677_v0  ;;  %2014 = vmatprep.subr.bf16.mxu1 %v2677_v0 }
 0x13f   : > { %1985 = vmatmul.mubr.bf16.vlgmr.msra.gmra.mrb[0].mxu1 %v3088_v11 }
 0x140   : > { %2016 = vmatprep.mubr.msk.bf16.mxu1 %vm2678_vm0, %v2677_v0 }
 0x141   : > { %1991 = vmatpush3.bf16.msra.mxu0 %v2210_v12  ;;  %v2235_v12 = vld [vmem:[%s3302_s2 + $0x4] ss:$8 sps:$4 sm:$0xff]  }
 0x142   : > { %1992 = vmatprep.subr.bf16.mxu0 %v2677_v0 }
 0x145   : > { %1993 = vmatpush3.bf16.msra.mxu0 %v2211_v13 }
 0x146   : > { %1994 = vmatprep.subr.bf16.mxu0 %v2677_v0 }
 0x149   : > { %1995 = vmatpush3.bf16.msra.mxu0 %v2212_v14 }
 0x14a   : > { %1996 = vmatprep.subr.bf16.mxu0 %v2677_v0 }
 0x14d   : > { %1997 = vmatpush3.bf16.msra.mxu0 %v2213_v15 }
 0x14e   : > { %1998 = vmatprep.subr.bf16.mxu0 %v2677_v0 }
 0x151   : > { %1999 = vmatpush3.bf16.msra.mxu0 %v2214_v16 }
 0x152   : > { %2000 = vmatprep.subr.bf16.mxu0 %v2677_v0 }
 0x155   : > { %2001 = vmatpush3.bf16.msra.mxu0 %v2215_v17 }
 0x156   : > { %2002 = vmatprep.subr.bf16.mxu0 %v2677_v0 }
 0x159   : > { %2003 = vmatpush3.bf16.msra.mxu0 %v2216_v18  ;;  %v2238_v18 = vld [vmem:[%s3302_s2 + $0x14] ss:$8 sps:$4 sm:$0xff]  }
 0x15a   : > { %2008 = vmatprep.subr.bf16.mxu0 %v2677_v0 }
 0x15c   : > { %2005 = vmatmul.mubr.bf16.vlgmr.msra.gmra.mrb[4].mxu0 %v3088_v11  ;;  %v2233_v11 = vld [vmem:[%s3302_s2] ss:$8 sps:$4 sm:$0xff]  }
 0x15d   : > { %2010 = vmatprep.mubr.msk.bf16.mxu0 %vm2678_vm0, %v2677_v0 }
 0x20f   : > { %v737_v19 = vpop.f32.mrb[0].mxu0 }
 0x210   : > { %v743_v20 = vpack.c.bf16 %v737_v19, %v737_v19  ;;  %v1966_v21 = vpop.f32.mrb[1].mxu0  ;;  %v2236_v19 = vld [vmem:[%s3302_s2 + $0x10] ss:$8 sps:$4 sm:$0xff]  }
 0x211   : > { %v740_v22 = vpop.f32.mrb[2].mxu0  ;;  %v2244_v21 = vld [vmem:[%s3302_s2 + $0x34] ss:$8 sps:$4 sm:$0xff]  }
 0x212   : > { %744 = vst [vmem:[#allocation2] sm:$0xf] %v743_v20  ;;  %v1967_v23 = vpop.f32.mrb[3].mxu0  ;;  %v843_v44 = vpop.f32.mrb[0].mxu1  ;;  %v2239_v20 = vld [vmem:[%s3302_s2 + $0x20] ss:$8 sps:$4 sm:$0xff]  }
 0x213   : > { %v849_v45 = vpack.c.bf16 %v843_v44, %v843_v44  ;;  %v1986_v46 = vpop.f32.mrb[1].mxu1  ;;  %v2242_v22 = vld [vmem:[%s3302_s2 + $0x30] ss:$8 sps:$4 sm:$0xff]   ;;  %v2245_v23 = vld [vmem:[%s3302_s2 + $0x40] ss:$8 sps:$4 sm:$0xff]  }
 0x214   : > { %v846_v47 = vpop.f32.mrb[2].mxu1 }
 0x215   : > { %850 = vst [vmem:[#allocation3] sm:$0xf] %v849_v45  ;;  %v1987_v48 = vpop.f32.mrb[3].mxu1 }
 0x219   : > { %v961_v24 = vld [vmem:[#allocation2] sm:$0xf] }
 0x21a   : > { %2009 = vmatpush3.bf16.xpose.msra.mxu0 %v961_v24  ;;  %v2247_v24 = vld [vmem:[%s3302_s2 + $0x44] ss:$8 sps:$4 sm:$0xff]  }
 0x21b   : > { %1308 = vmatprep.subr.bf16.mxu0 %v2235_v12 }
 0x21c   : > { %v1015_v54 = vld [vmem:[#allocation3] sm:$0xf] }
 0x21d   : > { %v1021_v55 = vsel %vm1019_vm2, %v1015_v54, 0 }
 0x21e   : > { %2015 = vmatpush3.bf16.msra.mxu1 %v1021_v55  ;;  %v1846_v55 = vld [vmem:[#allocation16] ss:$0 sm:$0xff] }
 0x21f   : > { %2020 = vmatprep.subr.bf16.mxu1 %v2677_v0 }
 0x22f   : > { %v953_v25 = vpop.f32.mrb[4].mxu0 }
 0x230   : > { %v959_v26 = vmul.f32 0.088388346, %v953_v25  ;;  %v2006_v27 = vpop.f32.mrb[5].mxu0  ;;  %v2250_v25 = vld [vmem:[%s3302_s2 + $0x54] ss:$8 sps:$4 sm:$0xff]  }
 0x231   : > { %v956_v28 = vpop.f32.mrb[6].mxu0  ;;  %v2248_v27 = vld [vmem:[%s3302_s2 + $0x50] ss:$8 sps:$4 sm:$0xff]  }
 0x232   : > { %v960_v29 = vpack.c.bf16 %v959_v26, %v959_v26  ;;  %v2007_v30 = vpop.f32.mrb[7].mxu0  ;;  %v2679_v26 = vmov 0   ;;  %v2253_v28 = vld [vmem:[%s3302_s2 + $0x64] ss:$8 sps:$4 sm:$0xff]  }
 0x233   : > { %v2256_v30 = vld [vmem:[%s3302_s2 + $0x74] ss:$8 sps:$4 sm:$0xff]  }
 0x234   : > { %2011 = vmatmul.mubr.bf16.vlgmr.msra.gmra.mrb[8].mxu0 %v960_v29  ;;  %v2251_v29 = vld [vmem:[%s3302_s2 + $0x60] ss:$8 sps:$4 sm:$0xff]  }
 0x235   : > { %1309 = vmatpush1.bf16.msra.mxu0 %v2233_v11  ;;  %1340 = vmatprep.mubr.bf16.mxu0 %v2679_v26 }
 0x236   : > { %1310 = vmatprep.subr.bf16.mxu0 %v2238_v18  ;;  %v1863_v18 = vld [vmem:[%s3303_s23] ss:$0 sm:$0xff]  ;;  %s2567_s23 = scalar_lea.vmem %s2566_s25, 256 }
 0x237   : > { %p2569_p3 = scmp.lt.s32.totalorder %s2567_s23, %s2561_s24 }
 0x239   : > { %1311 = vmatpush1.bf16.msra.mxu0 %v2236_v19  ;;  %p2570_p5 = por %p2569_p3, %p2568_p2 }
 0x23b   : > { %p2571_p6 = pnand %p2570_p5, %p2564_p0 }
 0x307   : > { %v996_v39 = vpop.f32.mrb[8].mxu0 }
 0x308   : > { %v2012_v40 = vpop.f32.mrb[9].mxu0  ;;  %v1003_v41 = vsel %vm1002_vm1, %v996_v39, -inf }
 0x309   : > { %1004 = vmax.xlane.f32.xlu0 %v1003_v41  ;;  %v999_v42 = vpop.f32.mrb[10].mxu0  ;;  %v2265_v40 = vld [vmem:[#allocation13 + $0x60] sm:$0xff]  }
 0x30a   : > { %v2013_v43 = vpop.f32.mrb[11].mxu0  ;;  %v2266_v41 = vld [vmem:[#allocation13 + $0x20] sm:$0xff]   ;;  %v2267_v42 = vld [vmem:[#allocation13 + $0x68] sm:$0xff]  }
 0x30b   : > { %v2268_v43 = vld [vmem:[#allocation13 + $0x28] sm:$0xff]  }
 0x396   : > { %v1005_v49 = vpop.xlane.xlu0 %1004 }
 0x397   : > { %v1006_v50 = vsub.f32 %v996_v39, %v1005_v49  ;;  %v2264_v39 = vld [vmem:[#allocation13 + $0x18] sm:$0xff]  }
 0x399   : > { %v1007_v51 = vmul.f32 1.442695, %v1006_v50 }
 0x39b   : > { %2273 = vpow2.f32 %v1007_v51 }
 0x3a5   : > { %v2274_v52 = vpop.eup %2273 }
 0x3a6   : > { %v1009_v53 = vsel %vm1002_vm1, %v2274_v52, 0.0 }
 0x3a7   : > { %1010 = vadd.xlane.f32.xlu0 %v1009_v53  ;;  %v1845_v53 = vld [vmem:[#allocation15] ss:$0 sm:$0xff] }
 0x434   : > { %v1011_v56 = vpop.xlane.xlu0 %1010 }
 0x435   : > { %2275 = vrcp.f32 %v1011_v56 }
 0x43f   : > { %v2276_v57 = vpop.eup %2275 }
 0x440   : > { %v1013_v58 = vmul.f32 %v2276_v57, %v2274_v52 }
 0x442   : > { %v1014_v60 = vpack.c.bf16 %v1013_v58, %v1013_v58  ;;  %1559 = vst.msk [vmem:[%s620_s13] sm:$0xff] %vm1002_vm1, %v1013_v58 }
 0x444   : > { %2017 = vmatmul.mubr.msk.bf16.vlgmr.msra.gmra.mrb[4].mxu1 %vm1002_vm1, %v1014_v60  ;;  %v2270_v60 = vld [vmem:[#allocation13 + $0x30] sm:$0xff]  }
 0x445   : > { %2021 = vmatpush3.bf16.msra.mxu1 %v2225_v59  ;;  %2036 = vmatprep.mubr.msk.bf16.mxu1 %vm2678_vm0, %v2677_v0  ;;  %v2269_v59 = vld [vmem:[#allocation13 + $0x70] sm:$0xff]  }
 0x446   : > { %2022 = vmatprep.subr.bf16.mxu1 %v2677_v0 }
 0x449   : > { %2023 = vmatpush3.bf16.msra.mxu1 %v2226_v61  ;;  %v2271_v61 = vld [vmem:[#allocation13 + $0x78] sm:$0xff]  }
 0x44a   : > { %2024 = vmatprep.subr.bf16.mxu1 %v2677_v0 }
 0x44d   : > { %2025 = vmatpush3.bf16.msra.mxu1 %v2227_v62  ;;  %v2272_v62 = vld [vmem:[#allocation13 + $0x38] sm:$0xff]  }
 0x44e   : > { %2026 = vmatprep.subr.bf16.mxu1 %v2677_v0 }
 0x451   : > { %2027 = vmatpush3.bf16.msra.mxu1 %v2228_v63  ;;  %v1218_v63 = vlaneseq }
 0x452   : > { %2028 = vmatprep.subr.bf16.mxu1 %v2677_v0 }
 0x455   : > { %2029 = vmatpush3.bf16.msra.mxu1 %v2229_v1  ;;  %v1219_v1 = vshrl.u32 %v1218_v63, 7 }
 0x456   : > { %2030 = vmatprep.subr.bf16.mxu1 %v2677_v0 }
 0x459   : > { %2031 = vmatpush3.bf16.msra.mxu1 %v2230_v2  ;;  %v1220_v2 = vsub.s32 0, %v1219_v1 }
 0x45a   : > { %2032 = vmatprep.subr.bf16.mxu1 %v2677_v0 }
 0x45d   : > { %2033 = vmatpush3.bf16.msra.mxu1 %v2231_v3  ;;  %v1216_v3 = vld [vmem:[#allocation12] sm:$0x3] }
 0x45e   : > { %2034 = vmatprep.subr.bf16.mxu1 %v2677_v0 }
 0x461   : > { %2035 = vmatpush3.bf16.msra.mxu1 %v2232_v4  ;;  %v1224_v4 = vsub.s32 1, %v1219_v1 }
 0x462   : > { %1926 = vmatprep.subr.bf16.mxu1 %v2257_v32 }
 0x517   : > { %v1057_v5 = vpop.f32.mrb[4].mxu1 }
 0x518   : > { %v1063_v6 = vpack.c.bf16 %v1057_v5, %v1057_v5  ;;  %v2018_v7 = vpop.f32.mrb[5].mxu1  ;;  %v1221_v5 = vrot.slane %v1216_v3, %v1220_v2 }
 0x519   : > { %v1060_v8 = vpop.f32.mrb[6].mxu1 }
 0x51a   : > { %v2019_v10 = vpop.f32.mrb[7].mxu1  ;;  %2037 = vmatmul.mubr.bf16.vlgmr.msra.gmra.mrb[8].mxu1 %v1063_v6  ;;  %v1225_v6 = vrot.slane %v1216_v3, %v1224_v4 }
 0x51b   : > { %1927 = vmatpush3.bf16.msra.mxu1 %v2258_v33 }
 0x51c   : > { %1928 = vmatprep.subr.bf16.mxu1 %v2259_v34 }
 0x51f   : > { %1929 = vmatpush3.bf16.msra.mxu1 %v2260_v35 }
 0x520   : > { %1930 = vmatprep.subr.bf16.mxu1 %v2261_v36 }
 0x523   : > { %1931 = vmatpush3.bf16.msra.mxu1 %v2262_v37 }
 0x524   : > { %1932 = vmatprep.subr.bf16.mxu1 %v2263_v38 }
 0x527   : > { %1933 = vmatpush3.bf16.msra.mxu1 %v2264_v39 }
 0x528   : > { %1934 = vmatprep.subr.bf16.mxu1 %v2265_v40 }
 0x52b   : > { %1935 = vmatpush3.bf16.msra.mxu1 %v2266_v41 }
 0x52c   : > { %1936 = vmatprep.subr.bf16.mxu1 %v2267_v42 }
 0x52f   : > { %1937 = vmatpush3.bf16.msra.mxu1 %v2268_v43 }
 0x530   : > { %1938 = vmatprep.subr.bf16.mxu1 %v2269_v59 }
 0x533   : > { %1939 = vmatpush3.bf16.msra.mxu1 %v2270_v60 }
 0x534   : > { %1940 = vmatprep.subr.bf16.mxu1 %v2271_v61 }
 0x537   : > { %1941 = vmatpush3.bf16.msra.mxu1 %v2272_v62 }
 0x5ed   : > { %v1162_v13 = vpop.f32.mrb[8].mxu1 }
 0x5ee   : > { %v3145_v0 = vadd.f32 %v1162_v13, %v3083_v9  ;;  %v2038_v14 = vpop.f32.mrb[9].mxu1  ;;  %v2241_v9 = vld [vmem:[%s3302_s2 + $0x24] ss:$8 sps:$4 sm:$0xff]  }
 0x5ef   : > { %v1165_v15 = vpop.f32.mrb[10].mxu1  ;;  %1312 = vmatprep.subr.bf16.mxu0 %v2241_v9 }
 0x5f0   : > { %1169 = vadd.xlane.f32.xlu1 %v3145_v0  ;;  %v2039_v16 = vpop.f32.mrb[11].mxu1  ;;  %v1173_v17 = vmul.f32 %v3145_v0, %v3145_v0  ;;  %1313 = vmatpush1.bf16.msra.mxu0 %v2239_v20 }
 0x5f1   : > { %1314 = vmatprep.subr.bf16.mxu0 %v2244_v21 }
 0x5f4   : > { %1174 = vadd.xlane.f32.xlu1 %v1173_v17  ;;  %1315 = vmatpush1.bf16.msra.mxu0 %v2242_v22 }
 0x5f5   : > { %1316 = vmatprep.subr.bf16.mxu0 %v2247_v24 }
 0x5f8   : > { %1317 = vmatpush1.bf16.msra.mxu0 %v2245_v23 }
 0x5f9   : > { %1318 = vmatprep.subr.bf16.mxu0 %v2250_v25 }
 0x5fc   : > { %1319 = vmatpush1.bf16.msra.mxu0 %v2248_v27 }
 0x5fd   : > { %1320 = vmatprep.subr.bf16.mxu0 %v2253_v28 }
 0x600   : > { %1321 = vmatpush1.bf16.msra.mxu0 %v2251_v29 }
 0x601   : > { %1322 = vmatprep.subr.bf16.mxu0 %v2256_v30 }
 0x604   : > { %1323 = vmatpush1.bf16.msra.mxu0 %v2254_v31 }
 0x67d   : > { %v1170_v44 = vpop.xlane.xlu1 %1169 }
 0x67e   : > { %v1172_v45 = vmul.f32 0.0078125, %v1170_v44 }
 0x680   : > { %v1177_v47 = vmul.f32 %v1172_v45, %v1172_v45  ;;  %v1179_v51 = vsub.f32 %v3145_v0, %v1172_v45 }
 0x681   : > { %v1175_v46 = vpop.xlane.xlu1 %1174 }
 0x682   : > { %v1176_v48 = vmul.f32 0.0078125, %v1175_v46 }
 0x684   : > { %v1178_v49 = vsub.f32 %v1176_v48, %v1177_v47 }
 0x686   : > { %v1180_v50 = vadd.f32 1e-05, %v1178_v49 }
 0x688   : > { %2277 = vrsqrt.f32 %v1180_v50 }
 0x692   : > { %v2278_v52 = vpop.eup %2277 }
 0x693   : > { %v1182_v54 = vmul.f32 %v2278_v52, %v1179_v51 }
 0x695   : > { %v1190_v56 = vmul.f32 %v1845_v53, %v1182_v54 }
 0x697   : > { %v1198_v57 = vadd.f32 %v1846_v55, %v1190_v56 }
 0x699   : > { %v1199_v58 = vpack.c.bf16 %v1198_v57, %v1198_v57 }
 0x69b   : > { %1341 = vmatmul.mubr.bf16.vlgmr.msra.gmra.mrb[12].mxu0 %v1199_v58 }
 0x76e   : > { %v1342_v7 = vpop.f32.mrb[12].mxu0 }
 0x76f   : > { %v1343_v8 = vadd.f32 %v1342_v7, %v1221_v5  ;;  %v1344_v10 = vpop.f32.mrb[13].mxu0 }
 0x770   : > { %v1345_v11 = vadd.f32 %v1344_v10, %v1225_v6  ;;  %v1346_v12 = vpop.f32.mrb[14].mxu0 }
 0x771   : > { %v1349_v13 = vmax.f32 %v1343_v8, 0.0  ;;  %v1347_v0 = vpop.f32.mrb[15].mxu0 }
 0x772   : > { %v1350_v14 = vmax.f32 %v1345_v11, 0.0 }
 0x773   : > { %v1351_v16 = vpack.c.bf16 %v1349_v13, %v1349_v13 }
 0x774   : > { %v1352_v15 = vpack.c.bf16 %v1350_v14, %v1350_v14 }
 0x776   : > { %1520 = vmatprep.mubr.bf16.mxu1 %v1352_v15 }
 0x777   : > { %1521 = vmatmul.mubr.bf16.vlgmr.msra.gmra.mrb[12].mxu1 %v1351_v16 }
 0x84a   : > { %v1942_v17 = vpop.f32.mrb[12].mxu1 }
 0x84b   : > { %v1943_v19 = vpop.f32.mrb[13].mxu1 }
 0x84c   : > { %v1944_v9 = vadd.f32 %v1943_v19, %v1942_v17  ;;  %v1945_v20 = vpop.f32.mrb[14].mxu1 }
 0x84d   : > { %v1946_v21 = vpop.f32.mrb[15].mxu1 }
 0x84e   : > { %v1523_v22 = vadd.f32 %v1944_v9, %v1863_v18 }
 0x850   : > { %v1528_v23 = vadd.f32 %v1523_v22, %v1198_v57 }
 0x852   : > { %1529 = vadd.xlane.f32.xlu0 %v1528_v23  ;;  %v1532_v24 = vmul.f32 %v1528_v23, %v1528_v23 }
 0x854   : > { %1533 = vadd.xlane.f32.xlu1 %v1532_v24 }
 0x855   : > { %2574 = shalt.err (!%p2571_p6)
}
 0x856   : > { %s2575_s16 = scalar_lea.hbm %s3202_s22, 128  ;;  %s2579_s13 = scalar_lea.hbm %s3306_s14, 256 }
 0x857   : > { %p2576_p7 = scmp.ne.s32.totalorder %s3202_s22, %s2575_s16  ;;  %p2580_p4 = scmp.lt.u32.totalorder %s3202_s22, %s3306_s14 }
 0x858   : > { %p2581_p8 = scmp.lt.u32.totalorder %s2579_s13, %s2575_s16  ;;  %p2583_p1 = scmp.lt.u32.totalorder %s2575_s16, %s3202_s22 }
 0x859   : > { %p2577_p9 = pnand %p2576_p7, %p3307_p10 }
 0x85a   : > { %p2582_p13 = por %p2581_p8, %p2580_p4 }
 0x85b   : > { %p2578_p12 = pneg %p2577_p9 }
 0x85c   : > { %p2584_p11 = por %p2583_p1, %p2582_p13 }
 0x85e   : > { %p2585_p0 = pnand %p2584_p11, %p2578_p12 }
 0x860   : > { %2588 = shalt.err (!%p2585_p0)
}
 0x861   : > { %2080 = dma.vmem_to_hbm [thread:$0]  (%p3307_p10), %s1586_s20, 128, %s3202_s22, %s1568_s26   ;;  %v1880_v34 = vld [vmem:[#allocation18] ss:$0 sm:$0xff]  ;;  %v1881_v36 = vld [vmem:[#allocation19] ss:$0 sm:$0xff] }
 0x862   : > { %s3308_s15 = sld [smem:[#allocation40_spill]] }
 0x868   : > { %s631_s24 = scalar_lea.vmem %s3308_s15, %s1810_s27 }
 0x8df   : > { %v1530_v25 = vpop.xlane.xlu0 %1529 }
 0x8e0   : > { %v1531_v26 = vmul.f32 0.0078125, %v1530_v25 }
 0x8e1   : > { %v1534_v27 = vpop.xlane.xlu1 %1533 }
 0x8e2   : > { %v1536_v28 = vmul.f32 %v1531_v26, %v1531_v26  ;;  %v1535_v29 = vmul.f32 0.0078125, %v1534_v27  ;;  %v1538_v32 = vsub.f32 %v1528_v23, %v1531_v26 }
 0x8e4   : > { %v1537_v30 = vsub.f32 %v1535_v29, %v1536_v28 }
 0x8e6   : > { %v1539_v31 = vadd.f32 1e-05, %v1537_v30 }
 0x8e8   : > { %2279 = vrsqrt.f32 %v1539_v31 }
 0x8f2   : > { %v2280_v33 = vpop.eup %2279 }
 0x8f3   : > { %v1541_v35 = vmul.f32 %v2280_v33, %v1538_v32 }
 0x8f5   : > { %v1549_v37 = vmul.f32 %v1880_v34, %v1541_v35 }
 0x8f7   : > { %v1557_v38 = vadd.f32 %v1881_v36, %v1549_v37 }
 0x8f9   : > { %1558 = vst [vmem:[%s631_s24] sm:$0xff] %v1557_v38 }
 0x8fa PF: > { %s3309_s20 = sld [smem:[#allocation32_spill]]  ;;  %s3310_s22 = sld [smem:[#allocation29_spill]] }
 0x8fb   : > { %s3311_s26 = sld [smem:[#allocation35_spill]] }
 0x900   : > { %p2137_p10 = scmp.ge.s32.totalorder %s3309_s20, 2  ;;  %s1607_s8 = sand.u32 1, %s3310_s22  }
 0x901   : > { %p3312_p2 = scmp.ne.s32.totalorder %s3311_s26, 0  ;;  %s1608_s25 = scalar_lea.sflag [#allocation6], %s1607_s8 }
 0x903   : > { %p2114_p3 = pnand %p2137_p10, %p3312_p2 }
 0x905   : > { %2638 = dma.done.wait (!%p2114_p3), %s1608_s25, 128  }
 0x906   : > { %2640 = vsyncadd (!%p2114_p3), %s1608_s25, 4294967168  ;;  %s34_s18 = sadd.s32 1, %s3309_s20   ;;  %s3313_s21 = sld [smem:[#allocation30_spill]] }
 0x907   : > { %p31_p5 = scmp.ge.s32.totalorder %s34_s18, 4   ;;  %s3314_s15 = sld [smem:[#allocation36_spill]] }
 0x908   : > { %s3315_s16 = sld [smem:[#allocation31_spill]]  ;;  %s3316_s17 = sld [smem:[#allocation33_spill]] }
 0x909   : > { %s3317_s29 = smov %s2647_s30  ;;  %33 = sbr.rel (!%p31_p5) target bundleno = 16 (0x10), region = 165 }
 0x90c   : > { %s3318_s30 = smov %s3313_s21 }
 0x910   :  { %1613 = vsyncpa [#allocation5], 1 }
 0x911   :  { %1615 = vsyncpa [#allocation5 + $0x1], 1 }
 0x912   :  { %1616 = vsyncpa [#allocation8], 1 }
 0x913   :  { %1617 = vsyncpa [#allocation11], 1 }
 0x914   :  { %1618 = vsyncpa [#allocation14], 1 }
 0x915   :  { %1619 = vsyncpa [#allocation17], 1 }
 0x916   :  { %1620 = vsyncpa [#allocation20], 1 }
 0x917   :  { %1621 = vsyncpa [#allocation6], 1 }
 0x918   :  { %1623 = vsyncpa [#allocation6 + $0x1], 1 }

// kernel: encoder_stack_forward.3
= control target key start
LH: loop header
LB: loop body
LE: loop exit
PB: predicated region body
PF: predicated region fallthrough
CT: control target
= control target key end

     0   :  { %s2695_s0 = inlined_call_operand.vmem [shape: f32[2,32,128], index: 0, kind: input, shape index: {}]   ;;  %s2696_s1 = inlined_call_operand.vmem [shape: bf16[128,128], index: 1, kind: input, shape index: {}]   ;;  %s2697_s2 = inlined_call_operand.vmem [shape: bf16[128,128], index: 2, kind: input, shape index: {}]   ;;  %s2698_s3 = inlined_call_operand.vmem [shape: bf16[128,128], index: 3, kind: input, shape index: {}]   ;;  %s2699_s4 = inlined_call_operand.vmem [shape: bf16[128,128], index: 4, kind: input, shape index: {}]   ;;  %s2700_s5 = inlined_call_operand.vmem [shape: bf16[128,256], index: 5, kind: input, shape index: {}]   ;;  %s2701_s6 = inlined_call_operand.vmem [shape: f32[1,256], index: 6, kind: input, shape index: {}]   ;;  %s2702_s7 = inlined_call_operand.vmem [shape: bf16[256,128], index: 7, kind: input, shape index: {}]   ;;  %s2703_s8 = inlined_call_operand.vmem [shape: f32[1,128], index: 8, kind: input, shape index: {}]   ;;  %s2704_s9 = inlined_call_operand.vmem [shape: f32[1,128], index: 9, kind: input, shape index: {}]   ;;  %s2705_s10 = inlined_call_operand.vmem [shape: f32[1,128], index: 10, kind: input, shape index: {}]   ;;  %s2706_s11 = inlined_call_operand.vmem [shape: f32[1,128], index: 11, kind: input, shape index: {}]   ;;  %s2707_s12 = inlined_call_operand.vmem [shape: f32[1,128], index: 12, kind: input, shape index: {}]   ;;  %s2708_s13 = inlined_call_operand.vmem [shape: f32[2,32,128], index: 13, kind: output, shape index: {0}]   ;;  %s2709_s14 = inlined_call_operand.hbm [shape: f32[2,32,32], index: 14, kind: output, shape index: {1}]  }
   0x1   :  { %2724 = sst [smem:[#allocation18_spill]] %s2706_s11 }
   0x2   :  { %2725 = sst [smem:[#allocation19_spill]] %s2707_s12 }
   0x3   :  { %2726 = sst [smem:[#allocation20_spill]] %s2709_s14 }
   0x4   :  { %20 = vsyncpa [#allocation5], 0 }
   0x5   :  { %22 = vsyncpa [#allocation5 + $0x1], 0  ;;  %s2250_s29 = smov 0   ;;  %s2252_s30 = smov 0  }
   0x6   :  { %s2254_s15 = smov 0   ;;  %s2256_s16 = smov 0  }
   0x7   :  { %s2258_s17 = smov 0   ;;  %s2260_s18 = smov 0  }
   0x8   :  { %s2262_s19 = smov 0   ;;  %s2264_s20 = smov 0  }
   0x9 LB: > { %2727 = sst [smem:[#allocation7_spill]] %s2139_s29  ;;  %s1657_s21 = sadd.s32 4294967295, %s2167_s20   ;;  %s2167_s20 = sphi %s2264_s20, %s28_s20   ;;  %s2163_s19 = sphi %s2262_s19, %s2755_s19   ;;  %s2159_s18 = sphi %s2260_s18, %s2754_s18   ;;  %s2155_s17 = sphi %s2258_s17, %s2753_s17   ;;  %s2151_s16 = sphi %s2256_s16, %s2752_s16   ;;  %s2147_s15 = sphi %s2254_s15, %s2751_s15   ;;  %s2143_s30 = sphi %s2252_s30, %s2750_s30   ;;  %s2139_s29 = sphi %s2250_s29, %s2749_s29  }
   0xa   : > { %2728 = sst [smem:[#allocation8_spill]] %s2143_s30  ;;  %s1658_s22 = sadd.s32 4294967294, %s2167_s20  }
   0xb   : > { %2729 = sst [smem:[#allocation9_spill]] %s2147_s15  ;;  %s37_s23 = sadd.s32 1, %s2159_s18 }
   0xc   : > { %2730 = sst [smem:[#allocation10_spill]] %s2159_s18  ;;  %p38_p0 = scmp.ge.s32.totalorder %s37_s23, 2 }
   0xd   : > { %2731 = sst [smem:[#allocation11_spill]] %s2163_s19  ;;  %s40_s24 = sadd.s32 1, %s2163_s19 }
   0xe   : > { %2732 = sst [smem:[#allocation12_spill]] %s2167_s20  ;;  %p365_p1 = scmp.ne.s32.totalorder %s2147_s15, %s2143_s30 }
   0xf   : > { %p366_p2 = scmp.eq.s32.totalorder %s1657_s21, 3  ;;  %s2757_s23 = smov (%p38_p0, %s37_s23), 0 }
  0x10   : > { %2733 = sst [smem:[#allocation13_spill]] %s2757_s23  ;;  %s2759_s24 = smov (!%p38_p0, %s40_s24), %s2163_s19 }
  0x11   : > { %s351_s25 = ssub.s32 %s2159_s18, %s2757_s23  ;;  %p2301_p3 = por %p366_p2, %p365_p1 }
  0x12   : > { %p42_p4 = scmp.ge.s32.totalorder %s2759_s24, 2  ;;  %p371_p5 = scmp.ne.s32.totalorder %s2143_s30, %s2139_s29 }
  0x13   : > { %s2734_s26 = scalar_select %p2301_p3, 1, 0 }
  0x14   : > { %p372_p6 = scmp.eq.s32.totalorder %s1658_s22, 3  ;;  %p1661_p7 = scmp.ge.s32.totalorder %s2167_s20, 1 }
  0x15   : > { %2735 = sst [smem:[#allocation14_spill]] %s2734_s26  ;;  %s2761_s24 = smov (%p42_p4, %s2759_s24), 0 }
  0x16   : > { %2736 = sst [smem:[#allocation15_spill]] %s2761_s24  ;;  %p2310_p8 = por %p372_p6, %p371_p5 }
  0x17   : > { %p434_p9 = scmp.lt.s32.totalorder %s2167_s20, 5  ;;  %s350_s28 = ssub.s32 %s2163_s19, %s2761_s24 }
  0x18   : > { %s2737_s27 = scalar_select %p2310_p8, 1, 0 }
  0x19   : > { %s355_s21 = sadd.s32 1, %s2147_s15  ;;  %s352_s12 = sor.u32 %s351_s25, %s350_s28 }
  0x1a   : > { %2738 = sst [smem:[#allocation16_spill]] %s2737_s27  ;;  %p435_p10 = pnand %p1661_p7, %p434_p9 }
  0x1b   : > { %p353_p11 = scmp.eq.s32.totalorder %s352_s12, 0  ;;  %s2719_s22 = sand.u32 (!%p435_p10), 1, %s2143_s30  }
  0x1c   : > { %438 = sbr.rel (%p435_p10) target bundleno = 2288 (0x8f0), region = 72  ;;  %p489_p12 = scmp.lt.s32.totalorder (!%p435_p10), %s2155_s17, 1 }
  0x1d   : > { %s2319_s23 = scalar_select %p353_p11, %s2147_s15, %s355_s21  }
  0x1e   : > { %s1662_s18 = sshll.u32 (!%p435_p10), %s2719_s22, 4  ;;  %s2326_s29 = sshll.u32 (!%p435_p10), %s2151_s16, 1 }
  0x1f   : > { %2739 = sst [smem:[#allocation17_spill]] %s2319_s23  ;;  %p497_p13 = scmp.lt.s32.totalorder (!%p435_p10), %s2326_s29, 3 }
  0x20   : > { %s2341_s14 = scalar_lea.vmem (!%p435_p10), [#allocation4], %s1662_s18  ;;  %p1668_p0 = scmp.ne.s32.totalorder (!%p435_p10), %s2151_s16, 0 }
  0x23   : > { %s490_s25 = scalar_select %p489_p12, %s2155_s17, 1 }
  0x24   : > { %s498_s28 = scalar_select %p497_p13, %s2326_s29, 3 }
  0x25   : > { %s1746_s12 = sshll.u32 %s490_s25, 5  ;;  %s1666_s21 = sshll.u32 %s490_s25, 2  ;;  %v1985_v0 = vld [vmem:[%s2697_s2] sm:$0xff] (!%p1668_p0)   ;;  %v1987_v2 = vld [vmem:[%s2697_s2 + $0x8] sm:$0xff] (!%p1668_p0)   ;;  %v1989_v4 = vld [vmem:[%s2697_s2 + $0x10] sm:$0xff] (!%p1668_p0)  }
  0x26   : > { %s2334_s23 = scalar_lea.vmem %s2695_s0, %s1746_s12  ;;  %s500_s15 = sadd.s32 %s1666_s21, %s498_s28  ;;  %v1986_v1 = vld [vmem:[%s2698_s3] sm:$0xff] (!%p1668_p0)   ;;  %1813 = vmatprep.subr.bf16.mxu0 (!%p1668_p0), %v1985_v0  ;;  %v1988_v3 = vld [vmem:[%s2698_s3 + $0x8] sm:$0xff] (!%p1668_p0)   ;;  %v1990_v5 = vld [vmem:[%s2698_s3 + $0x10] sm:$0xff] (!%p1668_p0)  }
  0x27   : > { %s1667_s27 = sshll.u32 %s500_s15, 3  ;;  %509 = sbr.rel (%p1668_p0) target bundleno = 289 (0x121), region = 76  ;;  %1833 = vmatprep.subr.bf16.mxu1 (!%p1668_p0), %v1986_v1  ;;  %1814 = vmatpush3.bf16.msra.mxu0 (!%p1668_p0), %v1985_v0  ;;  %v1991_v6 = vld [vmem:[%s2697_s2 + $0x18] sm:$0xff] (!%p1668_p0)   ;;  %v1993_v8 = vld [vmem:[%s2697_s2 + $0x20] sm:$0xff] (!%p1668_p0)   ;;  %v1995_v10 = vld [vmem:[%s2697_s2 + $0x28] sm:$0xff] (!%p1668_p0)  }
  0x28   : > { %s2339_s22 = scalar_lea.vmem %s2708_s13, %s1667_s27  ;;  %1834 = vmatpush3.bf16.msra.mxu1 (!%p1668_p0), %v1986_v1  ;;  %1815 = vmatprep.subr.bf16.mxu0 (!%p1668_p0), %v1987_v2  ;;  %v1992_v7 = vld [vmem:[%s2698_s3 + $0x18] sm:$0xff] (!%p1668_p0)   ;;  %v1994_v9 = vld [vmem:[%s2698_s3 + $0x20] sm:$0xff] (!%p1668_p0)   ;;  %v511_v12 = vld [vmem:[%s2334_s23 + $0x8] sm:$0xff] (!%p1668_p0) }
  0x29   : > { %1835 = vmatprep.subr.bf16.mxu1 (!%p1668_p0), %v1988_v3  ;;  %v510_v11 = vld [vmem:[%s2334_s23] sm:$0xff] (!%p1668_p0)  ;;  %v1996_v13 = vld [vmem:[%s2698_s3 + $0x28] sm:$0xff] (!%p1668_p0)   ;;  %v1997_v15 = vld [vmem:[%s2697_s2 + $0x30] sm:$0xff] (!%p1668_p0)  }
  0x2a   : > { %v514_v14 = vpack.c.bf16 (!%p1668_p0), %v511_v12, %v510_v11  ;;  %v1998_v16 = vld [vmem:[%s2698_s3 + $0x30] sm:$0xff] (!%p1668_p0)   ;;  %v1999_v17 = vld [vmem:[%s2697_s2 + $0x38] sm:$0xff] (!%p1668_p0)  }
  0x2b   : > { %1816 = vmatpush3.bf16.msra.mxu0 (!%p1668_p0), %v1987_v2  ;;  %v2000_v18 = vld [vmem:[%s2698_s3 + $0x38] sm:$0xff] (!%p1668_p0)   ;;  %v512_v19 = vld [vmem:[%s2334_s23 + $0x10] sm:$0xff] (!%p1668_p0) }
  0x2c   : > { %1836 = vmatpush3.bf16.msra.mxu1 (!%p1668_p0), %v1988_v3  ;;  %1817 = vmatprep.subr.bf16.mxu0 (!%p1668_p0), %v1989_v4  ;;  %v513_v20 = vld [vmem:[%s2334_s23 + $0x18] sm:$0xff] (!%p1668_p0) }
  0x2d   : > { %1837 = vmatprep.subr.bf16.mxu1 (!%p1668_p0), %v1990_v5  ;;  %1829 = vmatprep.mubr.bf16.mxu0 (!%p1668_p0), %v514_v14  ;;  %v515_v21 = vpack.c.bf16 (!%p1668_p0), %v513_v20, %v512_v19 }
  0x2e   : > { %1849 = vmatprep.mubr.bf16.mxu1 %v514_v14 }
  0x2f   : > { %1818 = vmatpush3.bf16.msra.mxu0 %v1989_v4 }
  0x30   : > { %1838 = vmatpush3.bf16.msra.mxu1 %v1990_v5  ;;  %1819 = vmatprep.subr.bf16.mxu0 %v1991_v6 }
  0x31   : > { %1839 = vmatprep.subr.bf16.mxu1 %v1992_v7 }
  0x33   : > { %1820 = vmatpush3.bf16.msra.mxu0 %v1991_v6 }
  0x34   : > { %1840 = vmatpush3.bf16.msra.mxu1 %v1992_v7  ;;  %1821 = vmatprep.subr.bf16.mxu0 %v1993_v8 }
  0x35   : > { %1841 = vmatprep.subr.bf16.mxu1 %v1994_v9 }
  0x37   : > { %1822 = vmatpush3.bf16.msra.mxu0 %v1993_v8 }
  0x38   : > { %1842 = vmatpush3.bf16.msra.mxu1 %v1994_v9  ;;  %1823 = vmatprep.subr.bf16.mxu0 %v1995_v10 }
  0x39   : > { %1843 = vmatprep.subr.bf16.mxu1 %v1996_v13 }
  0x3b   : > { %1824 = vmatpush3.bf16.msra.mxu0 %v1995_v10 }
  0x3c   : > { %1844 = vmatpush3.bf16.msra.mxu1 %v1996_v13  ;;  %1825 = vmatprep.subr.bf16.mxu0 %v1997_v15 }
  0x3d   : > { %1845 = vmatprep.subr.bf16.mxu1 %v1998_v16 }
  0x3f   : > { %1826 = vmatpush3.bf16.msra.mxu0 %v1997_v15 }
  0x40   : > { %1846 = vmatpush3.bf16.msra.mxu1 %v1998_v16  ;;  %1827 = vmatprep.subr.bf16.mxu0 %v1999_v17 }
  0x41   : > { %1847 = vmatprep.subr.bf16.mxu1 %v2000_v18 }
  0x43   : > { %1828 = vmatpush3.bf16.msra.mxu0 %v1999_v17 }
  0x44   : > { %1848 = vmatpush3.bf16.msra.mxu1 %v2000_v18 }
  0x46   : > { %1830 = vmatmul.mubr.bf16.vlgmr.msra.gmra.mrb[0].mxu0 %v515_v21 }
  0x47   : > { %1850 = vmatmul.mubr.bf16.vlgmr.msra.gmra.mrb[0].mxu1 %v515_v21 }
 0x119   : > { %v1831_v22 = vpop.f32.mrb[0].mxu0 }
 0x11a   : > { %v1851_v23 = vpop.f32.mrb[0].mxu1  ;;  %v614_v24 = vpop.f32.mrb[1].mxu0 }
 0x11b   : > { %v731_v25 = vpop.f32.mrb[1].mxu1  ;;  %v1832_v26 = vpop.f32.mrb[2].mxu0 }
 0x11c   : > { %v630_v27 = vpack.c.bf16 %v1832_v26, %v1831_v22  ;;  %v1852_v28 = vpop.f32.mrb[2].mxu1  ;;  %v617_v29 = vpop.f32.mrb[3].mxu0 }
 0x11d   : > { %v747_v30 = vpack.c.bf16 %v1852_v28, %v1851_v23  ;;  %v629_v31 = vpack.c.bf16 %v617_v29, %v614_v24  ;;  %v734_v32 = vpop.f32.mrb[3].mxu1 }
 0x11e   : > { %632 = vst [vmem:[#allocation2 + $0x8] sm:$0xff] %v630_v27  ;;  %v746_v33 = vpack.c.bf16 %v734_v32, %v731_v25 }
 0x11f   : > { %749 = vst [vmem:[#allocation3 + $0x8] sm:$0xff] %v747_v30  ;;  %631 = vst [vmem:[#allocation2] sm:$0xff] %v629_v31 }
 0x120   : > { %748 = vst [vmem:[#allocation3] sm:$0xff] %v746_v33 }
 0x121 PF: > { %v2001_v34 = vld [vmem:[%s2696_s1] sm:$0xff]   ;;  %v2169_v35 = vmov 0.0   ;;  %v2002_v36 = vld [vmem:[%s2696_s1 + $0x8] sm:$0xff]   ;;  %vm2170_vm0 = vmmov 0   ;;  %v2003_v37 = vld [vmem:[%s2696_s1 + $0x10] sm:$0xff]   ;;  %s1685_s24 = sshll.u32 %s2151_s16, 4 }
 0x122   : > { %1853 = vmatprep.subr.bf16.mxu0 %v2169_v35  ;;  %1881 = vmatprep.subr.bf16.mxu1 %v2169_v35  ;;  %v2004_v38 = vld [vmem:[%s2696_s1 + $0x18] sm:$0xff]   ;;  %v2005_v39 = vld [vmem:[%s2696_s1 + $0x20] sm:$0xff]   ;;  %v2006_v40 = vld [vmem:[%s2696_s1 + $0x28] sm:$0xff]   ;;  %s751_s20 = scalar_lea.vmem %s2334_s23, %s1685_s24  ;;  %vm906_vm1 = vcmask 261120   ;;  %s2740_s30 = sld [smem:[#allocation8_spill]] }
 0x123   : > { %1854 = vmatpush3.bf16.msra.mxu0 %v2001_v34  ;;  %1869 = vmatprep.mubr.msk.bf16.mxu0 %vm2170_vm0, %v2169_v35  ;;  %v2007_v41 = vld [vmem:[%s2696_s1 + $0x30] sm:$0xff]   ;;  %v2008_v42 = vld [vmem:[%s2696_s1 + $0x38] sm:$0xff]   ;;  %v2434_v43 = vld [vmem:[%s751_s20] sm:$0xff]  ;;  %s1742_s16 = sshll.u32 %s2155_s17, 2  ;;  %s1542_s28 = sshll.u32 %s2341_s14, 4  ;;  %s2629_s28 = int_to_ptr.vmem [resolvable:$true] %s1542_s28 }
 0x124   : > { %1855 = vmatprep.subr.bf16.mxu0 %v2169_v35  ;;  %1885 = vmatprep.mubr.msk.bf16.mxu1 %vm2170_vm0, %v2169_v35  ;;  %v2436_v44 = vld [vmem:[%s751_s20 + $0x8] sm:$0xff]  ;;  %v2009_v15 = vld [vmem:[%s2699_s4] sm:$0xff]   ;;  %v2011_v18 = vld [vmem:[%s2699_s4 + $0x10] sm:$0xff]   ;;  %s1539_s23 = sadd.s32 %s1742_s16, %s2326_s29  ;;  %s2742_s25 = sld [smem:[#allocation20_spill]] }
 0x125   : > { %v754_v45 = vpack.c.bf16 %v2436_v44, %v2434_v43  ;;  %v864_v47 = vld [vmem:[#allocation2 + $0x8] sm:$0xff]  ;;  %v2012_v19 = vld [vmem:[%s2699_s4 + $0x18] sm:$0xff]   ;;  %v2013_v20 = vld [vmem:[%s2699_s4 + $0x20] sm:$0xff]   ;;  %s1743_s27 = sshll.u32 %s1539_s23, 7  ;;  %s2073_s11 = scalar_lea.vmem %s2629_s28, 256 }
 0x126   : > { %v863_v46 = vld [vmem:[#allocation2] sm:$0xff]  ;;  %v931_v8 = vld [vmem:[#allocation3 + $0x8] sm:$0xff]  ;;  %v2010_v17 = vld [vmem:[%s2699_s4 + $0x8] sm:$0xff]   ;;  %p2074_p1 = scmp.ne.s32.totalorder %s2629_s28, %s2073_s11  ;;  %s2172_s29 = smov [#allocation4]  }
 0x127   : > { %1856 = vmatpush3.bf16.msra.mxu0 %v2002_v36  ;;  %v930_v7 = vld [vmem:[#allocation3] sm:$0xff]  ;;  %v2014_v21 = vld [vmem:[%s2699_s4 + $0x28] sm:$0xff]   ;;  %v2016_v23 = vld [vmem:[%s2699_s4 + $0x38] sm:$0xff]  }
 0x128   : > { %1857 = vmatprep.subr.bf16.mxu0 %v2169_v35  ;;  %1882 = vmatpush3.bf16.msra.mxu1 %v930_v7  ;;  %v2015_v22 = vld [vmem:[%s2699_s4 + $0x30] sm:$0xff]   ;;  %v2017_v29 = vld [vmem:[%s2700_s5] ss:$8 sps:$4 sm:$0xff]   ;;  %v2019_v30 = vld [vmem:[%s2700_s5 + $0x4] ss:$8 sps:$4 sm:$0xff]   ;;  %s2743_s15 = sand.u32 1, %s2740_s30   ;;  %p2075_p2 = pnand %p2074_p1, %p2301_p3 }
 0x129   : > { %1883 = vmatprep.subr.bf16.mxu1 %v2169_v35  ;;  %s2633_s24 = scalar_lea.sflag [#allocation5], %s2743_s15 }
 0x12a   : > { %s2627_s19 = scalar_lea.hbm %s2742_s25, %s1743_s27  ;;  %p2076_p4 = pneg %p2075_p2 }
 0x12b   : > { %1858 = vmatpush3.bf16.msra.mxu0 %v2003_v37 }
 0x12c   : > { %1859 = vmatprep.subr.bf16.mxu0 %v2169_v35  ;;  %1884 = vmatpush3.bf16.msra.mxu1 %v931_v8 }
 0x12d   : > { %1889 = vmatprep.subr.bf16.mxu1 %v2169_v35 }
 0x12f   : > { %1860 = vmatpush3.bf16.msra.mxu0 %v2004_v38 }
 0x130   : > { %1861 = vmatprep.subr.bf16.mxu0 %v2169_v35 }
 0x133   : > { %1862 = vmatpush3.bf16.msra.mxu0 %v2005_v39  ;;  %v2022_v39 = vld [vmem:[%s2700_s5 + $0x14] ss:$8 sps:$4 sm:$0xff]  }
 0x134   : > { %1863 = vmatprep.subr.bf16.mxu0 %v2169_v35 }
 0x137   : > { %1864 = vmatpush3.bf16.msra.mxu0 %v2006_v40  ;;  %v2020_v40 = vld [vmem:[%s2700_s5 + $0x10] ss:$8 sps:$4 sm:$0xff]  }
 0x138   : > { %1865 = vmatprep.subr.bf16.mxu0 %v2169_v35 }
 0x13b   : > { %1866 = vmatpush3.bf16.msra.mxu0 %v2007_v41  ;;  %v2025_v41 = vld [vmem:[%s2700_s5 + $0x24] ss:$8 sps:$4 sm:$0xff]  }
 0x13c   : > { %1867 = vmatprep.subr.bf16.mxu0 %v2169_v35 }
 0x13f   : > { %1868 = vmatpush3.bf16.msra.mxu0 %v2008_v42  ;;  %v2023_v42 = vld [vmem:[%s2700_s5 + $0x20] ss:$8 sps:$4 sm:$0xff]  }
 0x140   : > { %1873 = vmatprep.subr.bf16.mxu0 %v2169_v35 }
 0x142   : > { %1870 = vmatmul.mubr.bf16.vlgmr.msra.gmra.mrb[0].mxu0 %v754_v45  ;;  %v2029_v45 = vld [vmem:[%s2700_s5 + $0x40] ss:$8 sps:$4 sm:$0xff]  }
 0x143   : > { %1877 = vmatprep.mubr.msk.bf16.mxu0 %vm2170_vm0, %v2169_v35 }
 0x148   : > { %1874 = vmatpush3.bf16.xpose.msra.mxu0 %v863_v46  ;;  %v2031_v46 = vld [vmem:[%s2700_s5 + $0x44] ss:$8 sps:$4 sm:$0xff]  }
 0x149   : > { %1875 = vmatprep.subr.bf16.mxu0 %v2169_v35 }
 0x150   : > { %1876 = vmatpush3.bf16.xpose.msra.mxu0 %v864_v47  ;;  %v2034_v47 = vld [vmem:[%s2700_s5 + $0x54] ss:$8 sps:$4 sm:$0xff]  }
 0x151   : > { %1238 = vmatprep.subr.bf16.mxu0 %v2019_v30  ;;  %v2054_v30 = vld [vmem:[%s2702_s7 + $0x30] sm:$0xff]  }
 0x215   : > { %v853_v48 = vpop.f32.mrb[0].mxu0 }
 0x216   : > { %v1871_v49 = vpop.f32.mrb[1].mxu0  ;;  %v860_v51 = vmul.f32 0.088388346, %v853_v48  ;;  %v2171_v48 = vmov 0  }
 0x217   : > { %v856_v50 = vpop.f32.mrb[2].mxu0  ;;  %v2032_v49 = vld [vmem:[%s2700_s5 + $0x50] ss:$8 sps:$4 sm:$0xff]  }
 0x218   : > { %v861_v52 = vmul.f32 0.088388346, %v856_v50  ;;  %v1872_v53 = vpop.f32.mrb[3].mxu0  ;;  %v2037_v50 = vld [vmem:[%s2700_s5 + $0x64] ss:$8 sps:$4 sm:$0xff]  }
 0x219   : > { %v2038_v53 = vld [vmem:[%s2700_s5 + $0x70] ss:$8 sps:$4 sm:$0xff]  }
 0x21a   : > { %v862_v54 = vpack.c.bf16 %v861_v52, %v860_v51  ;;  %v2035_v51 = vld [vmem:[%s2700_s5 + $0x60] ss:$8 sps:$4 sm:$0xff]   ;;  %v2040_v52 = vld [vmem:[%s2700_s5 + $0x74] ss:$8 sps:$4 sm:$0xff]  }
 0x21c   : > { %1878 = vmatmul.mubr.bf16.vlgmr.msra.gmra.mrb[4].mxu0 %v862_v54  ;;  %v2041_v54 = vld [vmem:[%s2702_s7 + $0x40] sm:$0xff]  }
 0x21d   : > { %1239 = vmatpush1.bf16.msra.mxu0 %v2017_v29  ;;  %1270 = vmatprep.mubr.bf16.mxu0 %v2171_v48  ;;  %v2053_v29 = vld [vmem:[%s2702_s7 + $0x70] sm:$0xff]  }
 0x21e   : > { %1240 = vmatprep.subr.bf16.mxu0 %v2022_v39 }
 0x221   : > { %1241 = vmatpush1.bf16.msra.mxu0 %v2020_v40 }
 0x222   : > { %1242 = vmatprep.subr.bf16.mxu0 %v2025_v41 }
 0x225   : > { %1243 = vmatpush1.bf16.msra.mxu0 %v2023_v42 }
 0x2ef   : > { %v899_v55 = vpop.f32.mrb[4].mxu0 }
 0x2f0   : > { %v1879_v56 = vpop.f32.mrb[5].mxu0  ;;  %v907_v57 = vsel %vm906_vm1, %v899_v55, -inf }
 0x2f1   : > { %908 = vmax.xlane.f32.xlu0 %v907_v57  ;;  %v902_v58 = vpop.f32.mrb[6].mxu0  ;;  %v2043_v56 = vld [vmem:[%s2702_s7 + $0x48] sm:$0xff]  }
 0x2f2   : > { %v1880_v59 = vpop.f32.mrb[7].mxu0  ;;  %v910_v60 = vsel %vm906_vm1, %v902_v58, -inf  ;;  %v2044_v57 = vld [vmem:[%s2702_s7 + $0x8] sm:$0xff]  }
 0x2f3   : > { %v2046_v59 = vld [vmem:[%s2702_s7 + $0x10] sm:$0xff]  }
 0x2f5   : > { %911 = vmax.xlane.f32.xlu0 %v910_v60  ;;  %v2047_v60 = vld [vmem:[%s2702_s7 + $0x58] sm:$0xff]  }
 0x37e   : > { %v909_v61 = vpop.xlane.xlu0 %908 }
 0x37f   : > { %v913_v62 = vsub.f32 %v899_v55, %v909_v61  ;;  %v2042_v55 = vld [vmem:[%s2702_s7] sm:$0xff]   ;;  %v2048_v61 = vld [vmem:[%s2702_s7 + $0x18] sm:$0xff]  }
 0x381   : > { %v915_v63 = vmul.f32 1.442695, %v913_v62  ;;  %v2049_v62 = vld [vmem:[%s2702_s7 + $0x60] sm:$0xff]  }
 0x382   : > { %v912_v0 = vpop.xlane.xlu0 %911 }
 0x383   : > { %2057 = vpow2.f32 %v915_v63  ;;  %v914_v1 = vsub.f32 %v902_v58, %v912_v0  ;;  %v2045_v58 = vld [vmem:[%s2702_s7 + $0x50] sm:$0xff]   ;;  %v2050_v63 = vld [vmem:[%s2702_s7 + $0x20] sm:$0xff]   ;;  %v2051_v0 = vld [vmem:[%s2702_s7 + $0x68] sm:$0xff]  }
 0x385   : > { %v917_v2 = vmul.f32 1.442695, %v914_v1 }
 0x387   : > { %2059 = vpow2.f32 %v917_v2 }
 0x38d   : > { %v2058_v3 = vpop.eup %2057 }
 0x38e   : > { %v919_v4 = vsel %vm906_vm1, %v2058_v3, 0.0 }
 0x38f   : > { %920 = vadd.xlane.f32.xlu1 %v919_v4 }
 0x391   : > { %v2060_v5 = vpop.eup %2059 }
 0x392   : > { %v922_v6 = vsel %vm906_vm1, %v2060_v5, 0.0 }
 0x393   : > { %923 = vadd.xlane.f32.xlu1 %v922_v6 }
 0x41c   : > { %v921_v9 = vpop.xlane.xlu1 %920 }
 0x41d   : > { %2061 = vrcp.f32 %v921_v9 }
 0x420   : > { %v924_v10 = vpop.xlane.xlu1 %923 }
 0x421   : > { %2063 = vrcp.f32 %v924_v10 }
 0x427   : > { %v2062_v11 = vpop.eup %2061 }
 0x428   : > { %v927_v12 = vmul.f32 %v2062_v11, %v2058_v3 }
 0x42a   : > { %1511 = vst.msk [vmem:[%s2341_s14] sm:$0xff] %vm906_vm1, %v927_v12 }
 0x42b   : > { %v2064_v13 = vpop.eup %2063 }
 0x42c   : > { %v928_v14 = vmul.f32 %v2064_v13, %v2060_v5 }
 0x42e   : > { %v929_v16 = vpack.c.bf16 %v928_v14, %v927_v12  ;;  %1512 = vst.msk [vmem:[%s2341_s14 + $0x8] sm:$0xff] %vm906_vm1, %v928_v14  ;;  %s2077_s14 = sshll.u32 %s2172_s29, 4  ;;  %s2078_s14 = int_to_ptr.vmem [resolvable:$false] %s2077_s14 }
 0x42f   : > { %s2079_s17 = scalar_lea.vmem %s2078_s14, 512  ;;  %p2080_p5 = scmp.lt.s32.totalorder %s2629_s28, %s2078_s14 }
 0x430   : > { %1886 = vmatmul.mubr.msk.bf16.vlgmr.msra.gmra.mrb[0].mxu1 %vm906_vm1, %v929_v16  ;;  %p2081_p6 = scmp.lt.s32.totalorder %s2079_s17, %s2073_s11 }
 0x431   : > { %1890 = vmatpush3.bf16.msra.mxu1 %v2009_v15  ;;  %1905 = vmatprep.mubr.msk.bf16.mxu1 %vm2170_vm0, %v2169_v35 }
 0x432   : > { %1891 = vmatprep.subr.bf16.mxu1 %v2169_v35  ;;  %p2082_p7 = por %p2081_p6, %p2080_p5 }
 0x434   : > { %p2083_p9 = pnand %p2082_p7, %p2076_p4 }
 0x435   : > { %1892 = vmatpush3.bf16.msra.mxu1 %v2010_v17  ;;  %v1703_v17 = vld [vmem:[%s2704_s9] ss:$0 sm:$0xff] }
 0x436   : > { %1893 = vmatprep.subr.bf16.mxu1 %v2169_v35 }
 0x439   : > { %1894 = vmatpush3.bf16.msra.mxu1 %v2011_v18 }
 0x43a   : > { %1895 = vmatprep.subr.bf16.mxu1 %v2169_v35 }
 0x43d   : > { %1896 = vmatpush3.bf16.msra.mxu1 %v2012_v19 }
 0x43e   : > { %1897 = vmatprep.subr.bf16.mxu1 %v2169_v35 }
 0x441   : > { %1898 = vmatpush3.bf16.msra.mxu1 %v2013_v20 }
 0x442   : > { %1899 = vmatprep.subr.bf16.mxu1 %v2169_v35 }
 0x445   : > { %1900 = vmatpush3.bf16.msra.mxu1 %v2014_v21 }
 0x446   : > { %1901 = vmatprep.subr.bf16.mxu1 %v2169_v35 }
 0x449   : > { %1902 = vmatpush3.bf16.msra.mxu1 %v2015_v22 }
 0x44a   : > { %1903 = vmatprep.subr.bf16.mxu1 %v2169_v35 }
 0x44d   : > { %1904 = vmatpush3.bf16.msra.mxu1 %v2016_v23  ;;  %v1704_v23 = vld [vmem:[%s2705_s10] ss:$0 sm:$0xff] }
 0x44e   : > { %1791 = vmatprep.subr.bf16.mxu1 %v2041_v54 }
 0x503   : > { %v969_v24 = vpop.f32.mrb[0].mxu1 }
 0x504   : > { %v1887_v25 = vpop.f32.mrb[1].mxu1 }
 0x505   : > { %v972_v26 = vpop.f32.mrb[2].mxu1 }
 0x506   : > { %v976_v27 = vpack.c.bf16 %v972_v26, %v969_v24  ;;  %v1888_v28 = vpop.f32.mrb[3].mxu1 }
 0x507   : > { %v2052_v28 = vld [vmem:[%s2702_s7 + $0x28] sm:$0xff]  }
 0x508   : > { %1906 = vmatmul.mubr.bf16.vlgmr.msra.gmra.mrb[4].mxu1 %v976_v27 }
 0x509   : > { %1792 = vmatpush3.bf16.msra.mxu1 %v2042_v55  ;;  %v1721_v55 = vld [vmem:[%s2703_s8] ss:$0 sm:$0xff] }
 0x50a   : > { %1793 = vmatprep.subr.bf16.mxu1 %v2043_v56 }
 0x50d   : > { %1794 = vmatpush3.bf16.msra.mxu1 %v2044_v57 }
 0x50e   : > { %1795 = vmatprep.subr.bf16.mxu1 %v2045_v58 }
 0x511   : > { %1796 = vmatpush3.bf16.msra.mxu1 %v2046_v59 }
 0x512   : > { %1797 = vmatprep.subr.bf16.mxu1 %v2047_v60 }
 0x515   : > { %1798 = vmatpush3.bf16.msra.mxu1 %v2048_v61 }
 0x516   : > { %1799 = vmatprep.subr.bf16.mxu1 %v2049_v62 }
 0x519   : > { %1800 = vmatpush3.bf16.msra.mxu1 %v2050_v63 }
 0x51a   : > { %1801 = vmatprep.subr.bf16.mxu1 %v2051_v0 }
 0x51d   : > { %1802 = vmatpush3.bf16.msra.mxu1 %v2052_v28 }
 0x51e   : > { %1803 = vmatprep.subr.bf16.mxu1 %v2053_v29 }
 0x521   : > { %1804 = vmatpush3.bf16.msra.mxu1 %v2054_v30 }
 0x5db   : > { %v1075_v31 = vpop.f32.mrb[4].mxu1 }
 0x5dc   : > { %v2496_v32 = vadd.f32 %v1075_v31, %v2434_v43  ;;  %v1907_v33 = vpop.f32.mrb[5].mxu1  ;;  %v2028_v43 = vld [vmem:[%s2700_s5 + $0x34] ss:$8 sps:$4 sm:$0xff]  }
 0x5dd   : > { %v1078_v34 = vpop.f32.mrb[6].mxu1  ;;  %1244 = vmatprep.subr.bf16.mxu0 %v2028_v43  ;;  %v2055_v31 = vld [vmem:[%s2702_s7 + $0x78] sm:$0xff]   ;;  %v1148_v33 = vlaneseq }
 0x5de   : > { %v2499_v35 = vadd.f32 %v1078_v34, %v2436_v44  ;;  %1084 = vadd.xlane.f32.xlu0 %v2496_v32  ;;  %v1908_v36 = vpop.f32.mrb[7].mxu1  ;;  %v1091_v37 = vmul.f32 %v2496_v32, %v2496_v32  ;;  %v2026_v44 = vld [vmem:[%s2700_s5 + $0x30] ss:$8 sps:$4 sm:$0xff]   ;;  %1805 = vmatprep.subr.bf16.mxu1 %v2055_v31 }
 0x5df   : > { %1245 = vmatpush1.bf16.msra.mxu0 %v2026_v44  ;;  %v1149_v34 = vshrl.u32 %v1148_v33, 7  ;;  %v1146_v36 = vld [vmem:[%s2701_s6] sm:$0x3] }
 0x5e0   : > { %1086 = vadd.xlane.f32.xlu1 %v2499_v35  ;;  %v1092_v38 = vmul.f32 %v2499_v35, %v2499_v35  ;;  %1246 = vmatprep.subr.bf16.mxu0 %v2031_v46 }
 0x5e2   : > { %1093 = vadd.xlane.f32.xlu0 %v1091_v37  ;;  %v1154_v37 = vsub.s32 1, %v1149_v34 }
 0x5e3   : > { %1247 = vmatpush1.bf16.msra.mxu0 %v2029_v45 }
 0x5e4   : > { %1095 = vadd.xlane.f32.xlu1 %v1092_v38  ;;  %1248 = vmatprep.subr.bf16.mxu0 %v2034_v47  ;;  %v1155_v39 = vrot.slane %v1146_v36, %v1154_v37 }
 0x5e7   : > { %1249 = vmatpush1.bf16.msra.mxu0 %v2032_v49 }
 0x5e8   : > { %1250 = vmatprep.subr.bf16.mxu0 %v2037_v50 }
 0x5eb   : > { %1251 = vmatpush1.bf16.msra.mxu0 %v2035_v51 }
 0x5ec   : > { %1252 = vmatprep.subr.bf16.mxu0 %v2040_v52 }
 0x5ef   : > { %1253 = vmatpush1.bf16.msra.mxu0 %v2038_v53 }
 0x66b   : > { %v1085_v1 = vpop.xlane.xlu0 %1084 }
 0x66c   : > { %v1089_v2 = vmul.f32 0.0078125, %v1085_v1 }
 0x66d   : > { %v1087_v3 = vpop.xlane.xlu1 %1086 }
 0x66e   : > { %v1090_v4 = vmul.f32 0.0078125, %v1087_v3  ;;  %v1099_v6 = vmul.f32 %v1089_v2, %v1089_v2  ;;  %v1103_v15 = vsub.f32 %v2496_v32, %v1089_v2  ;;  %v2056_v32 = vld [vmem:[%s2702_s7 + $0x38] sm:$0xff]  }
 0x66f   : > { %v1094_v5 = vpop.xlane.xlu0 %1093  ;;  %1806 = vmatpush3.bf16.msra.mxu1 %v2056_v32 }
 0x670   : > { %v1097_v7 = vmul.f32 0.0078125, %v1094_v5  ;;  %v1100_v9 = vmul.f32 %v1090_v4, %v1090_v4  ;;  %v1104_v18 = vsub.f32 %v2499_v35, %v1090_v4  ;;  %v1150_v35 = vsub.s32 0, %v1149_v34 }
 0x671   : > { %v1096_v8 = vpop.xlane.xlu1 %1095 }
 0x672   : > { %v1101_v10 = vsub.f32 %v1097_v7, %v1099_v6  ;;  %v1098_v11 = vmul.f32 0.0078125, %v1096_v8  ;;  %v1151_v38 = vrot.slane %v1146_v36, %v1150_v35 }
 0x674   : > { %v1105_v12 = vadd.f32 1e-05, %v1101_v10  ;;  %v1102_v13 = vsub.f32 %v1098_v11, %v1100_v9 }
 0x676   : > { %2065 = vrsqrt.f32 %v1105_v12  ;;  %v1106_v14 = vadd.f32 1e-05, %v1102_v13 }
 0x678   : > { %2067 = vrsqrt.f32 %v1106_v14 }
 0x680   : > { %v2066_v16 = vpop.eup %2065 }
 0x681   : > { %v1109_v19 = vmul.f32 %v2066_v16, %v1103_v15 }
 0x682   : > { %v2068_v20 = vpop.eup %2067 }
 0x683   : > { %v1110_v21 = vmul.f32 %v2068_v20, %v1104_v18  ;;  %v1118_v22 = vmul.f32 %v1703_v17, %v1109_v19 }
 0x685   : > { %v1119_v24 = vmul.f32 %v1703_v17, %v1110_v21  ;;  %v1127_v25 = vadd.f32 %v1704_v23, %v1118_v22 }
 0x687   : > { %v1128_v26 = vadd.f32 %v1704_v23, %v1119_v24 }
 0x689   : > { %v1129_v27 = vpack.c.bf16 %v1128_v26, %v1127_v25 }
 0x68b   : > { %1271 = vmatmul.mubr.bf16.vlgmr.msra.gmra.mrb[8].mxu0 %v1129_v27 }
 0x75e   : > { %v1272_v40 = vpop.f32.mrb[8].mxu0 }
 0x75f   : > { %v1273_v41 = vadd.f32 %v1272_v40, %v1151_v38  ;;  %v1274_v42 = vpop.f32.mrb[9].mxu0 }
 0x760   : > { %v1275_v43 = vadd.f32 %v1274_v42, %v1155_v39  ;;  %v1276_v44 = vpop.f32.mrb[10].mxu0 }
 0x761   : > { %v1277_v45 = vadd.f32 %v1276_v44, %v1151_v38  ;;  %v1278_v46 = vpop.f32.mrb[11].mxu0  ;;  %v1281_v48 = vmax.f32 %v1273_v41, 0.0 }
 0x762   : > { %v1279_v47 = vadd.f32 %v1278_v46, %v1155_v39  ;;  %v1282_v50 = vmax.f32 %v1275_v43, 0.0 }
 0x763   : > { %v1283_v49 = vmax.f32 %v1277_v45, 0.0 }
 0x764   : > { %v1284_v51 = vmax.f32 %v1279_v47, 0.0 }
 0x765   : > { %v1285_v52 = vpack.c.bf16 %v1283_v49, %v1281_v48 }
 0x766   : > { %v1286_v53 = vpack.c.bf16 %v1284_v51, %v1282_v50 }
 0x768   : > { %1454 = vmatprep.mubr.bf16.mxu1 %v1286_v53 }
 0x769   : > { %1455 = vmatmul.mubr.bf16.vlgmr.msra.gmra.mrb[8].mxu1 %v1285_v52 }
 0x83c   : > { %v1807_v54 = vpop.f32.mrb[8].mxu1 }
 0x83d   : > { %v1808_v56 = vpop.f32.mrb[9].mxu1 }
 0x83e   : > { %v1809_v57 = vadd.f32 %v1808_v56, %v1807_v54  ;;  %v1810_v58 = vpop.f32.mrb[10].mxu1 }
 0x83f   : > { %v1811_v59 = vpop.f32.mrb[11].mxu1 }
 0x840   : > { %v1457_v60 = vadd.f32 %v1809_v57, %v1721_v55  ;;  %v1812_v61 = vadd.f32 %v1811_v59, %v1810_v58 }
 0x842   : > { %v1460_v62 = vadd.f32 %v1812_v61, %v1721_v55  ;;  %v2611_v63 = vadd.f32 %v1457_v60, %v1127_v25 }
 0x844   : > { %1465 = vadd.xlane.f32.xlu0 %v2611_v63  ;;  %v2614_v0 = vadd.f32 %v1460_v62, %v1128_v26  ;;  %v1471_v1 = vmul.f32 %v2611_v63, %v2611_v63 }
 0x846   : > { %1467 = vadd.xlane.f32.xlu1 %v2614_v0  ;;  %v1472_v2 = vmul.f32 %v2614_v0, %v2614_v0 }
 0x848   : > { %1473 = vadd.xlane.f32.xlu0 %v1471_v1 }
 0x84a   : > { %1475 = vadd.xlane.f32.xlu1 %v1472_v2 }
 0x84b   : > { %2086 = shalt.err (!%p2083_p9)
}
 0x84c   : > { %s2087_s18 = scalar_lea.hbm %s2627_s19, 256  ;;  %s2091_s16 = scalar_lea.hbm %s2742_s25, 1024 }
 0x84d   : > { %p2088_p10 = scmp.ne.s32.totalorder %s2627_s19, %s2087_s18  ;;  %p2092_p13 = scmp.lt.u32.totalorder %s2627_s19, %s2742_s25 }
 0x84e   : > { %p2093_p0 = scmp.lt.u32.totalorder %s2091_s16, %s2087_s18  ;;  %p2095_p2 = scmp.lt.u32.totalorder %s2087_s18, %s2627_s19 }
 0x84f   : > { %p2089_p11 = pnand %p2088_p10, %p2301_p3 }
 0x850   : > { %p2094_p1 = por %p2093_p0, %p2092_p13 }
 0x851   : > { %p2090_p12 = pneg %p2089_p11 }
 0x852   : > { %p2096_p4 = por %p2095_p2, %p2094_p1 }
 0x854   : > { %p2097_p5 = pnand %p2096_p4, %p2090_p12 }
 0x856   : > { %2100 = shalt.err (!%p2097_p5)
}
 0x857   : > { %s2173_s12 = smov 128   ;;  %s2174_s21 = smov 8  }
 0x858   : > { %1909 = dma.vmem_to_hbm [thread:$0]  (%p2301_p3), %s2629_s28, 256, %s2627_s19, %s2633_s24, %s2173_s12, %s2173_s12, %s2174_s21  }
 0x859   : > { %s2744_s19 = sld [smem:[#allocation18_spill]]  ;;  %s2745_s11 = sld [smem:[#allocation19_spill]] }
 0x85f   : > { %v1738_v19 = vld [vmem:[%s2744_s19] ss:$0 sm:$0xff] }
 0x860   : > { %v1739_v23 = vld [vmem:[%s2745_s11] ss:$0 sm:$0xff] }
 0x8d1   : > { %v1466_v3 = vpop.xlane.xlu0 %1465 }
 0x8d2   : > { %v1469_v4 = vmul.f32 0.0078125, %v1466_v3 }
 0x8d3   : > { %v1468_v5 = vpop.xlane.xlu1 %1467 }
 0x8d4   : > { %v1470_v6 = vmul.f32 0.0078125, %v1468_v5  ;;  %v1479_v8 = vmul.f32 %v1469_v4, %v1469_v4  ;;  %v1483_v17 = vsub.f32 %v2611_v63, %v1469_v4 }
 0x8d5   : > { %v1474_v7 = vpop.xlane.xlu0 %1473 }
 0x8d6   : > { %v1477_v9 = vmul.f32 0.0078125, %v1474_v7  ;;  %v1480_v11 = vmul.f32 %v1470_v6, %v1470_v6  ;;  %v1484_v20 = vsub.f32 %v2614_v0, %v1470_v6 }
 0x8d7   : > { %v1476_v10 = vpop.xlane.xlu1 %1475 }
 0x8d8   : > { %v1481_v12 = vsub.f32 %v1477_v9, %v1479_v8  ;;  %v1478_v13 = vmul.f32 0.0078125, %v1476_v10 }
 0x8da   : > { %v1485_v14 = vadd.f32 1e-05, %v1481_v12  ;;  %v1482_v15 = vsub.f32 %v1478_v13, %v1480_v11 }
 0x8dc   : > { %2069 = vrsqrt.f32 %v1485_v14  ;;  %v1486_v16 = vadd.f32 1e-05, %v1482_v15 }
 0x8de   : > { %2071 = vrsqrt.f32 %v1486_v16 }
 0x8e6   : > { %v2070_v18 = vpop.eup %2069 }
 0x8e7   : > { %v1489_v21 = vmul.f32 %v2070_v18, %v1483_v17 }
 0x8e8   : > { %v2072_v22 = vpop.eup %2071 }
 0x8e9   : > { %v1498_v24 = vmul.f32 %v1738_v19, %v1489_v21  ;;  %v1490_v25 = vmul.f32 %v2072_v22, %v1484_v20 }
 0x8eb   : > { %v1507_v26 = vadd.f32 %v1739_v23, %v1498_v24  ;;  %v1499_v27 = vmul.f32 %v1738_v19, %v1490_v25 }
 0x8ed   : > { %1509 = vst [vmem:[%s2339_s22] sm:$0xff] %v1507_v26  ;;  %v1508_v28 = vadd.f32 %v1739_v23, %v1499_v27 }
 0x8ef   : > { %1510 = vst [vmem:[%s2339_s22 + $0x8] sm:$0xff] %v1508_v28 }
 0x8f0 PF: > { %s2746_s29 = sld [smem:[#allocation12_spill]]  ;;  %s2747_s14 = sld [smem:[#allocation7_spill]] }
 0x8f6   : > { %p1915_p3 = scmp.ge.s32.totalorder %s2746_s29, 2  ;;  %s1569_s18 = sand.u32 1, %s2747_s14  }
 0x8f7   : > { %s1570_s20 = scalar_lea.sflag [#allocation5], %s1569_s18 }
 0x8f8   : > { %p1912_p6 = pnand %p1915_p3, %p2310_p8 }
 0x8fa   : > { %2134 = dma.done.wait (!%p1912_p6), %s1570_s20, 256  }
 0x8fb   : > { %2136 = vsyncadd (!%p1912_p6), %s1570_s20, 4294967040  ;;  %s28_s20 = sadd.s32 1, %s2746_s29   ;;  %s2749_s29 = sld [smem:[#allocation8_spill]] }
 0x8fc   : > { %p25_p7 = scmp.ge.s32.totalorder %s28_s20, 6   ;;  %s2750_s30 = sld [smem:[#allocation9_spill]] }
 0x8fd   : > { %s2751_s15 = sld [smem:[#allocation17_spill]]  ;;  %s2752_s16 = sld [smem:[#allocation10_spill]] }
 0x8fe   : > { %s2753_s17 = sld [smem:[#allocation11_spill]]  ;;  %s2754_s18 = sld [smem:[#allocation13_spill]] }
 0x8ff   : > { %s2755_s19 = sld [smem:[#allocation15_spill]]  ;;  %27 = sbr.rel (!%p25_p7) target bundleno = 9 (0x9), region = 124 }
 0x906   :  { %1575 = vsyncpa [#allocation5], 1 }
 0x907   :  { %1577 = vsyncpa [#allocation5 + $0x1], 1 }

// kernel: encoder_stack_forward.4
= control target key start
LH: loop header
LB: loop body
LE: loop exit
PB: predicated region body
PF: predicated region fallthrough
CT: control target
= control target key end

     0   :  { %s2608_s0 = inlined_call_operand.vmem [shape: f32[2,16,128], index: 0, kind: input, shape index: {}]   ;;  %s2609_s1 = inlined_call_operand.vmem [shape: bf16[128,128], index: 1, kind: input, shape index: {}]   ;;  %s2610_s2 = inlined_call_operand.vmem [shape: bf16[128,128], index: 2, kind: input, shape index: {}]   ;;  %s2611_s3 = inlined_call_operand.vmem [shape: bf16[128,128], index: 3, kind: input, shape index: {}]   ;;  %s2612_s4 = inlined_call_operand.vmem [shape: bf16[128,128], index: 4, kind: input, shape index: {}]   ;;  %s2613_s5 = inlined_call_operand.vmem [shape: bf16[128,256], index: 5, kind: input, shape index: {}]   ;;  %s2614_s6 = inlined_call_operand.vmem [shape: f32[1,256], index: 6, kind: input, shape index: {}]   ;;  %s2615_s7 = inlined_call_operand.vmem [shape: bf16[256,128], index: 7, kind: input, shape index: {}]   ;;  %s2616_s8 = inlined_call_operand.vmem [shape: f32[1,128], index: 8, kind: input, shape index: {}]   ;;  %s2617_s9 = inlined_call_operand.vmem [shape: f32[1,128], index: 9, kind: input, shape index: {}]   ;;  %s2618_s10 = inlined_call_operand.vmem [shape: f32[1,128], index: 10, kind: input, shape index: {}]   ;;  %s2619_s11 = inlined_call_operand.vmem [shape: f32[1,128], index: 11, kind: input, shape index: {}]   ;;  %s2620_s12 = inlined_call_operand.vmem [shape: f32[1,128], index: 12, kind: input, shape index: {}]   ;;  %s2621_s13 = inlined_call_operand.vmem [shape: f32[2,16,128], index: 13, kind: output, shape index: {0}]   ;;  %s2622_s14 = inlined_call_operand.hbm [shape: f32[2,16,16], index: 14, kind: output, shape index: {1}]  }
   0x1   :  { %2629 = sst [smem:[#allocation12_spill]] %s2608_s0 }
   0x2   :  { %20 = vsyncpa [#allocation5], 0 }
   0x3   :  { %22 = vsyncpa [#allocation5 + $0x1], 0  ;;  %s2180_s29 = smov 0   ;;  %s2182_s30 = smov 0  }
   0x4   :  { %s2184_s15 = smov 0   ;;  %s2186_s16 = smov 0  }
   0x5   :  { %s2188_s17 = smov 0   ;;  %s2190_s18 = smov 0  }
   0x6 LB: > { %2630 = sst [smem:[#allocation7_spill]] %s2085_s15  ;;  %s1629_s19 = sadd.s32 4294967295, %s2097_s18   ;;  %s2097_s18 = sphi %s2190_s18, %s28_s18   ;;  %s2093_s17 = sphi %s2188_s17, %s2644_s17   ;;  %s2089_s16 = sphi %s2186_s16, %s2643_s16   ;;  %s2085_s15 = sphi %s2184_s15, %s2642_s15   ;;  %s2081_s30 = sphi %s2182_s30, %s2646_s30   ;;  %s2077_s29 = sphi %s2180_s29, %s2645_s29  }
   0x7   : > { %2631 = sst [smem:[#allocation8_spill]] %s2093_s17  ;;  %s1630_s20 = sadd.s32 4294967294, %s2097_s18  }
   0x8   : > { %s40_s21 = sadd.s32 1, %s2093_s17  ;;  %s355_s22 = sadd.s32 1, %s2085_s15 }
   0x9   : > { %p42_p0 = scmp.ge.s32.totalorder %s40_s21, 2  ;;  %p365_p1 = scmp.ne.s32.totalorder %s2085_s15, %s2081_s30 }
   0xa   : > { %p366_p2 = scmp.eq.s32.totalorder %s1629_s19, 1  ;;  %p371_p3 = scmp.ne.s32.totalorder %s2081_s30, %s2077_s29 }
   0xb   : > { %s2648_s21 = smov (%p42_p0, %s40_s21), 0  ;;  %p372_p5 = scmp.eq.s32.totalorder %s1630_s20, 1 }
   0xc   : > { %2632 = sst [smem:[#allocation9_spill]] %s2648_s21  ;;  %p2220_p4 = por %p366_p2, %p365_p1 }
   0xd   : > { %s350_s24 = ssub.s32 %s2093_s17, %s2648_s21  ;;  %p1633_p6 = scmp.ge.s32.totalorder %s2097_s18, 1 }
   0xe   : > { %p353_p7 = scmp.eq.s32.totalorder %s350_s24, 0  ;;  %p2227_p8 = por %p372_p5, %p371_p3 }
   0xf   : > { %p434_p9 = scmp.lt.s32.totalorder %s2097_s18, 3 }
  0x10   : > { %s2634_s25 = scalar_select %p2227_p8, 1, 0 }
  0x11   : > { %s2233_s26 = scalar_select %p353_p7, %s2085_s15, %s355_s22  }
  0x12   : > { %2635 = sst [smem:[#allocation10_spill]] %s2634_s25  ;;  %p435_p10 = pnand %p1633_p6, %p434_p9 }
  0x13   : > { %2636 = sst [smem:[#allocation11_spill]] %s2233_s26  ;;  %v1931_v0 = vld [vmem:[%s2610_s2] sm:$0xff] (!%p435_p10)   ;;  %v2099_v1 = vmov (!%p435_p10), 0.0   ;;  %v1932_v2 = vld [vmem:[%s2610_s2 + $0x8] sm:$0xff] (!%p435_p10)   ;;  %vm2100_vm0 = vmmov (!%p435_p10), 0   ;;  %v1933_v3 = vld [vmem:[%s2610_s2 + $0x10] sm:$0xff] (!%p435_p10)  }
  0x14   : > { %438 = sbr.rel (%p435_p10) target bundleno = 2050 (0x802), region = 72  ;;  %1779 = vmatprep.subr.bf16.mxu0 (!%p435_p10), %v2099_v1  ;;  %1799 = vmatprep.subr.bf16.mxu1 (!%p435_p10), %v2099_v1  ;;  %p489_p11 = scmp.lt.s32.totalorder (!%p435_p10), %s2089_s16, 1  ;;  %v1934_v4 = vld [vmem:[%s2610_s2 + $0x18] sm:$0xff] (!%p435_p10)   ;;  %v1935_v5 = vld [vmem:[%s2610_s2 + $0x20] sm:$0xff] (!%p435_p10)   ;;  %v1936_v6 = vld [vmem:[%s2610_s2 + $0x28] sm:$0xff] (!%p435_p10)   ;;  %vm882_vm1 = vcmask (!%p435_p10), 130048  }
  0x15   : > { %1780 = vmatpush3.bf16.msra.mxu0 (!%p435_p10), %v1931_v0  ;;  %1795 = vmatprep.mubr.msk.bf16.mxu0 (!%p435_p10), %vm2100_vm0, %v2099_v1  ;;  %v1937_v7 = vld [vmem:[%s2610_s2 + $0x30] sm:$0xff] (!%p435_p10)   ;;  %s2637_s0 = sld [smem:[#allocation12_spill]] (!%p435_p10)  ;;  %v1938_v8 = vld [vmem:[%s2610_s2 + $0x38] sm:$0xff] (!%p435_p10)   ;;  %v1939_v11 = vld [vmem:[%s2609_s1] sm:$0xff] (!%p435_p10)   ;;  %s2628_s27 = sand.u32 (!%p435_p10), 1, %s2081_s30  }
  0x16   : > { %1781 = vmatprep.subr.bf16.mxu0 (!%p435_p10), %v2099_v1  ;;  %1815 = vmatprep.mubr.msk.bf16.mxu1 (!%p435_p10), %vm2100_vm0, %v2099_v1  ;;  %v1940_v13 = vld [vmem:[%s2609_s1 + $0x8] sm:$0xff] (!%p435_p10)   ;;  %v1941_v14 = vld [vmem:[%s2609_s1 + $0x10] sm:$0xff] (!%p435_p10)   ;;  %v1942_v15 = vld [vmem:[%s2609_s1 + $0x18] sm:$0xff] (!%p435_p10)   ;;  %s1634_s28 = sshll.u32 (!%p435_p10), %s2628_s27, 4  ;;  %s2638_s24 = sand.u32 (!%p435_p10), 1, %s2081_s30  }
  0x17   : > { %v1943_v16 = vld [vmem:[%s2609_s1 + $0x20] sm:$0xff] (!%p435_p10)   ;;  %v1944_v17 = vld [vmem:[%s2609_s1 + $0x28] sm:$0xff] (!%p435_p10)   ;;  %v1945_v18 = vld [vmem:[%s2609_s1 + $0x30] sm:$0xff] (!%p435_p10)   ;;  %s2550_s15 = scalar_lea.sflag (!%p435_p10), [#allocation5], %s2638_s24 }
  0x18   : > { %v1946_v19 = vld [vmem:[%s2609_s1 + $0x38] sm:$0xff] (!%p435_p10)   ;;  %v1947_v32 = vld [vmem:[%s2611_s3] sm:$0xff] (!%p435_p10)   ;;  %v1948_v33 = vld [vmem:[%s2611_s3 + $0x8] sm:$0xff] (!%p435_p10)  }
  0x19   : > { %1782 = vmatpush3.bf16.msra.mxu0 (!%p435_p10), %v1932_v2  ;;  %1800 = vmatpush3.bf16.msra.mxu1 (!%p435_p10), %v1947_v32  ;;  %v1949_v34 = vld [vmem:[%s2611_s3 + $0x10] sm:$0xff] (!%p435_p10)   ;;  %v1950_v35 = vld [vmem:[%s2611_s3 + $0x18] sm:$0xff] (!%p435_p10)   ;;  %v1951_v36 = vld [vmem:[%s2611_s3 + $0x20] sm:$0xff] (!%p435_p10)  }
  0x1a   : > { %1783 = vmatprep.subr.bf16.mxu0 (!%p435_p10), %v2099_v1  ;;  %1801 = vmatprep.subr.bf16.mxu1 (!%p435_p10), %v2099_v1  ;;  %v1952_v37 = vld [vmem:[%s2611_s3 + $0x28] sm:$0xff] (!%p435_p10)   ;;  %v1953_v38 = vld [vmem:[%s2611_s3 + $0x30] sm:$0xff] (!%p435_p10)   ;;  %v1954_v39 = vld [vmem:[%s2611_s3 + $0x38] sm:$0xff] (!%p435_p10)  }
  0x1b   : > { %s2258_s19 = scalar_select %p489_p11, %s2089_s16, 1  ;;  %v1972_v32 = vld [vmem:[%s2613_s5 + $0x30] ss:$8 sps:$4 sm:$0xff]  }
  0x1d   : > { %1784 = vmatpush3.bf16.msra.mxu0 %v1933_v3  ;;  %s2627_s17 = sshll.u32 %s2258_s19, 4  ;;  %1802 = vmatpush3.bf16.msra.mxu1 %v1948_v33  ;;  %v1975_v33 = vld [vmem:[%s2613_s5 + $0x40] ss:$8 sps:$4 sm:$0xff]  }
  0x1e   : > { %1785 = vmatprep.subr.bf16.mxu0 %v2099_v1  ;;  %s493_s21 = scalar_lea.vmem %s2637_s0, %s2627_s17  ;;  %1803 = vmatprep.subr.bf16.mxu1 %v2099_v1  ;;  %s1716_s0 = sshll.u32 %s2089_s16, 8 }
  0x1f   : > { %v2281_v9 = vld [vmem:[%s493_s21] sm:$0xff]  ;;  %v2283_v10 = vld [vmem:[%s493_s21 + $0x8] sm:$0xff]  ;;  %s2372_s21 = scalar_lea.vmem [#allocation4], %s1634_s28  ;;  %s2544_s22 = scalar_lea.hbm %s2622_s14, %s1716_s0 }
  0x20   : > { %v2291_v12 = vpack.c.bf16 %v2283_v10, %v2281_v9  ;;  %s1517_s27 = sshll.u32 %s2372_s21, 4  ;;  %s2102_s16 = smov [#allocation4]   ;;  %s2546_s27 = int_to_ptr.vmem [resolvable:$true] %s1517_s27 }
  0x21   : > { %1786 = vmatpush3.bf16.msra.mxu0 %v1934_v4  ;;  %1804 = vmatpush3.bf16.msra.mxu1 %v1949_v34  ;;  %v1955_v4 = vld [vmem:[%s2612_s4] sm:$0xff]   ;;  %s2019_s25 = scalar_lea.vmem %s2546_s27, 256 }
  0x22   : > { %1787 = vmatprep.subr.bf16.mxu0 %v2099_v1  ;;  %1805 = vmatprep.subr.bf16.mxu1 %v2099_v1  ;;  %v1977_v34 = vld [vmem:[%s2613_s5 + $0x44] ss:$8 sps:$4 sm:$0xff]   ;;  %p2020_p12 = scmp.ne.s32.totalorder %s2546_s27, %s2019_s25 }
  0x24   : > { %p2021_p13 = pnand %p2020_p12, %p2220_p4 }
  0x25   : > { %1788 = vmatpush3.bf16.msra.mxu0 %v1935_v5  ;;  %1806 = vmatpush3.bf16.msra.mxu1 %v1950_v35  ;;  %v1980_v35 = vld [vmem:[%s2613_s5 + $0x54] ss:$8 sps:$4 sm:$0xff]  }
  0x26   : > { %1789 = vmatprep.subr.bf16.mxu0 %v2099_v1  ;;  %1807 = vmatprep.subr.bf16.mxu1 %v2099_v1  ;;  %p2022_p0 = pneg %p2021_p13 }
  0x29   : > { %1790 = vmatpush3.bf16.msra.mxu0 %v1936_v6  ;;  %1808 = vmatpush3.bf16.msra.mxu1 %v1951_v36  ;;  %v1956_v6 = vld [vmem:[%s2612_s4 + $0x8] sm:$0xff]   ;;  %v2101_v36 = vmov 0  }
  0x2a   : > { %1791 = vmatprep.subr.bf16.mxu0 %v2099_v1  ;;  %1809 = vmatprep.subr.bf16.mxu1 %v2099_v1 }
  0x2d   : > { %1792 = vmatpush3.bf16.msra.mxu0 %v1937_v7  ;;  %1810 = vmatpush3.bf16.msra.mxu1 %v1952_v37  ;;  %v1957_v7 = vld [vmem:[%s2612_s4 + $0x10] sm:$0xff]  }
  0x2e   : > { %1793 = vmatprep.subr.bf16.mxu0 %v2099_v1  ;;  %1811 = vmatprep.subr.bf16.mxu1 %v2099_v1  ;;  %v1978_v37 = vld [vmem:[%s2613_s5 + $0x50] ss:$8 sps:$4 sm:$0xff]  }
  0x31   : > { %1794 = vmatpush3.bf16.msra.mxu0 %v1938_v8  ;;  %1812 = vmatpush3.bf16.msra.mxu1 %v1953_v38  ;;  %v1958_v8 = vld [vmem:[%s2612_s4 + $0x18] sm:$0xff]   ;;  %v1983_v38 = vld [vmem:[%s2613_s5 + $0x64] ss:$8 sps:$4 sm:$0xff]  }
  0x32   : > { %1819 = vmatprep.subr.bf16.mxu0 %v2099_v1  ;;  %1813 = vmatprep.subr.bf16.mxu1 %v2099_v1 }
  0x34   : > { %1796 = vmatmul.mubr.bf16.vlgmr.msra.gmra.mrb[0].mxu0 %v2291_v12 }
  0x35   : > { %1820 = vmatpush3.bf16.msra.mxu0 %v1939_v11  ;;  %1835 = vmatprep.mubr.msk.bf16.mxu0 %vm2100_vm0, %v2099_v1  ;;  %v1959_v11 = vld [vmem:[%s2612_s4 + $0x20] sm:$0xff]  }
  0x36   : > { %1821 = vmatprep.subr.bf16.mxu0 %v2099_v1  ;;  %1814 = vmatpush3.bf16.msra.mxu1 %v1954_v39  ;;  %v1981_v39 = vld [vmem:[%s2613_s5 + $0x60] ss:$8 sps:$4 sm:$0xff]  }
  0x37   : > { %1845 = vmatprep.subr.bf16.mxu1 %v2099_v1 }
  0x39   : > { %1822 = vmatpush3.bf16.msra.mxu0 %v1940_v13  ;;  %1816 = vmatmul.mubr.bf16.vlgmr.msra.gmra.mrb[0].mxu1 %v2291_v12  ;;  %v1961_v13 = vld [vmem:[%s2612_s4 + $0x30] sm:$0xff]  }
  0x3a   : > { %1823 = vmatprep.subr.bf16.mxu0 %v2099_v1  ;;  %1847 = vmatprep.mubr.msk.bf16.mxu1 %vm2100_vm0, %v2099_v1 }
  0x3d   : > { %1824 = vmatpush3.bf16.msra.mxu0 %v1941_v14  ;;  %v1962_v14 = vld [vmem:[%s2612_s4 + $0x38] sm:$0xff]  }
  0x3e   : > { %1825 = vmatprep.subr.bf16.mxu0 %v2099_v1 }
  0x41   : > { %1826 = vmatpush3.bf16.msra.mxu0 %v1942_v15 }
  0x42   : > { %1827 = vmatprep.subr.bf16.mxu0 %v2099_v1 }
  0x45   : > { %1828 = vmatpush3.bf16.msra.mxu0 %v1943_v16 }
  0x46   : > { %1829 = vmatprep.subr.bf16.mxu0 %v2099_v1 }
  0x49   : > { %1830 = vmatpush3.bf16.msra.mxu0 %v1944_v17 }
  0x4a   : > { %1831 = vmatprep.subr.bf16.mxu0 %v2099_v1 }
  0x4d   : > { %1832 = vmatpush3.bf16.msra.mxu0 %v1945_v18 }
  0x4e   : > { %1833 = vmatprep.subr.bf16.mxu0 %v2099_v1 }
  0x51   : > { %1834 = vmatpush3.bf16.msra.mxu0 %v1946_v19 }
  0x52   : > { %1839 = vmatprep.subr.bf16.mxu0 %v2099_v1 }
  0x54   : > { %1836 = vmatmul.mubr.bf16.vlgmr.msra.gmra.mrb[4].mxu0 %v2291_v12  ;;  %v1960_v12 = vld [vmem:[%s2612_s4 + $0x28] sm:$0xff]  }
  0x55   : > { %1841 = vmatprep.mubr.msk.bf16.mxu0 %vm2100_vm0, %v2099_v1 }
 0x107   : > { %v611_v20 = vpop.f32.mrb[0].mxu0 }
 0x108   : > { %v1797_v21 = vpop.f32.mrb[1].mxu0 }
 0x109   : > { %v614_v22 = vpop.f32.mrb[2].mxu0  ;;  %v1965_v21 = vld [vmem:[%s2613_s5 + $0x4] ss:$8 sps:$4 sm:$0xff]  }
 0x10a   : > { %v618_v23 = vpack.c.bf16 %v614_v22, %v611_v20  ;;  %v1798_v24 = vpop.f32.mrb[3].mxu0  ;;  %v1963_v20 = vld [vmem:[%s2613_s5] ss:$8 sps:$4 sm:$0xff]  }
 0x10c   : > { %1840 = vmatpush3.bf16.xpose.msra.mxu0 %v618_v23  ;;  %v718_v56 = vpop.f32.mrb[0].mxu1 }
 0x10d   : > { %v1817_v57 = vpop.f32.mrb[1].mxu1  ;;  %1213 = vmatprep.subr.bf16.mxu0 %v1965_v21  ;;  %v2000_v21 = vld [vmem:[%s2615_s7 + $0x30] sm:$0xff]  }
 0x10e   : > { %v721_v58 = vpop.f32.mrb[2].mxu1 }
 0x10f   : > { %v1818_v59 = vpop.f32.mrb[3].mxu1  ;;  %v725_v60 = vpack.c.bf16 %v721_v58, %v718_v56 }
 0x111   : > { %1846 = vmatpush3.bf16.msra.mxu1 %v725_v60 }
 0x112   : > { %1851 = vmatprep.subr.bf16.mxu1 %v2099_v1 }
 0x127   : > { %v830_v25 = vpop.f32.mrb[4].mxu0 }
 0x128   : > { %v1837_v26 = vpop.f32.mrb[5].mxu0  ;;  %v837_v28 = vmul.f32 0.088388346, %v830_v25 }
 0x129   : > { %v833_v27 = vpop.f32.mrb[6].mxu0 }
 0x12a   : > { %v838_v29 = vmul.f32 0.088388346, %v833_v27  ;;  %v1838_v30 = vpop.f32.mrb[7].mxu0 }
 0x12b   : > { %v1969_v30 = vld [vmem:[%s2613_s5 + $0x20] ss:$8 sps:$4 sm:$0xff]  }
 0x12c   : > { %v839_v31 = vpack.c.bf16 %v838_v29, %v837_v28  ;;  %v1971_v29 = vld [vmem:[%s2613_s5 + $0x24] ss:$8 sps:$4 sm:$0xff]  }
 0x12e   : > { %1842 = vmatmul.mubr.bf16.vlgmr.msra.gmra.mrb[8].mxu0 %v839_v31  ;;  %v1974_v31 = vld [vmem:[%s2613_s5 + $0x34] ss:$8 sps:$4 sm:$0xff]  }
 0x12f   : > { %1214 = vmatpush1.bf16.msra.mxu0 %v1963_v20  ;;  %1245 = vmatprep.mubr.bf16.mxu0 %v2101_v36  ;;  %v1999_v20 = vld [vmem:[%s2615_s7 + $0x70] sm:$0xff]  }
 0x201   : > { %v875_v40 = vpop.f32.mrb[8].mxu0 }
 0x202   : > { %v1843_v41 = vpop.f32.mrb[9].mxu0  ;;  %v883_v42 = vsel %vm882_vm1, %v875_v40, -inf }
 0x203   : > { %884 = vmax.xlane.f32.xlu0 %v883_v42  ;;  %v878_v43 = vpop.f32.mrb[10].mxu0  ;;  %v1984_v41 = vld [vmem:[%s2613_s5 + $0x70] ss:$8 sps:$4 sm:$0xff]   ;;  %v1987_v42 = vld [vmem:[%s2615_s7 + $0x40] sm:$0xff]  }
 0x204   : > { %v1844_v44 = vpop.f32.mrb[11].mxu0  ;;  %v886_v45 = vsel %vm882_vm1, %v878_v43, -inf }
 0x205   : > { %v1989_v44 = vld [vmem:[%s2615_s7 + $0x48] sm:$0xff]  }
 0x207   : > { %887 = vmax.xlane.f32.xlu0 %v886_v45  ;;  %v1990_v45 = vld [vmem:[%s2615_s7 + $0x8] sm:$0xff]  }
 0x290   : > { %v885_v46 = vpop.xlane.xlu0 %884 }
 0x291   : > { %v889_v47 = vsub.f32 %v875_v40, %v885_v46  ;;  %v1986_v40 = vld [vmem:[%s2613_s5 + $0x74] ss:$8 sps:$4 sm:$0xff]  }
 0x292   : > { %v1991_v46 = vld [vmem:[%s2615_s7 + $0x50] sm:$0xff]  }
 0x293   : > { %v891_v48 = vmul.f32 1.442695, %v889_v47  ;;  %v1992_v47 = vld [vmem:[%s2615_s7 + $0x10] sm:$0xff]  }
 0x294   : > { %v888_v49 = vpop.xlane.xlu0 %887 }
 0x295   : > { %2003 = vpow2.f32 %v891_v48  ;;  %v890_v50 = vsub.f32 %v878_v43, %v888_v49  ;;  %v1988_v43 = vld [vmem:[%s2615_s7] sm:$0xff]   ;;  %v1993_v48 = vld [vmem:[%s2615_s7 + $0x58] sm:$0xff]  }
 0x296   : > { %v1994_v49 = vld [vmem:[%s2615_s7 + $0x18] sm:$0xff]  }
 0x297   : > { %v893_v51 = vmul.f32 1.442695, %v890_v50  ;;  %v1995_v50 = vld [vmem:[%s2615_s7 + $0x60] sm:$0xff]  }
 0x299   : > { %2005 = vpow2.f32 %v893_v51  ;;  %v1996_v51 = vld [vmem:[%s2615_s7 + $0x20] sm:$0xff]  }
 0x29f   : > { %v2004_v52 = vpop.eup %2003 }
 0x2a0   : > { %v895_v53 = vsel %vm882_vm1, %v2004_v52, 0.0 }
 0x2a1   : > { %896 = vadd.xlane.f32.xlu1 %v895_v53 }
 0x2a3   : > { %v2006_v54 = vpop.eup %2005 }
 0x2a4   : > { %v898_v55 = vsel %vm882_vm1, %v2006_v54, 0.0 }
 0x2a5   : > { %899 = vadd.xlane.f32.xlu1 %v898_v55 }
 0x32e   : > { %v897_v61 = vpop.xlane.xlu1 %896 }
 0x32f   : > { %2007 = vrcp.f32 %v897_v61 }
 0x332   : > { %v900_v62 = vpop.xlane.xlu1 %899 }
 0x333   : > { %2009 = vrcp.f32 %v900_v62 }
 0x339   : > { %v2008_v63 = vpop.eup %2007 }
 0x33a   : > { %v903_v0 = vmul.f32 %v2008_v63, %v2004_v52  ;;  %v1997_v52 = vld [vmem:[%s2615_s7 + $0x68] sm:$0xff]  }
 0x33c   : > { %1486 = vst.msk [vmem:[%s2372_s21] sm:$0xff] %vm882_vm1, %v903_v0 }
 0x33d   : > { %v2010_v2 = vpop.eup %2009 }
 0x33e   : > { %v904_v3 = vmul.f32 %v2010_v2, %v2006_v54 }
 0x340   : > { %v905_v5 = vpack.c.bf16 %v904_v3, %v903_v0  ;;  %1487 = vst.msk [vmem:[%s2372_s21 + $0x8] sm:$0xff] %vm882_vm1, %v904_v3  ;;  %s2023_s21 = sshll.u32 %s2102_s16, 4  ;;  %s2024_s21 = int_to_ptr.vmem [resolvable:$false] %s2023_s21 }
 0x341   : > { %s2025_s17 = scalar_lea.vmem %s2024_s21, 512  ;;  %p2026_p1 = scmp.lt.s32.totalorder %s2546_s27, %s2024_s21 }
 0x342   : > { %1848 = vmatmul.mubr.msk.bf16.vlgmr.msra.gmra.mrb[4].mxu1 %vm882_vm1, %v905_v5  ;;  %p2027_p2 = scmp.lt.s32.totalorder %s2025_s17, %s2019_s25 }
 0x343   : > { %1852 = vmatpush3.bf16.msra.mxu1 %v1955_v4  ;;  %1867 = vmatprep.mubr.msk.bf16.mxu1 %vm2100_vm0, %v2099_v1 }
 0x344   : > { %1853 = vmatprep.subr.bf16.mxu1 %v2099_v1  ;;  %p2028_p3 = por %p2027_p2, %p2026_p1 }
 0x346   : > { %p2029_p5 = pnand %p2028_p3, %p2022_p0 }
 0x347   : > { %1854 = vmatpush3.bf16.msra.mxu1 %v1956_v6  ;;  %v1672_v6 = vld [vmem:[%s2617_s9] ss:$0 sm:$0xff] }
 0x348   : > { %1855 = vmatprep.subr.bf16.mxu1 %v2099_v1 }
 0x34b   : > { %1856 = vmatpush3.bf16.msra.mxu1 %v1957_v7 }
 0x34c   : > { %1857 = vmatprep.subr.bf16.mxu1 %v2099_v1 }
 0x34f   : > { %1858 = vmatpush3.bf16.msra.mxu1 %v1958_v8 }
 0x350   : > { %1859 = vmatprep.subr.bf16.mxu1 %v2099_v1 }
 0x353   : > { %1860 = vmatpush3.bf16.msra.mxu1 %v1959_v11 }
 0x354   : > { %1861 = vmatprep.subr.bf16.mxu1 %v2099_v1 }
 0x357   : > { %1862 = vmatpush3.bf16.msra.mxu1 %v1960_v12 }
 0x358   : > { %1863 = vmatprep.subr.bf16.mxu1 %v2099_v1 }
 0x35b   : > { %1864 = vmatpush3.bf16.msra.mxu1 %v1961_v13 }
 0x35c   : > { %1865 = vmatprep.subr.bf16.mxu1 %v2099_v1 }
 0x35f   : > { %1866 = vmatpush3.bf16.msra.mxu1 %v1962_v14  ;;  %v1673_v14 = vld [vmem:[%s2618_s10] ss:$0 sm:$0xff] }
 0x360   : > { %1757 = vmatprep.subr.bf16.mxu1 %v1987_v42 }
 0x415   : > { %v944_v15 = vpop.f32.mrb[4].mxu1 }
 0x416   : > { %v1849_v16 = vpop.f32.mrb[5].mxu1 }
 0x417   : > { %v947_v17 = vpop.f32.mrb[6].mxu1 }
 0x418   : > { %v951_v18 = vpack.c.bf16 %v947_v17, %v944_v15  ;;  %v1850_v19 = vpop.f32.mrb[7].mxu1 }
 0x419   : > { %v1998_v19 = vld [vmem:[%s2615_s7 + $0x28] sm:$0xff]  }
 0x41a   : > { %1868 = vmatmul.mubr.bf16.vlgmr.msra.gmra.mrb[8].mxu1 %v951_v18 }
 0x41b   : > { %1758 = vmatpush3.bf16.msra.mxu1 %v1988_v43  ;;  %v1690_v43 = vld [vmem:[%s2616_s8] ss:$0 sm:$0xff] }
 0x41c   : > { %1759 = vmatprep.subr.bf16.mxu1 %v1989_v44 }
 0x41f   : > { %1760 = vmatpush3.bf16.msra.mxu1 %v1990_v45 }
 0x420   : > { %1761 = vmatprep.subr.bf16.mxu1 %v1991_v46 }
 0x423   : > { %1762 = vmatpush3.bf16.msra.mxu1 %v1992_v47 }
 0x424   : > { %1763 = vmatprep.subr.bf16.mxu1 %v1993_v48 }
 0x427   : > { %1764 = vmatpush3.bf16.msra.mxu1 %v1994_v49 }
 0x428   : > { %1765 = vmatprep.subr.bf16.mxu1 %v1995_v50 }
 0x42b   : > { %1766 = vmatpush3.bf16.msra.mxu1 %v1996_v51 }
 0x42c   : > { %1767 = vmatprep.subr.bf16.mxu1 %v1997_v52 }
 0x42f   : > { %1768 = vmatpush3.bf16.msra.mxu1 %v1998_v19 }
 0x430   : > { %1769 = vmatprep.subr.bf16.mxu1 %v1999_v20 }
 0x433   : > { %1770 = vmatpush3.bf16.msra.mxu1 %v2000_v21 }
 0x4ed   : > { %v1050_v1 = vpop.f32.mrb[8].mxu1 }
 0x4ee   : > { %v2419_v22 = vadd.f32 %v1050_v1, %v2281_v9  ;;  %v1869_v23 = vpop.f32.mrb[9].mxu1  ;;  %v1968_v9 = vld [vmem:[%s2613_s5 + $0x14] ss:$8 sps:$4 sm:$0xff]  }
 0x4ef   : > { %v1053_v24 = vpop.f32.mrb[10].mxu1  ;;  %1215 = vmatprep.subr.bf16.mxu0 %v1968_v9  ;;  %v2001_v1 = vld [vmem:[%s2615_s7 + $0x78] sm:$0xff]   ;;  %v1123_v23 = vlaneseq }
 0x4f0   : > { %v2422_v25 = vadd.f32 %v1053_v24, %v2283_v10  ;;  %1059 = vadd.xlane.f32.xlu0 %v2419_v22  ;;  %v1870_v26 = vpop.f32.mrb[11].mxu1  ;;  %v1066_v27 = vmul.f32 %v2419_v22, %v2419_v22  ;;  %v1966_v10 = vld [vmem:[%s2613_s5 + $0x10] ss:$8 sps:$4 sm:$0xff]   ;;  %1771 = vmatprep.subr.bf16.mxu1 %v2001_v1 }
 0x4f1   : > { %1216 = vmatpush1.bf16.msra.mxu0 %v1966_v10  ;;  %v1124_v24 = vshrl.u32 %v1123_v23, 7  ;;  %v1121_v26 = vld [vmem:[%s2614_s6] sm:$0x3] }
 0x4f2   : > { %1061 = vadd.xlane.f32.xlu1 %v2422_v25  ;;  %v1067_v28 = vmul.f32 %v2422_v25, %v2422_v25  ;;  %1217 = vmatprep.subr.bf16.mxu0 %v1971_v29 }
 0x4f4   : > { %1068 = vadd.xlane.f32.xlu0 %v1066_v27  ;;  %v1129_v27 = vsub.s32 1, %v1124_v24 }
 0x4f5   : > { %1218 = vmatpush1.bf16.msra.mxu0 %v1969_v30 }
 0x4f6   : > { %1070 = vadd.xlane.f32.xlu1 %v1067_v28  ;;  %1219 = vmatprep.subr.bf16.mxu0 %v1974_v31  ;;  %v1130_v9 = vrot.slane %v1121_v26, %v1129_v27 }
 0x4f9   : > { %1220 = vmatpush1.bf16.msra.mxu0 %v1972_v32 }
 0x4fa   : > { %1221 = vmatprep.subr.bf16.mxu0 %v1977_v34 }
 0x4fd   : > { %1222 = vmatpush1.bf16.msra.mxu0 %v1975_v33 }
 0x4fe   : > { %1223 = vmatprep.subr.bf16.mxu0 %v1980_v35 }
 0x501   : > { %1224 = vmatpush1.bf16.msra.mxu0 %v1978_v37 }
 0x502   : > { %1225 = vmatprep.subr.bf16.mxu0 %v1983_v38 }
 0x505   : > { %1226 = vmatpush1.bf16.msra.mxu0 %v1981_v39 }
 0x506   : > { %1227 = vmatprep.subr.bf16.mxu0 %v1986_v40 }
 0x509   : > { %1228 = vmatpush1.bf16.msra.mxu0 %v1984_v41 }
 0x57d   : > { %v1060_v53 = vpop.xlane.xlu0 %1059 }
 0x57e   : > { %v1064_v54 = vmul.f32 0.0078125, %v1060_v53 }
 0x57f   : > { %v1062_v55 = vpop.xlane.xlu1 %1061 }
 0x580   : > { %v1065_v56 = vmul.f32 0.0078125, %v1062_v55  ;;  %v1074_v58 = vmul.f32 %v1064_v54, %v1064_v54  ;;  %v1078_v4 = vsub.f32 %v2419_v22, %v1064_v54  ;;  %v2002_v22 = vld [vmem:[%s2615_s7 + $0x38] sm:$0xff]  }
 0x581   : > { %v1069_v57 = vpop.xlane.xlu0 %1068  ;;  %1772 = vmatpush3.bf16.msra.mxu1 %v2002_v22 }
 0x582   : > { %v1072_v59 = vmul.f32 0.0078125, %v1069_v57  ;;  %v1075_v61 = vmul.f32 %v1065_v56, %v1065_v56  ;;  %v1079_v7 = vsub.f32 %v2422_v25, %v1065_v56  ;;  %v1125_v25 = vsub.s32 0, %v1124_v24 }
 0x583   : > { %v1071_v60 = vpop.xlane.xlu1 %1070 }
 0x584   : > { %v1076_v62 = vsub.f32 %v1072_v59, %v1074_v58  ;;  %v1073_v63 = vmul.f32 0.0078125, %v1071_v60  ;;  %v1126_v28 = vrot.slane %v1121_v26, %v1125_v25 }
 0x586   : > { %v1080_v0 = vadd.f32 1e-05, %v1076_v62  ;;  %v1077_v2 = vsub.f32 %v1073_v63, %v1075_v61 }
 0x588   : > { %2011 = vrsqrt.f32 %v1080_v0  ;;  %v1081_v3 = vadd.f32 1e-05, %v1077_v2 }
 0x58a   : > { %2013 = vrsqrt.f32 %v1081_v3 }
 0x592   : > { %v2012_v5 = vpop.eup %2011 }
 0x593   : > { %v1084_v8 = vmul.f32 %v2012_v5, %v1078_v4 }
 0x594   : > { %v2014_v11 = vpop.eup %2013 }
 0x595   : > { %v1085_v12 = vmul.f32 %v2014_v11, %v1079_v7  ;;  %v1093_v13 = vmul.f32 %v1672_v6, %v1084_v8 }
 0x597   : > { %v1094_v15 = vmul.f32 %v1672_v6, %v1085_v12  ;;  %v1102_v16 = vadd.f32 %v1673_v14, %v1093_v13 }
 0x599   : > { %v1103_v17 = vadd.f32 %v1673_v14, %v1094_v15 }
 0x59b   : > { %v1104_v18 = vpack.c.bf16 %v1103_v17, %v1102_v16 }
 0x59d   : > { %1246 = vmatmul.mubr.bf16.vlgmr.msra.gmra.mrb[12].mxu0 %v1104_v18 }
 0x670   : > { %v1247_v10 = vpop.f32.mrb[12].mxu0 }
 0x671   : > { %v1248_v29 = vadd.f32 %v1247_v10, %v1126_v28  ;;  %v1249_v30 = vpop.f32.mrb[13].mxu0 }
 0x672   : > { %v1250_v31 = vadd.f32 %v1249_v30, %v1130_v9  ;;  %v1251_v32 = vpop.f32.mrb[14].mxu0 }
 0x673   : > { %v1252_v33 = vadd.f32 %v1251_v32, %v1126_v28  ;;  %v1253_v34 = vpop.f32.mrb[15].mxu0  ;;  %v1256_v36 = vmax.f32 %v1248_v29, 0.0 }
 0x674   : > { %v1254_v35 = vadd.f32 %v1253_v34, %v1130_v9  ;;  %v1257_v38 = vmax.f32 %v1250_v31, 0.0 }
 0x675   : > { %v1258_v37 = vmax.f32 %v1252_v33, 0.0 }
 0x676   : > { %v1259_v39 = vmax.f32 %v1254_v35, 0.0 }
 0x677   : > { %v1260_v40 = vpack.c.bf16 %v1258_v37, %v1256_v36 }
 0x678   : > { %v1261_v41 = vpack.c.bf16 %v1259_v39, %v1257_v38 }
 0x67a   : > { %1429 = vmatprep.mubr.bf16.mxu1 %v1261_v41 }
 0x67b   : > { %1430 = vmatmul.mubr.bf16.vlgmr.msra.gmra.mrb[12].mxu1 %v1260_v40 }
 0x74e   : > { %v1773_v42 = vpop.f32.mrb[12].mxu1 }
 0x74f   : > { %v1774_v44 = vpop.f32.mrb[13].mxu1 }
 0x750   : > { %v1775_v45 = vadd.f32 %v1774_v44, %v1773_v42  ;;  %v1776_v46 = vpop.f32.mrb[14].mxu1 }
 0x751   : > { %v1777_v47 = vpop.f32.mrb[15].mxu1 }
 0x752   : > { %v1432_v48 = vadd.f32 %v1775_v45, %v1690_v43  ;;  %v1778_v49 = vadd.f32 %v1777_v47, %v1776_v46 }
 0x754   : > { %v1435_v50 = vadd.f32 %v1778_v49, %v1690_v43  ;;  %v1438_v51 = vadd.f32 %v1432_v48, %v1102_v16 }
 0x756   : > { %1440 = vadd.xlane.f32.xlu0 %v1438_v51  ;;  %v2534_v52 = vadd.f32 %v1435_v50, %v1103_v17  ;;  %v1446_v53 = vmul.f32 %v1438_v51, %v1438_v51 }
 0x758   : > { %1442 = vadd.xlane.f32.xlu1 %v2534_v52  ;;  %v1447_v54 = vmul.f32 %v2534_v52, %v2534_v52 }
 0x75a   : > { %1448 = vadd.xlane.f32.xlu0 %v1446_v53 }
 0x75c   : > { %1450 = vadd.xlane.f32.xlu1 %v1447_v54 }
 0x75d   : > { %2032 = shalt.err (!%p2029_p5)
}
 0x75e   : > { %s2033_s26 = scalar_lea.hbm %s2544_s22, 256  ;;  %s2037_s20 = scalar_lea.hbm %s2622_s14, 512 }
 0x75f   : > { %p2034_p6 = scmp.ne.s32.totalorder %s2544_s22, %s2033_s26  ;;  %p2038_p10 = scmp.lt.u32.totalorder %s2544_s22, %s2622_s14 }
 0x760   : > { %p2039_p11 = scmp.lt.u32.totalorder %s2037_s20, %s2033_s26  ;;  %p2041_p13 = scmp.lt.u32.totalorder %s2033_s26, %s2544_s22 }
 0x761   : > { %p2035_p7 = pnand %p2034_p6, %p2220_p4 }
 0x762   : > { %p2040_p12 = por %p2039_p11, %p2038_p10 }
 0x763   : > { %p2036_p9 = pneg %p2035_p7 }
 0x764   : > { %p2042_p0 = por %p2041_p13, %p2040_p12 }
 0x766   : > { %p2043_p1 = pnand %p2042_p0, %p2036_p9 }
 0x768   : > { %2046 = shalt.err (!%p2043_p1)
}
 0x769   : > { %s2103_s25 = smov 128   ;;  %s2104_s21 = smov 8   ;;  %v1707_v8 = vld [vmem:[%s2619_s11] ss:$0 sm:$0xff] }
 0x76a   : > { %1871 = dma.vmem_to_hbm [thread:$0]  (%p2220_p4), %s2546_s27, 256, %s2544_s22, %s2550_s15, %s2103_s25, %s2103_s25, %s2104_s21  }
 0x76b   : > { %v1708_v14 = vld [vmem:[%s2620_s12] ss:$0 sm:$0xff]  ;;  %s2639_s17 = sshll.u32 %s2258_s19, 4 }
 0x76c   : > { %s502_s28 = scalar_lea.vmem %s2621_s13, %s2639_s17 }
 0x7e3   : > { %v1441_v55 = vpop.xlane.xlu0 %1440 }
 0x7e4   : > { %v1444_v56 = vmul.f32 0.0078125, %v1441_v55 }
 0x7e5   : > { %v1443_v57 = vpop.xlane.xlu1 %1442 }
 0x7e6   : > { %v1445_v58 = vmul.f32 0.0078125, %v1443_v57  ;;  %v1454_v60 = vmul.f32 %v1444_v56, %v1444_v56  ;;  %v1458_v6 = vsub.f32 %v1438_v51, %v1444_v56 }
 0x7e7   : > { %v1449_v59 = vpop.xlane.xlu0 %1448 }
 0x7e8   : > { %v1452_v61 = vmul.f32 0.0078125, %v1449_v59  ;;  %v1455_v63 = vmul.f32 %v1445_v58, %v1445_v58  ;;  %v1459_v11 = vsub.f32 %v2534_v52, %v1445_v58 }
 0x7e9   : > { %v1451_v62 = vpop.xlane.xlu1 %1450 }
 0x7ea   : > { %v1456_v0 = vsub.f32 %v1452_v61, %v1454_v60  ;;  %v1453_v2 = vmul.f32 0.0078125, %v1451_v62 }
 0x7ec   : > { %v1460_v3 = vadd.f32 1e-05, %v1456_v0  ;;  %v1457_v4 = vsub.f32 %v1453_v2, %v1455_v63 }
 0x7ee   : > { %2015 = vrsqrt.f32 %v1460_v3  ;;  %v1461_v5 = vadd.f32 1e-05, %v1457_v4 }
 0x7f0   : > { %2017 = vrsqrt.f32 %v1461_v5 }
 0x7f8   : > { %v2016_v7 = vpop.eup %2015 }
 0x7f9   : > { %v1464_v12 = vmul.f32 %v2016_v7, %v1458_v6 }
 0x7fa   : > { %v2018_v13 = vpop.eup %2017 }
 0x7fb   : > { %v1473_v15 = vmul.f32 %v1707_v8, %v1464_v12  ;;  %v1465_v16 = vmul.f32 %v2018_v13, %v1459_v11 }
 0x7fd   : > { %v1482_v17 = vadd.f32 %v1708_v14, %v1473_v15  ;;  %v1474_v18 = vmul.f32 %v1707_v8, %v1465_v16 }
 0x7ff   : > { %1484 = vst [vmem:[%s502_s28] sm:$0xff] %v1482_v17  ;;  %v1483_v19 = vadd.f32 %v1708_v14, %v1474_v18 }
 0x801   : > { %1485 = vst [vmem:[%s502_s28 + $0x8] sm:$0xff] %v1483_v19 }
 0x802 PF: > { %p1877_p4 = scmp.ge.s32.totalorder %s2097_s18, 2  ;;  %s1544_s24 = sand.u32 1, %s2077_s29  }
 0x803   : > { %s1545_s16 = scalar_lea.sflag [#allocation5], %s1544_s24 }
 0x804   : > { %p1874_p2 = pnand %p1877_p4, %p2227_p8 }
 0x806   : > { %2072 = dma.done.wait (!%p1874_p2), %s1545_s16, 256  }
 0x807   : > { %2074 = vsyncadd (!%p1874_p2), %s1545_s16, 4294967040  ;;  %s28_s18 = sadd.s32 1, %s2097_s18   ;;  %s2641_s19 = sld [smem:[#allocation7_spill]] }
 0x808   : > { %p25_p3 = scmp.ge.s32.totalorder %s28_s18, 4   ;;  %s2642_s15 = sld [smem:[#allocation11_spill]] }
 0x809   : > { %s2643_s16 = sld [smem:[#allocation8_spill]]  ;;  %s2644_s17 = sld [smem:[#allocation9_spill]] }
 0x80a   : > { %s2645_s29 = smov %s2081_s30  ;;  %27 = sbr.rel (!%p25_p3) target bundleno = 6 (0x6), region = 124 }
 0x80d   : > { %s2646_s30 = smov %s2641_s19 }
 0x811   :  { %1550 = vsyncpa [#allocation5], 1 }
 0x812   :  { %1552 = vsyncpa [#allocation5 + $0x1], 1 }

</bundles_post_ra>
